<compile_context>
chip_gen: v7x
topology: tpu7x:2x2x1
jax: 0.10.0
libtpu: 0.0.40
codegen_flags: <defaults>
</compile_context>

<pallas_src>
import functools

import numpy as np

import jax
import jax.numpy as jnp
from jax.experimental import pallas as pl
from jax.experimental.pallas import tpu as pltpu

EPS = 1e-5
EXPANSION = 4


def _round_up(x, m):
    return ((x + m - 1) // m) * m


# ----------------------------------------------------------------------------
# The fused Bottleneck kernel (one image per grid step).
# ----------------------------------------------------------------------------
def _bottleneck_kernel(*refs, H, W, Ho, Wo, stride, has_sc_conv, fuse_sc, cdt):
    if has_sc_conv and not fuse_sc:
        (x_ref, w1_ref, b1_ref, w2_ref, b2_ref, w3_ref, b3_ref, wsc_ref,
         o_ref, y1pad_ref) = refs
    else:
        (x_ref, w1_ref, b1_ref, w2_ref, b2_ref, w3_ref, b3_ref,
         o_ref, y1pad_ref) = refs
        wsc_ref = None

    Cp = y1pad_ref.shape[-1]              # lane-padded hidden width (mult 128)
    Cin = x_ref.shape[-1]

    # ---- stage 1: 1x1 conv (folded bn1) + relu --------------------------------
    x_flat = x_ref[0]                                      # (H*W, Cin), cdt
    y1 = jnp.dot(x_flat, w1_ref[...], preferred_element_type=jnp.float32)
    y1 = jnp.maximum(y1 + b1_ref[...], 0.0)

    # Zero only the 1-wide halo ring each step (interior is fully overwritten;
    # scratch is per-core so this stays correct under a core-split grid axis).
    zrow = jnp.zeros((1, W + 2, Cp), cdt)
    y1pad_ref[0:1] = zrow
    y1pad_ref[H + 1:H + 2] = zrow
    zcol = jnp.zeros((H, 1, Cp), cdt)
    y1pad_ref[1:H + 1, 0:1, :] = zcol
    y1pad_ref[1:H + 1, W + 1:W + 2, :] = zcol
    y1pad_ref[1:H + 1, 1:W + 1, :] = y1.reshape(H, W, Cp).astype(cdt)

    # ---- stage 2: 3x3 conv (pad=1, stride) (folded bn2) + relu -----------------
    # For each dx: one column read of the padded scratch, 3 row-shifted views
    # concatenated along channels (lane-aligned, Cp % 128 == 0), ONE dot with
    # K = 3*Cp.  Accumulation stays in a traced f32 value (no scratch RMW).
    acc = None
    for dx in range(3):
        if stride == 1:
            col = y1pad_ref[:, dx:dx + W, :]               # (H+2, W, Cp)
            taps = [col[dy:dy + H].reshape(H * W, Cp) for dy in range(3)]
        else:
            colf = y1pad_ref[:, dx:dx + stride * (Wo - 1) + 1, :]
            col = jax.lax.slice(colf, (0, 0, 0), colf.shape, (1, stride, 1))
            taps = [jax.lax.slice(col, (dy, 0, 0),
                                  (dy + stride * (Ho - 1) + 1, Wo, Cp),
                                  (stride, 1, 1)).reshape(Ho * Wo, Cp)
                    for dy in range(3)]
        p = jnp.concatenate(taps, axis=-1)                 # (Ho*Wo, 3*Cp)
        c = jnp.dot(p, w2_ref[dx], preferred_element_type=jnp.float32)
        acc = c if acc is None else acc + c
    y2 = jnp.maximum(acc + b2_ref[...], 0.0).astype(cdt)   # (Ho*Wo, Cp)

    # ---- stage 3: 1x1 conv (folded bn3) + shortcut + add + relu ----------------
    if has_sc_conv:
        if stride == 1:
            xs = x_flat
        else:
            xs = jax.lax.slice(
                x_flat.reshape(H, W, Cin), (0, 0, 0),
                (stride * (Ho - 1) + 1, stride * (Wo - 1) + 1, Cin),
                (stride, stride, 1)).reshape(Ho * Wo, Cin)
        if fuse_sc:
            # One dot: [y2 | xs] @ [w3; wsc]  (Cin % 128 == 0 -> aligned concat)
            op = jnp.concatenate([y2, xs.astype(cdt)], axis=-1)
            out = jnp.dot(op, w3_ref[...], preferred_element_type=jnp.float32)
        else:
            out = (jnp.dot(y2, w3_ref[...], preferred_element_type=jnp.float32)
                   + jnp.dot(xs.astype(cdt), wsc_ref[...],
                             preferred_element_type=jnp.float32))
        out = out + b3_ref[...]                            # b3 + bsc (folded)
    else:
        # Identity shortcut: plain residual add, no matmul.
        out = jnp.dot(y2, w3_ref[...], preferred_element_type=jnp.float32)
        out = out + b3_ref[...] + x_flat.astype(jnp.float32)

    o_ref[0] = jnp.maximum(out, 0.0).astype(o_ref.dtype)


# ----------------------------------------------------------------------------
# Host-side parameter preparation: fold BN scales into weights, pad the hidden
# channel dim to a multiple of 128, stack the 3x3 weights for K-grouped taps,
# optionally stack [w3; wsc] for the fused shortcut dot, fold biases.
# ----------------------------------------------------------------------------
def _prepare_params(p, compute_dtype):
    cin = p["w1"].shape[0]
    cmid = p["w1"].shape[1]
    cout = p["w3"].shape[1]
    cp = _round_up(cmid, 128)
    pad_c = cp - cmid

    w1 = jnp.pad(p["w1"] * p["s1"][None, :], ((0, 0), (0, pad_c)))
    b1 = jnp.pad(p["b1"], ((0, pad_c),)).reshape(1, cp)
    w2 = jnp.pad(p["w2"] * p["s2"][None, None, None, :],
                 ((0, 0), (0, 0), (0, pad_c), (0, pad_c)))
    # Group the 3 dy taps along the contraction dim:
    #   w2g[dx][dy*cp + ci, co] == w2[dy, dx, ci, co]    ->  K = 3*cp per dot.
    w2g = jnp.concatenate([w2[0], w2[1], w2[2]], axis=1)        # (3, 3*cp, cp)
    b2 = jnp.pad(p["b2"], ((0, pad_c),)).reshape(1, cp)
    w3 = jnp.pad(p["w3"] * p["s3"][None, :], ((0, pad_c), (0, 0)))
    b3 = p["b3"].reshape(1, cout)

    has_sc_conv = "wsc" in p
    fuse_sc = has_sc_conv and (cin % 128 == 0)

    prep = {
        "w1": w1.astype(compute_dtype), "b1": b1.astype(jnp.float32),
        "w2g": w2g.astype(compute_dtype), "b2": b2.astype(jnp.float32),
        "b3": b3.astype(jnp.float32),
    }
    if has_sc_conv:
        wsc = p["wsc"] * p["ssc"][None, :]
        prep["b3"] = (b3 + p["bsc"].reshape(1, cout)).astype(jnp.float32)
        if fuse_sc:
            prep["w3"] = jnp.concatenate([w3, wsc], axis=0).astype(compute_dtype)
        else:
            prep["w3"] = w3.astype(compute_dtype)
            prep["wsc"] = wsc.astype(compute_dtype)
    else:
        prep["w3"] = w3.astype(compute_dtype)
    return prep, has_sc_conv, fuse_sc


def _vmem_limit_bytes(prep, H, W, Ho, Wo, Cin, Cp, Cout, cdt, odt):
    """Derive a VMEM limit from the actual block sizes (capped by the chip)."""
    cb = np.dtype(cdt).itemsize
    ob = np.dtype(odt).itemsize
    w_bytes = sum(int(v.size) * v.dtype.itemsize for v in prep.values())
    io_bytes = H * W * Cin * cb + Ho * Wo * Cout * ob
    scratch = (H + 2) * (W + 2) * Cp * cb
    temps = Ho * Wo * (3 * Cp * cb + 3 * Cp * 4 + (Cp + Cin) * cb + 2 * Cout * 4)
    need = 2 * (w_bytes + io_bytes) + scratch + temps + (8 << 20)
    cap = 100 << 20
    try:
        cap = int(pltpu.get_tpu_info().vmem_capacity_bytes) * 3 // 4
    except Exception:
        pass
    return int(min(max(need, 32 << 20), max(cap, 32 << 20)))


# ----------------------------------------------------------------------------
# Full Bottleneck forward (NCHW in, NCHW out).
# ----------------------------------------------------------------------------
def bottleneck_forward(x_nchw, params, stride=1, compute_dtype=jnp.bfloat16,
                       out_dtype=None):
    if out_dtype is None:
        out_dtype = x_nchw.dtype
    # HBM-facing activations are carried in the compute dtype (bf16 fast path).
    x = jnp.transpose(x_nchw, (0, 2, 3, 1)).astype(compute_dtype)      # NHWC
    N, H, W, Cin = x.shape
    Ho = (H - 1) // stride + 1
    Wo = (W - 1) // stride + 1

    prep, has_sc_conv, fuse_sc = _prepare_params(params, compute_dtype)
    Cp = prep["w1"].shape[1]
    Cout = prep["b3"].shape[1]
    if not has_sc_conv:
        assert stride == 1 and Cin == Cout, "identity shortcut shape mismatch"

    x_flat = x.reshape(N, H * W, Cin)        # free reshape outside the kernel

    def _wspec(shape):
        return pl.BlockSpec(shape, lambda n, _r=len(shape): (0,) * _r)

    in_specs = [
        pl.BlockSpec((1, H * W, Cin), lambda n: (n, 0, 0)),
        _wspec(prep["w1"].shape), _wspec(prep["b1"].shape),
        _wspec(prep["w2g"].shape), _wspec(prep["b2"].shape),
        _wspec(prep["w3"].shape), _wspec(prep["b3"].shape),
    ]
    args = [x_flat, prep["w1"], prep["b1"], prep["w2g"], prep["b2"],
            prep["w3"], prep["b3"]]
    if has_sc_conv and not fuse_sc:
        in_specs.append(_wspec(prep["wsc"].shape))
        args.append(prep["wsc"])

    kernel = functools.partial(
        _bottleneck_kernel, H=H, W=W, Ho=Ho, Wo=Wo, stride=stride,
        has_sc_conv=has_sc_conv, fuse_sc=fuse_sc, cdt=compute_dtype)

    vmem_limit = _vmem_limit_bytes(prep, H, W, Ho, Wo, Cin, Cp, Cout,
                                   compute_dtype, out_dtype)

    out = pl.pallas_call(
        kernel,
        out_shape=jax.ShapeDtypeStruct((N, Ho * Wo, Cout), out_dtype),
        grid_spec=pltpu.PrefetchScalarGridSpec(
            num_scalar_prefetch=0,
            grid=(N,),
            in_specs=in_specs,
            out_specs=pl.BlockSpec((1, Ho * Wo, Cout), lambda n: (n, 0, 0)),
            scratch_shapes=[
                pltpu.VMEM((H + 2, W + 2, Cp), compute_dtype),   # padded y1
            ]),
        compiler_params=pltpu.CompilerParams(
            dimension_semantics=("parallel",),
            vmem_limit_bytes=vmem_limit),
    )(*args)

    out = out.reshape(N, Ho, Wo, Cout)
    return jnp.transpose(out, (0, 3, 1, 2))                          # NCHW


# ----------------------------------------------------------------------------
# Parameter construction (deterministic, synthetic); BN kept as (scale, bias).
# ----------------------------------------------------------------------------
def _bn_params(key, c):
    kg, kb, km, kv = jax.random.split(key, 4)
    gamma = jax.random.uniform(kg, (c,), minval=0.5, maxval=1.5)
    beta = 0.1 * jax.random.normal(kb, (c,))
    mean = 0.1 * jax.random.normal(km, (c,))
    var = jax.random.uniform(kv, (c,), minval=0.5, maxval=1.5)
    scale = gamma / jnp.sqrt(var + EPS)
    bias = beta - mean * scale
    return scale.astype(jnp.float32), bias.astype(jnp.float32)


def init_bottleneck_params(key, in_planes, block_planes, stride):
    cout = EXPANSION * block_planes
    keys = jax.random.split(key, 8)
    p = {}
    p["w1"] = (jax.random.normal(keys[0], (in_planes, block_planes))
               / jnp.sqrt(in_planes)).astype(jnp.float32)
    p["s1"], p["b1"] = _bn_params(keys[1], block_planes)
    p["w2"] = (jax.random.normal(keys[2], (3, 3, block_planes, block_planes))
               / jnp.sqrt(9.0 * block_planes)).astype(jnp.float32)
    p["s2"], p["b2"] = _bn_params(keys[3], block_planes)
    p["w3"] = (jax.random.normal(keys[4], (block_planes, cout))
               / jnp.sqrt(block_planes)).astype(jnp.float32)
    p["s3"], p["b3"] = _bn_params(keys[5], cout)
    if in_planes != cout or stride != 1:
        p["wsc"] = (jax.random.normal(keys[6], (in_planes, cout))
                    / jnp.sqrt(in_planes)).astype(jnp.float32)
        p["ssc"], p["bsc"] = _bn_params(keys[7], cout)
    return p


# ----------------------------------------------------------------------------
# Pure-JAX reference (inference-mode BN) for verification.
# ----------------------------------------------------------------------------
def bottleneck_reference(x_nchw, p, stride=1):
    x = jnp.transpose(x_nchw, (0, 2, 3, 1)).astype(jnp.float32)
    y1 = jnp.maximum(
        jnp.einsum("nhwc,cd->nhwd", x, p["w1"]) * p["s1"] + p["b1"], 0.0)
    N, H, W, _ = y1.shape
    xp = jnp.pad(y1, ((0, 0), (1, 1), (1, 1), (0, 0)))
    cm = p["w2"].shape[-1]
    acc = jnp.zeros((N, H, W, cm), jnp.float32)
    for dy in range(3):
        for dx in range(3):
            acc = acc + jnp.einsum("nhwc,cd->nhwd",
                                   xp[:, dy:dy + H, dx:dx + W, :],
                                   p["w2"][dy, dx])
    y2 = jnp.maximum(acc * p["s2"] + p["b2"], 0.0)[:, ::stride, ::stride, :]
    y3 = jnp.einsum("nhwc,cd->nhwd", y2, p["w3"]) * p["s3"] + p["b3"]
    xs = x[:, ::stride, ::stride, :]
    if "wsc" in p:
        sc = jnp.einsum("nhwc,cd->nhwd", xs, p["wsc"]) * p["ssc"] + p["bsc"]
    else:
        sc = xs
    return jnp.transpose(jnp.maximum(y3 + sc, 0.0), (0, 3, 1, 2))


if __name__ == "__main__":
    key = jax.random.PRNGKey(0)
    k_x, k_p1, k_p2, k_p3 = jax.random.split(key, 4)

    # Tolerances absorb the difference between in-kernel matmuls and the
    # default-precision reference einsums on TPU.

    # --- Config A: projection shortcut, f32 compute (tight check). ----------
    N, in_planes, H, W = 2, 4, 16, 16
    block_planes, stride = 4, 1
    x = jax.random.normal(k_x, (N, in_planes, H, W), dtype=jnp.float32)
    params = init_bottleneck_params(k_p1, in_planes, block_planes, stride)
    out = jax.block_until_ready(
        bottleneck_forward(x, params, stride=stride, compute_dtype=jnp.float32))
    ref = bottleneck_reference(x, params, stride=stride)
    assert out.shape == (N, EXPANSION * block_planes, H, W)
    assert jnp.allclose(out, ref, atol=5e-2, rtol=5e-2), "config A f32 mismatch"

    # --- Config A again on the bf16 fast path (default compute dtype). ------
    out_bf = jax.block_until_ready(bottleneck_forward(x, params, stride=stride))
    assert jnp.allclose(out_bf, ref, atol=2e-1, rtol=1e-1), \
        "config A bf16 mismatch"

    # --- Config B: identity shortcut (in_planes == expansion*block_planes). -
    in_planes_b = EXPANSION * block_planes
    x_b = jax.random.normal(k_x, (N, in_planes_b, H, W), dtype=jnp.float32)
    params_b = init_bottleneck_params(k_p2, in_planes_b, block_planes, 1)
    out_b = jax.block_until_ready(
        bottleneck_forward(x_b, params_b, stride=1, compute_dtype=jnp.float32))
    ref_b = bottleneck_reference(x_b, params_b, stride=1)
    assert out_b.shape == (N, EXPANSION * block_planes, H, W)
    assert jnp.allclose(out_b, ref_b, atol=5e-2, rtol=5e-2), \
        "config B f32 mismatch"

    # --- Config C: projection shortcut with Cin % 128 == 0 ------------------
    #     (exercises the fused [y2 | x] @ [w3; wsc] stage-3 dot).
    in_planes_c, H_c, W_c = 128, 8, 8
    x_c = jax.random.normal(k_x, (N, in_planes_c, H_c, W_c), dtype=jnp.float32)
    params_c = init_bottleneck_params(k_p3, in_planes_c, block_planes, 1)
    out_c = jax.block_until_ready(
        bottleneck_forward(x_c, params_c, stride=1, compute_dtype=jnp.float32))
    ref_c = bottleneck_reference(x_c, params_c, stride=1)
    assert out_c.shape == (N, EXPANSION * block_planes, H_c, W_c)
    assert jnp.allclose(out_c, ref_c, atol=5e-2, rtol=5e-2), \
        "config C f32 mismatch"

    print("KERNEL_OK")
</pallas_src>

<mosaic_0001>
module attributes {stable_mosaic.version = 11 : i64} {
  func.func @_bottleneck_kernel(%arg0: i32, %arg1: memref<1x256x4xf32, #tpu.memory_space<vmem>>, %arg2: memref<4x128xf32, #tpu.memory_space<vmem>>, %arg3: memref<1x128xf32, #tpu.memory_space<vmem>>, %arg4: memref<3x384x128xf32, #tpu.memory_space<vmem>>, %arg5: memref<1x128xf32, #tpu.memory_space<vmem>>, %arg6: memref<128x16xf32, #tpu.memory_space<vmem>>, %arg7: memref<1x16xf32, #tpu.memory_space<vmem>>, %arg8: memref<4x16xf32, #tpu.memory_space<vmem>>, %arg9: memref<1x256x16xf32, #tpu.memory_space<vmem>>, %arg10: memref<18x18x128xf32, #tpu.memory_space<vmem>>) attributes {dimension_semantics = [#tpu.dimension_semantics<parallel>], iteration_bounds = array<i64: 2>, scalar_prefetch = 0 : i64, scratch_operands = 1 : i64, tpu.core_type = #tpu.core_type<tc>, window_params = [{transform_indices = @transform_0, window_bounds = array<i64: 1, 256, 4>}, {pipeline_mode = #tpu.pipeline_mode<synchronous>, transform_indices = @transform_1, window_bounds = array<i64: 4, 128>}, {pipeline_mode = #tpu.pipeline_mode<synchronous>, transform_indices = @transform_2, window_bounds = array<i64: 1, 128>}, {pipeline_mode = #tpu.pipeline_mode<synchronous>, transform_indices = @transform_3, window_bounds = array<i64: 3, 384, 128>}, {pipeline_mode = #tpu.pipeline_mode<synchronous>, transform_indices = @transform_4, window_bounds = array<i64: 1, 128>}, {pipeline_mode = #tpu.pipeline_mode<synchronous>, transform_indices = @transform_5, window_bounds = array<i64: 128, 16>}, {pipeline_mode = #tpu.pipeline_mode<synchronous>, transform_indices = @transform_6, window_bounds = array<i64: 1, 16>}, {pipeline_mode = #tpu.pipeline_mode<synchronous>, transform_indices = @transform_7, window_bounds = array<i64: 4, 16>}, {transform_indices = @transform_8, window_bounds = array<i64: 1, 256, 16>}]} {
    %c0 = arith.constant 0 : index
    %c0_0 = arith.constant 0 : index
    %c0_1 = arith.constant 0 : index
    %0 = vector.load %arg1[%c0, %c0_0, %c0_1] : memref<1x256x4xf32, #tpu.memory_space<vmem>>, vector<1x256x4xf32>
    %1 = vector.shape_cast %0 : vector<1x256x4xf32> to vector<256x4xf32>
    %c0_2 = arith.constant 0 : index
    %c0_3 = arith.constant 0 : index
    %2 = vector.load %arg2[%c0_2, %c0_3] : memref<4x128xf32, #tpu.memory_space<vmem>>, vector<4x128xf32>
    %cst = arith.constant dense<0.000000e+00> : vector<256x128xf32>
    %3 = tpu.matmul %1, %2, %cst {dimension_numbers = #tpu.dot_dimension_numbers<[1], [0], [0], [1], [0, 0, 1, 1], [], []>} : vector<256x4xf32>, vector<4x128xf32>, vector<256x128xf32> -> vector<256x128xf32>
    %c0_4 = arith.constant 0 : index
    %c0_5 = arith.constant 0 : index
    %4 = vector.load %arg3[%c0_4, %c0_5] : memref<1x128xf32, #tpu.memory_space<vmem>>, vector<1x128xf32>
    %5 = vector.broadcast %4 : vector<1x128xf32> to vector<256x128xf32>
    %6 = arith.addf %3, %5 : vector<256x128xf32>
    %cst_6 = arith.constant 0.000000e+00 : f32
    %7 = vector.broadcast %cst_6 : f32 to vector<256x128xf32>
    %8 = arith.maximumf %6, %7 : vector<256x128xf32>
    %cst_7 = arith.constant 0.000000e+00 : f32
    %9 = vector.broadcast %cst_7 : f32 to vector<1x18x128xf32>
    %c0_8 = arith.constant 0 : index
    %c0_9 = arith.constant 0 : index
    %c0_10 = arith.constant 0 : index
    %10 = vector.load %arg10[%c0_8, %c0_9, %c0_10] : memref<18x18x128xf32, #tpu.memory_space<vmem>>, vector<1x18x128xf32>
    tpu.vector_store %arg10[%c0_8, %c0_9, %c0_10], %9 {strides = array<i32>} : memref<18x18x128xf32, #tpu.memory_space<vmem>>, vector<1x18x128xf32>,
    %c17 = arith.constant 17 : index
    %c0_11 = arith.constant 0 : index
    %c0_12 = arith.constant 0 : index
    %11 = vector.load %arg10[%c17, %c0_11, %c0_12] : memref<18x18x128xf32, #tpu.memory_space<vmem>>, vector<1x18x128xf32>
    tpu.vector_store %arg10[%c17, %c0_11, %c0_12], %9 {strides = array<i32>} : memref<18x18x128xf32, #tpu.memory_space<vmem>>, vector<1x18x128xf32>,
    %cst_13 = arith.constant 0.000000e+00 : f32
    %12 = vector.broadcast %cst_13 : f32 to vector<16x1x128xf32>
    %c1 = arith.constant 1 : index
    %c0_14 = arith.constant 0 : index
    %c0_15 = arith.constant 0 : index
    %13 = vector.load %arg10[%c1, %c0_14, %c0_15] : memref<18x18x128xf32, #tpu.memory_space<vmem>>, vector<16x1x128xf32>
    tpu.vector_store %arg10[%c1, %c0_14, %c0_15], %12 {strides = array<i32>} : memref<18x18x128xf32, #tpu.memory_space<vmem>>, vector<16x1x128xf32>,
    %c1_16 = arith.constant 1 : index
    %c17_17 = arith.constant 17 : index
    %c0_18 = arith.constant 0 : index
    %14 = vector.load %arg10[%c1_16, %c17_17, %c0_18] : memref<18x18x128xf32, #tpu.memory_space<vmem>>, vector<16x1x128xf32>
    tpu.vector_store %arg10[%c1_16, %c17_17, %c0_18], %12 {strides = array<i32>} : memref<18x18x128xf32, #tpu.memory_space<vmem>>, vector<16x1x128xf32>,
    %15 = vector.shape_cast %8 : vector<256x128xf32> to vector<16x16x128xf32>
    %c1_19 = arith.constant 1 : index
    %c1_20 = arith.constant 1 : index
    %c0_21 = arith.constant 0 : index
    %16 = vector.load %arg10[%c1_19, %c1_20, %c0_21] : memref<18x18x128xf32, #tpu.memory_space<vmem>>, vector<16x16x128xf32>
    tpu.vector_store %arg10[%c1_19, %c1_20, %c0_21], %15 {strides = array<i32>} : memref<18x18x128xf32, #tpu.memory_space<vmem>>, vector<16x16x128xf32>,
    %c0_22 = arith.constant 0 : index
    %c0_23 = arith.constant 0 : index
    %c0_24 = arith.constant 0 : index
    %17 = vector.load %arg10[%c0_22, %c0_23, %c0_24] : memref<18x18x128xf32, #tpu.memory_space<vmem>>, vector<18x16x128xf32>
    %18 = vector.extract_strided_slice %17 {offsets = [0, 0, 0], sizes = [16, 16, 128], strides = [1, 1, 1]} : vector<18x16x128xf32> to vector<16x16x128xf32>
    %19 = vector.shape_cast %18 : vector<16x16x128xf32> to vector<256x128xf32>
    %20 = vector.extract_strided_slice %17 {offsets = [1, 0, 0], sizes = [16, 16, 128], strides = [1, 1, 1]} : vector<18x16x128xf32> to vector<16x16x128xf32>
    %21 = vector.shape_cast %20 : vector<16x16x128xf32> to vector<256x128xf32>
    %22 = vector.extract_strided_slice %17 {offsets = [2, 0, 0], sizes = [16, 16, 128], strides = [1, 1, 1]} : vector<18x16x128xf32> to vector<16x16x128xf32>
    %23 = vector.shape_cast %22 : vector<16x16x128xf32> to vector<256x128xf32>
    %24 = tpu.concatenate %19, %21, %23 in 1 : vector<256x128xf32>, vector<256x128xf32>, vector<256x128xf32> -> vector<256x384xf32>
    %c0_25 = arith.constant 0 : index
    %c0_26 = arith.constant 0 : index
    %c0_27 = arith.constant 0 : index
    %25 = vector.load %arg4[%c0_25, %c0_26, %c0_27] : memref<3x384x128xf32, #tpu.memory_space<vmem>>, vector<1x384x128xf32>
    %26 = vector.shape_cast %25 : vector<1x384x128xf32> to vector<384x128xf32>
    %cst_28 = arith.constant dense<0.000000e+00> : vector<256x128xf32>
    %27 = tpu.matmul %24, %26, %cst_28 {dimension_numbers = #tpu.dot_dimension_numbers<[1], [0], [0], [1], [0, 0, 1, 1], [], []>} : vector<256x384xf32>, vector<384x128xf32>, vector<256x128xf32> -> vector<256x128xf32>
    %c0_29 = arith.constant 0 : index
    %c1_30 = arith.constant 1 : index
    %c0_31 = arith.constant 0 : index
    %28 = vector.load %arg10[%c0_29, %c1_30, %c0_31] : memref<18x18x128xf32, #tpu.memory_space<vmem>>, vector<18x16x128xf32>
    %29 = vector.extract_strided_slice %28 {offsets = [0, 0, 0], sizes = [16, 16, 128], strides = [1, 1, 1]} : vector<18x16x128xf32> to vector<16x16x128xf32>
    %30 = vector.shape_cast %29 : vector<16x16x128xf32> to vector<256x128xf32>
    %31 = vector.extract_strided_slice %28 {offsets = [1, 0, 0], sizes = [16, 16, 128], strides = [1, 1, 1]} : vector<18x16x128xf32> to vector<16x16x128xf32>
    %32 = vector.shape_cast %31 : vector<16x16x128xf32> to vector<256x128xf32>
    %33 = vector.extract_strided_slice %28 {offsets = [2, 0, 0], sizes = [16, 16, 128], strides = [1, 1, 1]} : vector<18x16x128xf32> to vector<16x16x128xf32>
    %34 = vector.shape_cast %33 : vector<16x16x128xf32> to vector<256x128xf32>
    %35 = tpu.concatenate %30, %32, %34 in 1 : vector<256x128xf32>, vector<256x128xf32>, vector<256x128xf32> -> vector<256x384xf32>
    %c1_32 = arith.constant 1 : index
    %c0_33 = arith.constant 0 : index
    %c0_34 = arith.constant 0 : index
    %36 = vector.load %arg4[%c1_32, %c0_33, %c0_34] : memref<3x384x128xf32, #tpu.memory_space<vmem>>, vector<1x384x128xf32>
    %37 = vector.shape_cast %36 : vector<1x384x128xf32> to vector<384x128xf32>
    %cst_35 = arith.constant dense<0.000000e+00> : vector<256x128xf32>
    %38 = tpu.matmul %35, %37, %cst_35 {dimension_numbers = #tpu.dot_dimension_numbers<[1], [0], [0], [1], [0, 0, 1, 1], [], []>} : vector<256x384xf32>, vector<384x128xf32>, vector<256x128xf32> -> vector<256x128xf32>
    %39 = arith.addf %27, %38 : vector<256x128xf32>
    %c0_36 = arith.constant 0 : index
    %c2 = arith.constant 2 : index
    %c0_37 = arith.constant 0 : index
    %40 = vector.load %arg10[%c0_36, %c2, %c0_37] : memref<18x18x128xf32, #tpu.memory_space<vmem>>, vector<18x16x128xf32>
    %41 = vector.extract_strided_slice %40 {offsets = [0, 0, 0], sizes = [16, 16, 128], strides = [1, 1, 1]} : vector<18x16x128xf32> to vector<16x16x128xf32>
    %42 = vector.shape_cast %41 : vector<16x16x128xf32> to vector<256x128xf32>
    %43 = vector.extract_strided_slice %40 {offsets = [1, 0, 0], sizes = [16, 16, 128], strides = [1, 1, 1]} : vector<18x16x128xf32> to vector<16x16x128xf32>
    %44 = vector.shape_cast %43 : vector<16x16x128xf32> to vector<256x128xf32>
    %45 = vector.extract_strided_slice %40 {offsets = [2, 0, 0], sizes = [16, 16, 128], strides = [1, 1, 1]} : vector<18x16x128xf32> to vector<16x16x128xf32>
    %46 = vector.shape_cast %45 : vector<16x16x128xf32> to vector<256x128xf32>
    %47 = tpu.concatenate %42, %44, %46 in 1 : vector<256x128xf32>, vector<256x128xf32>, vector<256x128xf32> -> vector<256x384xf32>
    %c2_38 = arith.constant 2 : index
    %c0_39 = arith.constant 0 : index
    %c0_40 = arith.constant 0 : index
    %48 = vector.load %arg4[%c2_38, %c0_39, %c0_40] : memref<3x384x128xf32, #tpu.memory_space<vmem>>, vector<1x384x128xf32>
    %49 = vector.shape_cast %48 : vector<1x384x128xf32> to vector<384x128xf32>
    %cst_41 = arith.constant dense<0.000000e+00> : vector<256x128xf32>
    %50 = tpu.matmul %47, %49, %cst_41 {dimension_numbers = #tpu.dot_dimension_numbers<[1], [0], [0], [1], [0, 0, 1, 1], [], []>} : vector<256x384xf32>, vector<384x128xf32>, vector<256x128xf32> -> vector<256x128xf32>
    %51 = arith.addf %39, %50 : vector<256x128xf32>
    %c0_42 = arith.constant 0 : index
    %c0_43 = arith.constant 0 : index
    %52 = vector.load %arg5[%c0_42, %c0_43] : memref<1x128xf32, #tpu.memory_space<vmem>>, vector<1x128xf32>
    %53 = vector.broadcast %52 : vector<1x128xf32> to vector<256x128xf32>
    %54 = arith.addf %51, %53 : vector<256x128xf32>
    %cst_44 = arith.constant 0.000000e+00 : f32
    %55 = vector.broadcast %cst_44 : f32 to vector<256x128xf32>
    %56 = arith.maximumf %54, %55 : vector<256x128xf32>
    %c0_45 = arith.constant 0 : index
    %c0_46 = arith.constant 0 : index
    %57 = vector.load %arg6[%c0_45, %c0_46] : memref<128x16xf32, #tpu.memory_space<vmem>>, vector<128x16xf32>
    %cst_47 = arith.constant dense<0.000000e+00> : vector<256x16xf32>
    %58 = tpu.matmul %56, %57, %cst_47 {dimension_numbers = #tpu.dot_dimension_numbers<[1], [0], [0], [1], [0, 0, 1, 1], [], []>} : vector<256x128xf32>, vector<128x16xf32>, vector<256x16xf32> -> vector<256x16xf32>
    %c0_48 = arith.constant 0 : index
    %c0_49 = arith.constant 0 : index
    %59 = vector.load %arg8[%c0_48, %c0_49] : memref<4x16xf32, #tpu.memory_space<vmem>>, vector<4x16xf32>
    %cst_50 = arith.constant dense<0.000000e+00> : vector<256x16xf32>
    %60 = tpu.matmul %1, %59, %cst_50 {dimension_numbers = #tpu.dot_dimension_numbers<[1], [0], [0], [1], [0, 0, 1, 1], [], []>} : vector<256x4xf32>, vector<4x16xf32>, vector<256x16xf32> -> vector<256x16xf32>
    %61 = arith.addf %58, %60 : vector<256x16xf32>
    %c0_51 = arith.constant 0 : index
    %c0_52 = arith.constant 0 : index
    %62 = vector.load %arg7[%c0_51, %c0_52] : memref<1x16xf32, #tpu.memory_space<vmem>>, vector<1x16xf32>
    %63 = vector.broadcast %62 : vector<1x16xf32> to vector<256x16xf32>
    %64 = arith.addf %61, %63 : vector<256x16xf32>
    %cst_53 = arith.constant 0.000000e+00 : f32
    %65 = vector.broadcast %cst_53 : f32 to vector<256x16xf32>
    %66 = arith.maximumf %64, %65 : vector<256x16xf32>
    %c0_54 = arith.constant 0 : index
    %c0_55 = arith.constant 0 : index
    %c0_56 = arith.constant 0 : index
    %67 = vector.load %arg9[%c0_54, %c0_55, %c0_56] : memref<1x256x16xf32, #tpu.memory_space<vmem>>, vector<1x256x16xf32>
    %68 = vector.shape_cast %67 : vector<1x256x16xf32> to vector<256x16xf32>
    %69 = vector.shape_cast %66 : vector<256x16xf32> to vector<1x256x16xf32>
    tpu.vector_store %arg9[%c0_54, %c0_55, %c0_56], %69 {strides = array<i32>} : memref<1x256x16xf32, #tpu.memory_space<vmem>>, vector<1x256x16xf32>,
    return
  }
  func.func @transform_0(%arg0: i32) -> (i32, i32, i32) {
    %c0_i32 = arith.constant 0 : i32
    %c0_i32_0 = arith.constant 0 : i32
    %c0_i32_1 = arith.constant 0 : i32
    return %arg0, %c0_i32, %c0_i32_0 : i32, i32, i32
  }
  func.func @transform_1(%arg0: i32) -> (i32, i32) {
    %c0_i32 = arith.constant 0 : i32
    %c0_i32_0 = arith.constant 0 : i32
    %c0_i32_1 = arith.constant 0 : i32
    return %c0_i32, %c0_i32_0 : i32, i32
  }
  func.func @transform_2(%arg0: i32) -> (i32, i32) {
    %c0_i32 = arith.constant 0 : i32
    %c0_i32_0 = arith.constant 0 : i32
    %c0_i32_1 = arith.constant 0 : i32
    return %c0_i32, %c0_i32_0 : i32, i32
  }
  func.func @transform_3(%arg0: i32) -> (i32, i32, i32) {
    %c0_i32 = arith.constant 0 : i32
    %c0_i32_0 = arith.constant 0 : i32
    %c0_i32_1 = arith.constant 0 : i32
    %c0_i32_2 = arith.constant 0 : i32
    return %c0_i32, %c0_i32_0, %c0_i32_1 : i32, i32, i32
  }
  func.func @transform_4(%arg0: i32) -> (i32, i32) {
    %c0_i32 = arith.constant 0 : i32
    %c0_i32_0 = arith.constant 0 : i32
    %c0_i32_1 = arith.constant 0 : i32
    return %c0_i32, %c0_i32_0 : i32, i32
  }
  func.func @transform_5(%arg0: i32) -> (i32, i32) {
    %c0_i32 = arith.constant 0 : i32
    %c0_i32_0 = arith.constant 0 : i32
    %c0_i32_1 = arith.constant 0 : i32
    return %c0_i32, %c0_i32_0 : i32, i32
  }
  func.func @transform_6(%arg0: i32) -> (i32, i32) {
    %c0_i32 = arith.constant 0 : i32
    %c0_i32_0 = arith.constant 0 : i32
    %c0_i32_1 = arith.constant 0 : i32
    return %c0_i32, %c0_i32_0 : i32, i32
  }
  func.func @transform_7(%arg0: i32) -> (i32, i32) {
    %c0_i32 = arith.constant 0 : i32
    %c0_i32_0 = arith.constant 0 : i32
    %c0_i32_1 = arith.constant 0 : i32
    return %c0_i32, %c0_i32_0 : i32, i32
  }
  func.func @transform_8(%arg0: i32) -> (i32, i32, i32) {
    %c0_i32 = arith.constant 0 : i32
    %c0_i32_0 = arith.constant 0 : i32
    %c0_i32_1 = arith.constant 0 : i32
    return %arg0, %c0_i32, %c0_i32_0 : i32, i32, i32
  }
}

</mosaic_0001>

<bundles_post_ra>
// kernel: tpu_custom_call.1
= control target key start
LH: loop header
LB: loop body
LE: loop exit
PB: predicated region body
PF: predicated region fallthrough
CT: control target
= control target key end

     0   :  { %13 = vsyncpa [#allocation4], 0  ;;  %s4367_s27 = smov 0   ;;  %s5606_s0 = inlined_call_operand.vmem [shape: f32[2,256,4], index: 0, kind: input, shape index: {}]   ;;  %s5607_s1 = inlined_call_operand.vmem [shape: f32[4,128], index: 1, kind: input, shape index: {}]   ;;  %s5608_s2 = inlined_call_operand.vmem [shape: f32[1,128], index: 2, kind: input, shape index: {}]   ;;  %s5609_s3 = inlined_call_operand.hbm [shape: f32[3,384,128], index: 3, kind: input, shape index: {}]   ;;  %s5610_s4 = inlined_call_operand.vmem [shape: f32[1,128], index: 4, kind: input, shape index: {}]   ;;  %s5611_s5 = inlined_call_operand.vmem [shape: f32[128,16], index: 5, kind: input, shape index: {}]   ;;  %s5612_s6 = inlined_call_operand.vmem [shape: f32[1,16], index: 6, kind: input, shape index: {}]   ;;  %s5613_s7 = inlined_call_operand.vmem [shape: f32[4,16], index: 7, kind: input, shape index: {}]   ;;  %s5614_s8 = inlined_call_operand.vmem [shape: f32[2,256,16], index: 8, kind: output, shape index: {}]  }
   0x1 LB: > { %s4373_s28 = sadd.s32 4294967295, %s4315_s27   ;;  %p3141_p0 = scmp.ge.s32.totalorder %s4315_s27, 1  ;;  %s4315_s27 = sphi %s4367_s27, %s19_s27  }
   0x2   : > { %p223_p1 = scmp.lt.s32.totalorder %s4315_s27, 3  ;;  %s4317_s29 = smov [#allocation3]  }
   0x3   : > { %s241_s30 = sshll.u32 %s4317_s29, 4  ;;  %p5615_p3 = scmp.eq.s32.totalorder %s4373_s28, 0  ;;  %s242_s30 = int_to_ptr.vmem [resolvable:$true] %s241_s30 }
   0x4   : > { %p4377_p2 = pnand %p3141_p0, %p223_p1  ;;  %s4277_s13 = scalar_lea.hbm %s5609_s3, 18432 }
   0x5   : > { %p4278_p6 = scmp.ne.s32.totalorder %s5609_s3, %s4277_s13  ;;  %p4284_p10 = scmp.lt.u32.totalorder %s4277_s13, %s5609_s3 }
   0x6   : > { %s5617_s9 = scalar_select %p4377_p2, 1, 0 }
   0x7   : > { %p4225_p4 = pneg %p4377_p2 }
   0x9   : > { %p4386_p5 = pnand %p5615_p3, %p4225_p4 }
   0xb   : > { %p4279_p7 = pneg %p4386_p5 }
   0xd   : > { %p4280_p8 = pnand %p4279_p7, %p4278_p6 }
   0xf   : > { %p4281_p9 = pneg %p4280_p8 }
  0x11   : > { %p4286_p11 = pnand %p4284_p10, %p4281_p9 }
  0x13   : > { %4289 = shalt.err (!%p4286_p11)
}
  0x14   : > { %s4290_s18 = scalar_lea.vmem %s242_s30, 18432  ;;  %p4298_p1 = scmp.lt.s32.totalorder %s242_s30, %s242_s30 }
  0x15   : > { %p4291_p12 = scmp.ne.s32.totalorder %s242_s30, %s4290_s18  ;;  %p4299_p4 = scmp.lt.s32.totalorder %s4290_s18, %s4290_s18 }
  0x17   : > { %p4293_p13 = pnand %p4291_p12, %p4279_p7  ;;  %p4300_p3 = por %p4299_p4, %p4298_p1 }
  0x19   : > { %p4294_p0 = pneg %p4293_p13 }
  0x1b   : > { %p4301_p2 = pnand %p4300_p3, %p4294_p0 }
  0x1d   : > { %4304 = shalt.err (!%p4301_p2)
}
  0x1e   : > { %s4318_s19 = smov 128   ;;  %s4319_s20 = smov 8  }
  0x1f   : > { %4228 = dma.hbm_to_vmem [thread:$0]  (!%p4386_p5), %s5609_s3, 18432, %s242_s30, [#allocation4], %s4318_s19, %s4318_s19, %s4319_s20  }
  0x20   : > { %p5619_p6 = scmp.ne.s32.totalorder %s5617_s9, 0 }
  0x21   : > { %p5620_p8 = scmp.eq.s32.totalorder (!%p5619_p6), %s4373_s28, 0 }
  0x22   : > { %277 = sbr.rel (%p5619_p6) target bundleno = 1035 (0x40b), region = 52 }
  0x29   : > { %4310 = dma.done.wait (%p5620_p8), [#allocation4], 18432   ;;  %p5621_p7 = pmov %p5620_p8 }
  0x2a   : > { %p311_p2 = scmp.lt.s32.totalorder %s4373_s28, 1  ;;  %vm458_vm0 = vcmask 1043456   ;;  %vm361_vm1 = vcmask 31744   ;;  %v353_v0 = vld [vmem:[%s5607_s1] sm:$0xf]  ;;  %v4320_v4 = vmov 0.0|0.0  }
  0x2b   : > { %4312 = vsyncadd (%p5621_p7), [#allocation4], 4294948864  ;;  %3481 = vmatprep.subr.msk.mxu1 %vm458_vm0, %v353_v0  ;;  %v912_v9 = vld [vmem:[#allocation3 + $0x180] sm:$0xff]  ;;  %v913_v10 = vld [vmem:[#allocation3 + $0x188] sm:$0xff]  ;;  %vm3039_vm2 = vcmask 130048  }
  0x2c   : > { %s5623_s28 = smov (!%p311_p2, %s4373_s28), 1  ;;  %3482 = vmatpush3.msk.msra.mxu1 %vm458_vm0, %v353_v0  ;;  %v914_v11 = vld [vmem:[#allocation3 + $0x190] sm:$0xff]  ;;  %v3902_v13 = vpack.c.bf16 %v913_v10, %v912_v9  ;;  %v915_v14 = vld [vmem:[#allocation3 + $0x198] sm:$0xff]  ;;  %v916_v17 = vld [vmem:[#allocation3 + $0x1a0] sm:$0xff] }
  0x2d   : > { %s3221_s23 = sshll.u32 %s5623_s28, 8  ;;  %3901 = vmatprep.subr.bf16.mxu1 %v4320_v4  ;;  %v3905_v16 = vpack.c.bf16 %v915_v14, %v914_v11  ;;  %v917_v18 = vld [vmem:[#allocation3 + $0x1a8] sm:$0xff]  ;;  %v944_v21 = vld [vmem:[#allocation3 + $0x280] sm:$0xff]  ;;  %v918_v23 = vld [vmem:[#allocation3 + $0x1b0] sm:$0xff] }
  0x2e   : > { %s4422_s26 = scalar_lea.vmem %s5606_s0, %s3221_s23  ;;  %v3908_v22 = vpack.c.bf16 %v917_v18, %v916_v17  ;;  %v945_v24 = vld [vmem:[#allocation3 + $0x288] sm:$0xff]  ;;  %v919_v25 = vld [vmem:[#allocation3 + $0x1b8] sm:$0xff]  ;;  %v946_v27 = vld [vmem:[#allocation3 + $0x290] sm:$0xff]  ;;  %s5506_s14 = scalar_lea.vmem %s5614_s8, %s3221_s23 }
  0x2f   : > { %v321_v1 = vld [vmem:[%s4422_s26] sm:$0xff]  ;;  %v322_v2 = vld [vmem:[%s4422_s26 + $0x8] sm:$0xff]  ;;  %v323_v3 = vld [vmem:[%s4422_s26 + $0x10] sm:$0xff]  ;;  %v3949_v26 = vpack.c.bf16 %v945_v24, %v944_v21  ;;  %v3911_v34 = vpack.c.bf16 %v919_v25, %v918_v23 }
  0x30   : > { %3483 = vmatprep.mubr.msk.f32.mxu1 %vm361_vm1, %v321_v1  ;;  %v324_v5 = vld [vmem:[%s4422_s26 + $0x18] sm:$0xff]  ;;  %v325_v6 = vld [vmem:[%s4422_s26 + $0x20] sm:$0xff]  ;;  %v326_v7 = vld [vmem:[%s4422_s26 + $0x28] sm:$0xff] }
  0x31   : > { %3484 = vmatmul.mubr.msk.f32.vlgmr.msra.gmra.mrb[0].mxu1 %vm361_vm1, %v322_v2  ;;  %v327_v8 = vld [vmem:[%s4422_s26 + $0x30] sm:$0xff]  ;;  %v328_v12 = vld [vmem:[%s4422_s26 + $0x38] sm:$0xff]  ;;  %v329_v15 = vld [vmem:[%s4422_s26 + $0x40] sm:$0xff]  ;;  %3950 = vmatprep.subr.bf16.mxu0 %v3949_v26 }
  0x32   : > { %3486 = vmatprep.mubr.msk.f32.mxu1 %vm361_vm1, %v323_v3  ;;  %3903 = vmatpush1.bf16.msra.mxu1 %v3902_v13  ;;  %v330_v19 = vld [vmem:[%s4422_s26 + $0x48] sm:$0xff]  ;;  %v331_v20 = vld [vmem:[%s4422_s26 + $0x50] sm:$0xff]  ;;  %v332_v29 = vld [vmem:[%s4422_s26 + $0x58] sm:$0xff] }
  0x33   : > { %3904 = vmatprep.subr.bf16.mxu1 %v4320_v4  ;;  %v947_v28 = vld [vmem:[#allocation3 + $0x298] sm:$0xff]  ;;  %v333_v31 = vld [vmem:[%s4422_s26 + $0x60] sm:$0xff]  ;;  %v948_v32 = vld [vmem:[#allocation3 + $0x2a0] sm:$0xff]  ;;  %3952 = vmatpush3.bf16.msra.mxu0 %v3949_v26 }
  0x34   : > { %v3953_v30 = vpack.c.bf16 %v947_v28, %v946_v27  ;;  %v949_v33 = vld [vmem:[#allocation3 + $0x2a8] sm:$0xff]  ;;  %v920_v35 = vld [vmem:[#allocation3 + $0x1c0] sm:$0xff]  ;;  %v334_v37 = vld [vmem:[%s4422_s26 + $0x68] sm:$0xff] }
  0x35   : > { %3487 = vmatmul.mubr.msk.f32.gmra.mrb[2].mxu1 %vm361_vm1, %v324_v5  ;;  %v921_v36 = vld [vmem:[#allocation3 + $0x1c8] sm:$0xff]  ;;  %v3957_v38 = vpack.c.bf16 %v949_v33, %v948_v32  ;;  %v335_v39 = vld [vmem:[%s4422_s26 + $0x70] sm:$0xff]  ;;  %v950_v40 = vld [vmem:[#allocation3 + $0x2b0] sm:$0xff] }
  0x36   : > { %3489 = vmatprep.mubr.msk.f32.mxu1 %vm361_vm1, %v325_v6  ;;  %3906 = vmatpush1.bf16.msra.mxu1 %v3905_v16  ;;  %v951_v41 = vld [vmem:[#allocation3 + $0x2b8] sm:$0xff]  ;;  %v3914_v42 = vpack.c.bf16 %v921_v36, %v920_v35  ;;  %v922_v43 = vld [vmem:[#allocation3 + $0x1d0] sm:$0xff]  ;;  %v336_v45 = vld [vmem:[%s4422_s26 + $0x78] sm:$0xff] }
  0x37   : > { %3907 = vmatprep.subr.bf16.mxu1 %v4320_v4  ;;  %3954 = vmatprep.subr.bf16.mxu0 %v3953_v30  ;;  %v923_v44 = vld [vmem:[#allocation3 + $0x1d8] sm:$0xff]  ;;  %v3961_v46 = vpack.c.bf16 %v951_v41, %v950_v40  ;;  %v337_v47 = vld [vmem:[%s4422_s26 + $0x80] sm:$0xff]  ;;  %v924_v49 = vld [vmem:[#allocation3 + $0x1e0] sm:$0xff] }
  0x38   : > { %3956 = vmatpush3.bf16.msra.mxu0 %v3953_v30  ;;  %v3917_v48 = vpack.c.bf16 %v923_v44, %v922_v43  ;;  %v925_v50 = vld [vmem:[#allocation3 + $0x1e8] sm:$0xff]  ;;  %v338_v51 = vld [vmem:[%s4422_s26 + $0x88] sm:$0xff]  ;;  %v339_v52 = vld [vmem:[%s4422_s26 + $0x90] sm:$0xff] }
  0x39   : > { %3490 = vmatmul.mubr.msk.f32.gmra.mrb[4].mxu1 %vm361_vm1, %v326_v7  ;;  %3958 = vmatprep.subr.bf16.mxu0 %v3957_v38  ;;  %v3920_v53 = vpack.c.bf16 %v925_v50, %v924_v49  ;;  %v926_v54 = vld [vmem:[#allocation3 + $0x1f0] sm:$0xff]  ;;  %v927_v55 = vld [vmem:[#allocation3 + $0x1f8] sm:$0xff]  ;;  %v340_v56 = vld [vmem:[%s4422_s26 + $0x98] sm:$0xff] }
  0x3a   : > { %3492 = vmatprep.mubr.msk.f32.mxu1 %vm361_vm1, %v327_v8  ;;  %3909 = vmatpush1.bf16.msra.mxu1 %v3908_v22  ;;  %v341_v57 = vld [vmem:[%s4422_s26 + $0xa0] sm:$0xff]  ;;  %v3923_v58 = vpack.c.bf16 %v927_v55, %v926_v54  ;;  %v928_v59 = vld [vmem:[#allocation3 + $0x200] sm:$0xff]  ;;  %v929_v60 = vld [vmem:[#allocation3 + $0x208] sm:$0xff] }
  0x3b   : > { %3910 = vmatprep.subr.bf16.mxu1 %v4320_v4  ;;  %v342_v61 = vld [vmem:[%s4422_s26 + $0xa8] sm:$0xff]  ;;  %v343_v62 = vld [vmem:[%s4422_s26 + $0xb0] sm:$0xff]  ;;  %v3926_v63 = vpack.c.bf16 %v929_v60, %v928_v59  ;;  %v930_v0 = vld [vmem:[#allocation3 + $0x210] sm:$0xff] }
  0x3c   : > { %3960 = vmatpush3.bf16.msra.mxu0 %v3957_v38  ;;  %v931_v1 = vld [vmem:[#allocation3 + $0x218] sm:$0xff]  ;;  %v344_v2 = vld [vmem:[%s4422_s26 + $0xb8] sm:$0xff]  ;;  %v345_v3 = vld [vmem:[%s4422_s26 + $0xc0] sm:$0xff] }
  0x3d   : > { %3493 = vmatmul.mubr.msk.f32.gmra.mrb[6].mxu1 %vm361_vm1, %v328_v12  ;;  %3962 = vmatprep.subr.bf16.mxu0 %v3961_v46  ;;  %v3929_v5 = vpack.c.bf16 %v931_v1, %v930_v0  ;;  %v932_v6 = vld [vmem:[#allocation3 + $0x220] sm:$0xff]  ;;  %v933_v7 = vld [vmem:[#allocation3 + $0x228] sm:$0xff]  ;;  %v346_v8 = vld [vmem:[%s4422_s26 + $0xc8] sm:$0xff] }
  0x3e   : > { %3495 = vmatprep.mubr.msk.f32.mxu1 %vm361_vm1, %v329_v15  ;;  %3912 = vmatpush1.bf16.msra.mxu1 %v3911_v34  ;;  %v347_v9 = vld [vmem:[%s4422_s26 + $0xd0] sm:$0xff]  ;;  %v3932_v10 = vpack.c.bf16 %v933_v7, %v932_v6  ;;  %v934_v11 = vld [vmem:[#allocation3 + $0x230] sm:$0xff]  ;;  %v935_v12 = vld [vmem:[#allocation3 + $0x238] sm:$0xff]  ;;  %v4321_v34 = vmov 0.0  }
  0x3f   : > { %3913 = vmatprep.subr.bf16.mxu1 %v4320_v4  ;;  %v348_v13 = vld [vmem:[%s4422_s26 + $0xd8] sm:$0xff]  ;;  %v349_v14 = vld [vmem:[%s4422_s26 + $0xe0] sm:$0xff]  ;;  %v3935_v15 = vpack.c.bf16 %v935_v12, %v934_v11  ;;  %v936_v16 = vld [vmem:[#allocation3 + $0x240] sm:$0xff]  ;;  %719 = vst [vmem:[#allocation2] sm:$0xff] %v4321_v34 }
  0x40   : > { %3964 = vmatpush3.bf16.msra.mxu0 %v3961_v46  ;;  %v937_v17 = vld [vmem:[#allocation3 + $0x248] sm:$0xff]  ;;  %v350_v18 = vld [vmem:[%s4422_s26 + $0xe8] sm:$0xff]  ;;  %v952_v22 = vld [vmem:[#allocation3 + $0x2c0] sm:$0xff]  ;;  %720 = vst [vmem:[#allocation2 + $0x8] sm:$0xff] %v4321_v34 }
  0x41   : > { %3496 = vmatmul.mubr.msk.f32.gmra.mrb[8].mxu1 %vm361_vm1, %v330_v19  ;;  %v351_v19 = vld [vmem:[%s4422_s26 + $0xf0] sm:$0xff]  ;;  %v352_v21 = vld [vmem:[%s4422_s26 + $0xf8] sm:$0xff]  ;;  %v938_v24 = vld [vmem:[#allocation3 + $0x250] sm:$0xff]  ;;  %721 = vst [vmem:[#allocation2 + $0x10] sm:$0x3] %v4321_v34 }
  0x42   : > { %3498 = vmatprep.mubr.msk.f32.mxu1 %vm361_vm1, %v331_v20  ;;  %3915 = vmatpush1.bf16.msra.mxu1 %v3914_v42  ;;  %v3938_v20 = vpack.c.bf16 %v937_v17, %v936_v16  ;;  %v953_v23 = vld [vmem:[#allocation3 + $0x2c8] sm:$0xff]  ;;  %v939_v25 = vld [vmem:[#allocation3 + $0x258] sm:$0xff]  ;;  %v954_v28 = vld [vmem:[#allocation3 + $0x2d0] sm:$0xff]  ;;  %723 = vst [vmem:[#allocation2 + $0x198] sm:$0xff] %v4321_v34 }
  0x43   : > { %3916 = vmatprep.subr.bf16.mxu1 %v4320_v4  ;;  %v3965_v26 = vpack.c.bf16 %v953_v23, %v952_v22  ;;  %v3941_v27 = vpack.c.bf16 %v939_v25, %v938_v24  ;;  %v940_v30 = vld [vmem:[#allocation3 + $0x260] sm:$0xff]  ;;  %724 = vst [vmem:[#allocation2 + $0x1a0] sm:$0xff] %v4321_v34  ;;  %725 = vst [vmem:[#allocation2 + $0x1a8] sm:$0x3] %v4321_v34  ;;  %v957_v36 = vld [vmem:[#allocation3 + $0x2e8] sm:$0xff] }
  0x44   : > { %727 = vst [vmem:[#allocation2 + $0x18] sm:$0x1] %v4321_v34  ;;  %728 = vst [vmem:[#allocation2 + $0x30] sm:$0x1] %v4321_v34  ;;  %v956_v35 = vld [vmem:[#allocation3 + $0x2e0] sm:$0xff]  ;;  %v943_v38 = vld [vmem:[#allocation3 + $0x278] sm:$0xff] }
  0x45   : > { %3499 = vmatmul.mubr.msk.f32.gmra.mrb[10].mxu1 %vm361_vm1, %v332_v29  ;;  %3966 = vmatprep.subr.bf16.mxu0 %v3965_v26  ;;  %v955_v29 = vld [vmem:[#allocation3 + $0x2d8] sm:$0xff]  ;;  %729 = vst [vmem:[#allocation2 + $0x48] sm:$0x1] %v4321_v34  ;;  %730 = vst [vmem:[#allocation2 + $0x60] sm:$0x1] %v4321_v34  ;;  %v958_v41 = vld [vmem:[#allocation3 + $0x2f0] sm:$0xff] }
  0x46   : > { %3501 = vmatprep.mubr.msk.f32.mxu1 %vm361_vm1, %v333_v31  ;;  %3918 = vmatpush1.bf16.msra.mxu1 %v3917_v48  ;;  %v941_v31 = vld [vmem:[#allocation3 + $0x268] sm:$0xff]  ;;  %v3969_v32 = vpack.c.bf16 %v955_v29, %v954_v28  ;;  %731 = vst [vmem:[#allocation2 + $0x78] sm:$0x1] %v4321_v34  ;;  %732 = vst [vmem:[#allocation2 + $0x90] sm:$0x1] %v4321_v34  ;;  %v959_v42 = vld [vmem:[#allocation3 + $0x2f8] sm:$0xff] }
  0x47   : > { %3919 = vmatprep.subr.bf16.mxu1 %v4320_v4  ;;  %3968 = vmatpush3.bf16.msra.mxu0 %v3965_v26  ;;  %v3944_v33 = vpack.c.bf16 %v941_v31, %v940_v30  ;;  %733 = vst [vmem:[#allocation2 + $0xa8] sm:$0x1] %v4321_v34  ;;  %734 = vst [vmem:[#allocation2 + $0xc0] sm:$0x1] %v4321_v34  ;;  %v3977_v43 = vpack.c.bf16 %v959_v42, %v958_v41  ;;  %v859_v44 = vld [vmem:[#allocation3 + $0x100] sm:$0xff]  ;;  %v830_v11 = vld [vmem:[#allocation3 + $0x18] sm:$0xff] }
  0x48   : > { %3970 = vmatprep.subr.bf16.mxu0 %v3969_v32  ;;  %735 = vst [vmem:[#allocation2 + $0xd8] sm:$0x1] %v4321_v34  ;;  %736 = vst [vmem:[#allocation2 + $0xf0] sm:$0x1] %v4321_v34  ;;  %v827_v60 = vld [vmem:[#allocation3] sm:$0xff]  ;;  %v866_v16 = vld [vmem:[#allocation3 + $0x138] sm:$0xff] }
  0x49   : > { %3502 = vmatmul.mubr.msk.f32.gmra.mrb[12].mxu1 %vm361_vm1, %v334_v37  ;;  %737 = vst [vmem:[#allocation2 + $0x108] sm:$0x1] %v4321_v34  ;;  %738 = vst [vmem:[#allocation2 + $0x120] sm:$0x1] %v4321_v34  ;;  %v942_v37 = vld [vmem:[#allocation3 + $0x270] sm:$0xff]  ;;  %v863_v1 = vld [vmem:[#allocation3 + $0x120] sm:$0xff] }
  0x4a   : > { %3504 = vmatprep.mubr.msk.f32.mxu1 %vm361_vm1, %v335_v39  ;;  %3921 = vmatpush1.bf16.msra.mxu1 %v3920_v53  ;;  %739 = vst [vmem:[#allocation2 + $0x138] sm:$0x1] %v4321_v34  ;;  %740 = vst [vmem:[#allocation2 + $0x150] sm:$0x1] %v4321_v34  ;;  %v3973_v39 = vpack.c.bf16 %v957_v36, %v956_v35  ;;  %v3947_v40 = vpack.c.bf16 %v943_v38, %v942_v37  ;;  %v862_v53 = vld [vmem:[#allocation3 + $0x118] sm:$0xff]  ;;  %v831_v22 = vld [vmem:[#allocation3 + $0x20] sm:$0xff] }
  0x4b   : > { %3922 = vmatprep.subr.bf16.mxu1 %v4320_v4  ;;  %741 = vst [vmem:[#allocation2 + $0x168] sm:$0x1] %v4321_v34  ;;  %742 = vst [vmem:[#allocation2 + $0x180] sm:$0x1] %v4321_v34  ;;  %3972 = vmatpush3.bf16.msra.mxu0 %v3969_v32  ;;  %v876_v6 = vld [vmem:[#allocation2 + $0x9] sm:$0xff]  ;;  %v832_v23 = vld [vmem:[#allocation3 + $0x28] sm:$0xff] }
  0x4c   : > { %743 = vst [vmem:[#allocation2 + $0x29] sm:$0x1] %v4321_v34  ;;  %744 = vst [vmem:[#allocation2 + $0x41] sm:$0x1] %v4321_v34  ;;  %3974 = vmatprep.subr.bf16.mxu0 %v3973_v39  ;;  %v868_v28 = vld [vmem:[#allocation3 + $0x148] sm:$0xff]  ;;  %v3988_v31 = vpack.c.bf16 %v832_v23, %v831_v22  ;;  %v833_v35 = vld [vmem:[#allocation3 + $0x30] sm:$0xff] }
  0x4d   : > { %3505 = vmatmul.mubr.msk.f32.gmra.mrb[14].mxu1 %vm361_vm1, %v336_v45  ;;  %745 = vst [vmem:[#allocation2 + $0x59] sm:$0x1] %v4321_v34  ;;  %746 = vst [vmem:[#allocation2 + $0x71] sm:$0x1] %v4321_v34  ;;  %v860_v45 = vld [vmem:[#allocation3 + $0x108] sm:$0xff]  ;;  %v834_v36 = vld [vmem:[#allocation3 + $0x38] sm:$0xff] }
  0x4e   : > { %3507 = vmatprep.mubr.msk.f32.mxu1 %vm361_vm1, %v337_v47  ;;  %3924 = vmatpush1.bf16.msra.mxu1 %v3923_v58  ;;  %747 = vst [vmem:[#allocation2 + $0x89] sm:$0x1] %v4321_v34  ;;  %748 = vst [vmem:[#allocation2 + $0xa1] sm:$0x1] %v4321_v34  ;;  %v4029_v46 = vpack.c.bf16 %v860_v45, %v859_v44  ;;  %v4551_v47 = vld [vmem:[%s5608_s2] ss:$0 sm:$0xff]  ;;  %v3991_v44 = vpack.c.bf16 %v834_v36, %v833_v35 }
  0x4f   : > { %3925 = vmatprep.subr.bf16.mxu1 %v4320_v4  ;;  %749 = vst [vmem:[#allocation2 + $0xb9] sm:$0x1] %v4321_v34  ;;  %750 = vst [vmem:[#allocation2 + $0xd1] sm:$0x1] %v4321_v34  ;;  %3976 = vmatpush3.bf16.msra.mxu0 %v3973_v39  ;;  %v870_v41 = vld [vmem:[#allocation3 + $0x158] sm:$0xff] }
  0x50   : > { %751 = vst [vmem:[#allocation2 + $0xe9] sm:$0x1] %v4321_v34  ;;  %752 = vst [vmem:[#allocation2 + $0x101] sm:$0x1] %v4321_v34  ;;  %3978 = vmatprep.subr.bf16.mxu0 %v3977_v43  ;;  %v842_v22 = vld [vmem:[#allocation3 + $0x78] sm:$0xff] }
  0x51   : > { %3508 = vmatmul.mubr.msk.f32.gmra.mrb[16].mxu1 %vm361_vm1, %v338_v51  ;;  %753 = vst [vmem:[#allocation2 + $0x119] sm:$0x1] %v4321_v34  ;;  %754 = vst [vmem:[#allocation2 + $0x131] sm:$0x1] %v4321_v34 }
  0x52   : > { %3510 = vmatprep.mubr.msk.f32.mxu1 %vm361_vm1, %v339_v52  ;;  %3927 = vmatpush1.bf16.msra.mxu1 %v3926_v63  ;;  %755 = vst [vmem:[#allocation2 + $0x149] sm:$0x1] %v4321_v34  ;;  %756 = vst [vmem:[#allocation2 + $0x161] sm:$0x1] %v4321_v34  ;;  %v861_v52 = vld [vmem:[#allocation3 + $0x110] sm:$0xff] }
  0x53   : > { %3928 = vmatprep.subr.bf16.mxu1 %v4320_v4  ;;  %757 = vst [vmem:[#allocation2 + $0x179] sm:$0x1] %v4321_v34  ;;  %758 = vst [vmem:[#allocation2 + $0x191] sm:$0x1] %v4321_v34  ;;  %3980 = vmatpush3.bf16.msra.mxu0 %v3977_v43 }
  0x54   : > { %3981 = vmatprep.subr.bf16.mxu0 %v4320_v4 }
  0x55   : > { %3511 = vmatmul.mubr.msk.f32.gmra.mrb[18].mxu1 %vm361_vm1, %v340_v56 }
  0x56   : > { %3513 = vmatprep.mubr.msk.f32.mxu1 %vm361_vm1, %v341_v57  ;;  %3930 = vmatpush1.bf16.msra.mxu1 %v3929_v5  ;;  %v875_v57 = vld [vmem:[#allocation2 + $0x1] sm:$0xff] }
  0x57   : > { %3931 = vmatprep.subr.bf16.mxu1 %v4320_v4 }
  0x59   : > { %3514 = vmatmul.mubr.msk.f32.gmra.mrb[20].mxu1 %vm361_vm1, %v342_v61  ;;  %v828_v61 = vld [vmem:[#allocation3 + $0x8] sm:$0xff] }
  0x5a   : > { %3516 = vmatprep.mubr.msk.f32.mxu1 %vm361_vm1, %v343_v62  ;;  %3933 = vmatpush1.bf16.msra.mxu1 %v3932_v10  ;;  %v4033_v62 = vpack.c.bf16 %v862_v53, %v861_v52  ;;  %v3982_v7 = vpack.c.bf16 %v828_v61, %v827_v60  ;;  %v829_v10 = vld [vmem:[#allocation3 + $0x10] sm:$0xff]  ;;  %v871_v53 = vld [vmem:[#allocation3 + $0x160] sm:$0xff]  ;;  %v838_v61 = vld [vmem:[#allocation3 + $0x58] sm:$0xff] }
  0x5b   : > { %3934 = vmatprep.subr.bf16.mxu1 %v4320_v4  ;;  %v837_v60 = vld [vmem:[#allocation3 + $0x50] sm:$0xff] }
  0x5d   : > { %3517 = vmatmul.mubr.msk.f32.gmra.mrb[22].mxu1 %vm361_vm1, %v344_v2  ;;  %v864_v2 = vld [vmem:[#allocation3 + $0x128] sm:$0xff] }
  0x5e   : > { %3519 = vmatprep.mubr.msk.f32.mxu1 %vm361_vm1, %v345_v3  ;;  %3936 = vmatpush1.bf16.msra.mxu1 %v3935_v15  ;;  %v865_v15 = vld [vmem:[#allocation3 + $0x130] sm:$0xff] }
  0x5f   : > { %3937 = vmatprep.subr.bf16.mxu1 %v4320_v4  ;;  %v4041_v25 = vpack.c.bf16 %v866_v16, %v865_v15 }
  0x61   : > { %3520 = vmatmul.mubr.msk.f32.gmra.mrb[24].mxu1 %vm361_vm1, %v346_v8 }
  0x62   : > { %3522 = vmatprep.mubr.msk.f32.mxu1 %vm361_vm1, %v347_v9  ;;  %3939 = vmatpush1.bf16.msra.mxu1 %v3938_v20 }
  0x63   : > { %3940 = vmatprep.subr.bf16.mxu1 %v4320_v4 }
  0x65   : > { %3523 = vmatmul.mubr.msk.f32.gmra.mrb[26].mxu1 %vm361_vm1, %v348_v13  ;;  %v4037_v13 = vpack.c.bf16 %v864_v2, %v863_v1  ;;  %v873_v2 = vld [vmem:[#allocation3 + $0x170] sm:$0xff] }
  0x66   : > { %3525 = vmatprep.mubr.msk.f32.mxu1 %vm361_vm1, %v349_v14  ;;  %3942 = vmatpush1.bf16.msra.mxu1 %v3941_v27  ;;  %v867_v27 = vld [vmem:[#allocation3 + $0x140] sm:$0xff] }
  0x67   : > { %3943 = vmatprep.subr.bf16.mxu1 %v4320_v4  ;;  %v4045_v38 = vpack.c.bf16 %v868_v28, %v867_v27 }
  0x69   : > { %3526 = vmatmul.mubr.msk.f32.gmra.mrb[28].mxu1 %vm361_vm1, %v350_v18 }
  0x6a   : > { %3528 = vmatprep.mubr.msk.f32.mxu1 %vm361_vm1, %v351_v19  ;;  %3945 = vmatpush1.bf16.msra.mxu1 %v3944_v33  ;;  %v3985_v19 = vpack.c.bf16 %v830_v11, %v829_v10  ;;  %v839_v10 = vld [vmem:[#allocation3 + $0x60] sm:$0xff] }
  0x6b   : > { %3946 = vmatprep.subr.bf16.mxu1 %v4320_v4 }
  0x6d   : > { %3529 = vmatmul.mubr.msk.f32.gmra.mrb[30].mxu1 %vm361_vm1, %v352_v21 }
  0x6e   : > { %3948 = vmatpush1.bf16.msra.mxu1 %v3947_v40  ;;  %v869_v40 = vld [vmem:[#allocation3 + $0x150] sm:$0xff] }
  0x6f   : > { %4030 = vmatprep.subr.bf16.mxu1 %v4029_v46 }
 0x104   : > { %v3485_v48 = vpop.f32.mrb[0].mxu1 }
 0x105   : > { %v534_v49 = vadd.f32 %v3485_v48, %v4551_v47  ;;  %v528_v50 = vpop.f32.mrb[1].mxu1  ;;  %v835_v48 = vld [vmem:[#allocation3 + $0x40] sm:$0xff] }
 0x106   : > { %v529_v51 = vadd.f32 %v4551_v47, %v528_v50 }
 0x107   : > { %v4555_v54 = vmax.f32 %v534_v49, 0.0  ;;  %v836_v49 = vld [vmem:[#allocation3 + $0x48] sm:$0xff] }
 0x108   : > { %v687_v55 = vmax.f32 %v529_v51, 0.0  ;;  %v3488_v56 = vpop.f32.mrb[2].mxu1  ;;  %v4049_v51 = vpack.c.bf16 %v870_v41, %v869_v40  ;;  %v845_v41 = vld [vmem:[#allocation3 + $0x90] sm:$0xff] }
 0x109   : > { %760 = vst [vmem:[#allocation2 + $0x21] sm:$0xff] %v4555_v54  ;;  %v544_v58 = vadd.f32 %v3488_v56, %v4551_v47  ;;  %v538_v59 = vpop.f32.mrb[3].mxu1 }
 0x10a   : > { %759 = vst [vmem:[#allocation2 + $0x19] sm:$0xff] %v687_v55  ;;  %v539_v63 = vadd.f32 %v4551_v47, %v538_v59  ;;  %1024 = vmatprep.mubr.f32.mxu1 %v687_v55 }
 0x10b   : > { %v4560_v0 = vmax.f32 %v544_v58, 0.0  ;;  %1025 = vmatmul.mubr.f32.vlgmr.msra.gmra.mrb[32].mxu1 %v875_v57  ;;  %v3994_v57 = vpack.c.bf16 %v836_v49, %v835_v48 }
 0x10c   : > { %v4562_v3 = vmax.f32 %v539_v63, 0.0  ;;  %v3491_v5 = vpop.f32.mrb[4].mxu1  ;;  %4032 = vmatpush3.bf16.msra.mxu1 %v4029_v46  ;;  %1029 = vmatprep.mubr.f32.mxu1 %v4555_v54 }
 0x10d   : > { %762 = vst [vmem:[#allocation2 + $0x39] sm:$0xff] %v4560_v0  ;;  %v554_v8 = vadd.f32 %v3491_v5, %v4551_v47  ;;  %v548_v9 = vpop.f32.mrb[5].mxu1  ;;  %4034 = vmatprep.subr.bf16.mxu1 %v4033_v62 }
 0x10e   : > { %761 = vst [vmem:[#allocation2 + $0x31] sm:$0xff] %v4562_v3  ;;  %v549_v12 = vadd.f32 %v4551_v47, %v548_v9  ;;  %3563 = vmatprep.mubr.f32.mxu0 %v4562_v3 }
 0x10f   : > { %v4570_v14 = vmax.f32 %v554_v8, 0.0  ;;  %1030 = vmatmul.mubr.f32.gmra.mrb[34].mxu1 %v876_v6  ;;  %3564 = vmatmul.mubr.f32.vlgmr.msra.gmra.mrb[0].mxu0 %v4560_v0 }
 0x110   : > { %v4573_v17 = vmax.f32 %v549_v12, 0.0  ;;  %v3494_v18 = vpop.f32.mrb[6].mxu1  ;;  %3983 = vmatpush1.bf16.msra.mxu0 %v3982_v7  ;;  %1034 = vmatprep.mubr.f32.mxu1 %v4562_v3  ;;  %v3997_v7 = vpack.c.bf16 %v838_v61, %v837_v60  ;;  %v849_v61 = vld [vmem:[#allocation3 + $0xb0] sm:$0xff] }
 0x111   : > { %764 = vst [vmem:[#allocation2 + $0x51] sm:$0xff] %v4570_v14  ;;  %v564_v20 = vadd.f32 %v3494_v18, %v4551_v47  ;;  %v558_v21 = vpop.f32.mrb[7].mxu1  ;;  %3984 = vmatprep.subr.bf16.mxu0 %v4320_v4  ;;  %4036 = vmatpush3.bf16.msra.mxu1 %v4033_v62 }
 0x112   : > { %763 = vst [vmem:[#allocation2 + $0x49] sm:$0xff] %v4573_v17  ;;  %v559_v24 = vadd.f32 %v4551_v47, %v558_v21  ;;  %3566 = vmatprep.mubr.f32.mxu0 %v4573_v17  ;;  %4038 = vmatprep.subr.bf16.mxu1 %v4037_v13  ;;  %v841_v21 = vld [vmem:[#allocation3 + $0x70] sm:$0xff] }
 0x113   : > { %v4582_v26 = vmax.f32 %v564_v20, 0.0  ;;  %1035 = vmatmul.mubr.f32.gmra.mrb[36].mxu1 %v687_v55  ;;  %3567 = vmatmul.mubr.f32.gmra.mrb[2].mxu0 %v4570_v14  ;;  %v4003_v27 = vpack.c.bf16 %v842_v22, %v841_v21  ;;  %v854_v21 = vld [vmem:[#allocation3 + $0xd8] sm:$0xff] }
 0x114   : > { %v4585_v29 = vmax.f32 %v559_v24, 0.0  ;;  %v3497_v30 = vpop.f32.mrb[8].mxu1  ;;  %1039 = vmatprep.mubr.f32.mxu1 %v4560_v0  ;;  %3986 = vmatpush1.bf16.msra.mxu0 %v3985_v19 }
 0x115   : > { %766 = vst [vmem:[#allocation2 + $0x69] sm:$0xff] %v4582_v26  ;;  %v574_v32 = vadd.f32 %v3497_v30, %v4551_v47  ;;  %v568_v33 = vpop.f32.mrb[9].mxu1  ;;  %3987 = vmatprep.subr.bf16.mxu0 %v4320_v4  ;;  %4040 = vmatpush3.bf16.msra.mxu1 %v4037_v13 }
 0x116   : > { %765 = vst [vmem:[#allocation2 + $0x61] sm:$0xff] %v4585_v29  ;;  %v569_v37 = vadd.f32 %v4551_v47, %v568_v33  ;;  %3569 = vmatprep.mubr.f32.mxu0 %v4585_v29  ;;  %4042 = vmatprep.subr.bf16.mxu1 %v4041_v25 }
 0x117   : > { %v4594_v39 = vmax.f32 %v574_v32, 0.0  ;;  %1040 = vmatmul.mubr.f32.gmra.mrb[38].mxu1 %v4555_v54  ;;  %3570 = vmatmul.mubr.f32.gmra.mrb[4].mxu0 %v4582_v26  ;;  %v872_v54 = vld [vmem:[#allocation3 + $0x168] sm:$0xff] }
 0x118   : > { %v4598_v42 = vmax.f32 %v569_v37, 0.0  ;;  %v3500_v43 = vpop.f32.mrb[10].mxu1  ;;  %3989 = vmatpush1.bf16.msra.mxu0 %v3988_v31  ;;  %1044 = vmatprep.mubr.f32.mxu1 %v4573_v17  ;;  %v4053_v63 = vpack.c.bf16 %v872_v54, %v871_v53  ;;  %v843_v31 = vld [vmem:[#allocation3 + $0x80] sm:$0xff]  ;;  %v844_v32 = vld [vmem:[#allocation3 + $0x88] sm:$0xff] }
 0x119   : > { %768 = vst [vmem:[#allocation2 + $0x81] sm:$0xff] %v4594_v39  ;;  %v584_v45 = vadd.f32 %v3500_v43, %v4551_v47  ;;  %v578_v46 = vpop.f32.mrb[11].mxu1  ;;  %3990 = vmatprep.subr.bf16.mxu0 %v4320_v4  ;;  %4044 = vmatpush3.bf16.msra.mxu1 %v4041_v25  ;;  %v4006_v37 = vpack.c.bf16 %v844_v32, %v843_v31  ;;  %v846_v43 = vld [vmem:[#allocation3 + $0x98] sm:$0xff]  ;;  %v848_v53 = vld [vmem:[#allocation3 + $0xa8] sm:$0xff]  ;;  %v855_v31 = vld [vmem:[#allocation3 + $0xe0] sm:$0xff] }
 0x11a   : > { %767 = vst [vmem:[#allocation2 + $0x79] sm:$0xff] %v4598_v42  ;;  %v579_v50 = vadd.f32 %v4551_v47, %v578_v46  ;;  %3572 = vmatprep.mubr.f32.mxu0 %v4598_v42  ;;  %4046 = vmatprep.subr.bf16.mxu1 %v4045_v38  ;;  %v4009_v48 = vpack.c.bf16 %v846_v43, %v845_v41  ;;  %v856_v32 = vld [vmem:[#allocation3 + $0xe8] sm:$0xff]  ;;  %v910_v43 = vld [vmem:[#allocation2 + $0x1a1] sm:$0xff] }
 0x11b   : > { %v4607_v52 = vmax.f32 %v584_v45, 0.0  ;;  %1045 = vmatmul.mubr.f32.gmra.mrb[40].mxu1 %v4562_v3  ;;  %3573 = vmatmul.mubr.f32.gmra.mrb[6].mxu0 %v4594_v39  ;;  %v874_v3 = vld [vmem:[#allocation3 + $0x178] sm:$0xff]  ;;  %v1930_v41 = vld [vmem:[#allocation3 + $0x408] sm:$0xff] }
 0x11c   : > { %v4611_v55 = vmax.f32 %v579_v50, 0.0  ;;  %v3503_v56 = vpop.f32.mrb[12].mxu1  ;;  %1049 = vmatprep.mubr.f32.mxu1 %v4570_v14  ;;  %3992 = vmatpush1.bf16.msra.mxu0 %v3991_v44  ;;  %v4057_v12 = vpack.c.bf16 %v874_v3, %v873_v2 }
 0x11d   : > { %770 = vst [vmem:[#allocation2 + $0x99] sm:$0xff] %v4607_v52  ;;  %v594_v58 = vadd.f32 %v3503_v56, %v4551_v47  ;;  %v588_v59 = vpop.f32.mrb[13].mxu1  ;;  %3993 = vmatprep.subr.bf16.mxu0 %v4320_v4  ;;  %4048 = vmatpush3.bf16.msra.mxu1 %v4045_v38 }
 0x11e   : > { %769 = vst [vmem:[#allocation2 + $0x91] sm:$0xff] %v4611_v55  ;;  %v589_v62 = vadd.f32 %v4551_v47, %v588_v59  ;;  %3575 = vmatprep.mubr.f32.mxu0 %v4611_v55  ;;  %4050 = vmatprep.subr.bf16.mxu1 %v4049_v51 }
 0x11f   : > { %v4620_v1 = vmax.f32 %v594_v58, 0.0  ;;  %1050 = vmatmul.mubr.f32.gmra.mrb[42].mxu1 %v4560_v0  ;;  %3576 = vmatmul.mubr.f32.gmra.mrb[8].mxu0 %v4607_v52  ;;  %v840_v0 = vld [vmem:[#allocation3 + $0x68] sm:$0xff] }
 0x120   : > { %v4624_v5 = vmax.f32 %v589_v62, 0.0  ;;  %v3506_v6 = vpop.f32.mrb[14].mxu1  ;;  %3995 = vmatpush1.bf16.msra.mxu0 %v3994_v57  ;;  %1054 = vmatprep.mubr.f32.mxu1 %v4585_v29  ;;  %v4000_v18 = vpack.c.bf16 %v840_v0, %v839_v10  ;;  %v850_v62 = vld [vmem:[#allocation3 + $0xb8] sm:$0xff]  ;;  %v852_v10 = vld [vmem:[#allocation3 + $0xc8] sm:$0xff] }
 0x121   : > { %772 = vst [vmem:[#allocation2 + $0xb1] sm:$0xff] %v4620_v1  ;;  %v604_v8 = vadd.f32 %v3506_v6, %v4551_v47  ;;  %v598_v9 = vpop.f32.mrb[15].mxu1  ;;  %3996 = vmatprep.subr.bf16.mxu0 %v4320_v4  ;;  %4052 = vmatpush3.bf16.msra.mxu1 %v4049_v51  ;;  %v847_v51 = vld [vmem:[#allocation3 + $0xa0] sm:$0xff]  ;;  %v4015_v6 = vpack.c.bf16 %v850_v62, %v849_v61  ;;  %v4787_v62 = vld [vmem:[#allocation2 + $0x48] sm:$0xff] }
 0x122   : > { %771 = vst [vmem:[#allocation2 + $0xa9] sm:$0xff] %v4624_v5  ;;  %v599_v11 = vadd.f32 %v4551_v47, %v598_v9  ;;  %3578 = vmatprep.mubr.f32.mxu0 %v4624_v5  ;;  %4054 = vmatprep.subr.bf16.mxu1 %v4053_v63  ;;  %v4012_v58 = vpack.c.bf16 %v848_v53, %v847_v51  ;;  %v851_v9 = vld [vmem:[#allocation3 + $0xc0] sm:$0xff]  ;;  %v794_v51 = vld [vmem:[#allocation2 + $0x20] sm:$0xff] }
 0x123   : > { %v4633_v13 = vmax.f32 %v604_v8, 0.0  ;;  %1055 = vmatmul.mubr.f32.gmra.mrb[44].mxu1 %v4573_v17  ;;  %3579 = vmatmul.mubr.f32.gmra.mrb[10].mxu0 %v4620_v1  ;;  %v1933_v53 = vld [vmem:[#allocation3 + $0x420] sm:$0xff] }
 0x124   : > { %v4637_v15 = vmax.f32 %v599_v11, 0.0  ;;  %v3509_v16 = vpop.f32.mrb[16].mxu1  ;;  %1059 = vmatprep.mubr.f32.mxu1 %v4582_v26  ;;  %3998 = vmatpush1.bf16.msra.mxu0 %v3997_v7 }
 0x125   : > { %774 = vst [vmem:[#allocation2 + $0xc9] sm:$0xff] %v4633_v13  ;;  %v614_v19 = vadd.f32 %v3509_v16, %v4551_v47  ;;  %v608_v20 = vpop.f32.mrb[17].mxu1  ;;  %3999 = vmatprep.subr.bf16.mxu0 %v4320_v4  ;;  %4056 = vmatpush3.bf16.msra.mxu1 %v4053_v63  ;;  %v4018_v16 = vpack.c.bf16 %v852_v10, %v851_v9  ;;  %v1943_v9 = vld [vmem:[#allocation3 + $0x470] sm:$0xff]  ;;  %v1944_v10 = vld [vmem:[#allocation3 + $0x478] sm:$0xff] }
 0x126   : > { %773 = vst [vmem:[#allocation2 + $0xc1] sm:$0xff] %v4637_v15  ;;  %v609_v17 = vadd.f32 %v4551_v47, %v608_v20  ;;  %3581 = vmatprep.mubr.f32.mxu0 %v4637_v15  ;;  %4058 = vmatprep.subr.bf16.mxu1 %v4057_v12  ;;  %v853_v20 = vld [vmem:[#allocation3 + $0xd0] sm:$0xff] }
 0x127   : > { %v4646_v23 = vmax.f32 %v614_v19, 0.0  ;;  %1060 = vmatmul.mubr.f32.gmra.mrb[46].mxu1 %v4570_v14  ;;  %3582 = vmatmul.mubr.f32.gmra.mrb[12].mxu0 %v4633_v13 }
 0x128   : > { %v4650_v24 = vmax.f32 %v609_v17, 0.0  ;;  %v3512_v25 = vpop.f32.mrb[18].mxu1  ;;  %4001 = vmatpush1.bf16.msra.mxu0 %v4000_v18  ;;  %1064 = vmatprep.mubr.f32.mxu1 %v4598_v42 }
 0x129   : > { %776 = vst [vmem:[#allocation2 + $0xe1] sm:$0xff] %v4646_v23  ;;  %v624_v28 = vadd.f32 %v3512_v25, %v4551_v47  ;;  %v618_v30 = vpop.f32.mrb[19].mxu1  ;;  %4002 = vmatprep.subr.bf16.mxu0 %v4320_v4  ;;  %4060 = vmatpush3.bf16.msra.mxu1 %v4057_v12 }
 0x12a   : > { %775 = vst [vmem:[#allocation2 + $0xd9] sm:$0xff] %v4650_v24  ;;  %v619_v14 = vadd.f32 %v4551_v47, %v618_v30  ;;  %3584 = vmatprep.mubr.f32.mxu0 %v4650_v24  ;;  %4061 = vmatprep.subr.bf16.mxu1 %v4320_v4 }
 0x12b   : > { %v4660_v33 = vmax.f32 %v624_v28, 0.0  ;;  %1065 = vmatmul.mubr.f32.gmra.mrb[48].mxu1 %v4585_v29  ;;  %3585 = vmatmul.mubr.f32.gmra.mrb[14].mxu0 %v4646_v23 }
 0x12c   : > { %v4664_v35 = vmax.f32 %v619_v14, 0.0  ;;  %v3515_v36 = vpop.f32.mrb[20].mxu1  ;;  %1069 = vmatprep.mubr.f32.mxu1 %v4594_v39  ;;  %4004 = vmatpush1.bf16.msra.mxu0 %v4003_v27  ;;  %v4021_v27 = vpack.c.bf16 %v854_v21, %v853_v20  ;;  %v1899_v20 = vld [vmem:[#allocation3 + $0x310] sm:$0xff]  ;;  %v1900_v21 = vld [vmem:[#allocation3 + $0x318] sm:$0xff] }
 0x12d   : > { %778 = vst [vmem:[#allocation2 + $0xf9] sm:$0xff] %v4660_v33  ;;  %v634_v38 = vadd.f32 %v3515_v36, %v4551_v47  ;;  %v628_v40 = vpop.f32.mrb[21].mxu1  ;;  %4005 = vmatprep.subr.bf16.mxu0 %v4320_v4 }
 0x12e   : > { %777 = vst [vmem:[#allocation2 + $0xf1] sm:$0xff] %v4664_v35  ;;  %v629_v29 = vadd.f32 %v4551_v47, %v628_v40  ;;  %3587 = vmatprep.mubr.f32.mxu0 %v4664_v35  ;;  %v909_v40 = vld [vmem:[#allocation2 + $0x199] sm:$0xff] }
 0x12f   : > { %v4673_v44 = vmax.f32 %v634_v38, 0.0  ;;  %1070 = vmatmul.mubr.f32.gmra.mrb[50].mxu1 %v4582_v26  ;;  %3588 = vmatmul.mubr.f32.gmra.mrb[16].mxu0 %v4660_v33  ;;  %v857_v38 = vld [vmem:[#allocation3 + $0xf0] sm:$0xff] }
 0x130   : > { %v4677_v45 = vmax.f32 %v629_v29, 0.0  ;;  %v3518_v46 = vpop.f32.mrb[22].mxu1  ;;  %4007 = vmatpush1.bf16.msra.mxu0 %v4006_v37  ;;  %1074 = vmatprep.mubr.f32.mxu1 %v4611_v55  ;;  %v4024_v37 = vpack.c.bf16 %v856_v32, %v855_v31  ;;  %v1904_v31 = vld [vmem:[#allocation3 + $0x338] sm:$0xff] }
 0x131   : > { %780 = vst [vmem:[#allocation2 + $0x111] sm:$0xff] %v4673_v44  ;;  %v644_v49 = vadd.f32 %v3518_v46, %v4551_v47  ;;  %v638_v50 = vpop.f32.mrb[23].mxu1  ;;  %4008 = vmatprep.subr.bf16.mxu0 %v4320_v4 }
 0x132   : > { %779 = vst [vmem:[#allocation2 + $0x109] sm:$0xff] %v4677_v45  ;;  %v639_v26 = vadd.f32 %v4551_v47, %v638_v50  ;;  %3590 = vmatprep.mubr.f32.mxu0 %v4677_v45 }
 0x133   : > { %v4686_v54 = vmax.f32 %v644_v49, 0.0  ;;  %1075 = vmatmul.mubr.f32.gmra.mrb[52].mxu1 %v4598_v42  ;;  %3591 = vmatmul.mubr.f32.gmra.mrb[18].mxu0 %v4673_v44  ;;  %v1932_v49 = vld [vmem:[#allocation3 + $0x418] sm:$0xff] }
 0x134   : > { %v4690_v56 = vmax.f32 %v639_v26, 0.0  ;;  %v3521_v57 = vpop.f32.mrb[24].mxu1  ;;  %1079 = vmatprep.mubr.f32.mxu1 %v4607_v52  ;;  %4010 = vmatpush1.bf16.msra.mxu0 %v4009_v48  ;;  %v1931_v48 = vld [vmem:[#allocation3 + $0x410] sm:$0xff]  ;;  %v1934_v26 = vld [vmem:[#allocation3 + $0x428] sm:$0xff] }
 0x135   : > { %782 = vst [vmem:[#allocation2 + $0x129] sm:$0xff] %v4686_v54  ;;  %v654_v59 = vadd.f32 %v3521_v57, %v4551_v47  ;;  %v648_v60 = vpop.f32.mrb[25].mxu1  ;;  %4011 = vmatprep.subr.bf16.mxu0 %v4320_v4  ;;  %v4758_v50 = vpack.c.bf16 %v1932_v49, %v1931_v48  ;;  %v4769_v57 = vld [vmem:[#allocation2 + $0x30] sm:$0xff] }
 0x136   : > { %781 = vst [vmem:[#allocation2 + $0x121] sm:$0xff] %v4690_v56  ;;  %v649_v42 = vadd.f32 %v4551_v47, %v648_v60  ;;  %3593 = vmatprep.mubr.f32.mxu0 %v4690_v56  ;;  %v1938_v60 = vld [vmem:[#allocation3 + $0x448] sm:$0xff]  ;;  %v811_v32 = vld [vmem:[#allocation2 + $0xf0] sm:$0xff] }
 0x137   : > { %v4699_v63 = vmax.f32 %v654_v59, 0.0  ;;  %1080 = vmatmul.mubr.f32.gmra.mrb[54].mxu1 %v4594_v39  ;;  %3594 = vmatmul.mubr.f32.gmra.mrb[20].mxu0 %v4686_v54 }
 0x138   : > { %v4703_v2 = vmax.f32 %v649_v42, 0.0  ;;  %v3524_v3 = vpop.f32.mrb[26].mxu1  ;;  %4013 = vmatpush1.bf16.msra.mxu0 %v4012_v58  ;;  %1084 = vmatprep.mubr.f32.mxu1 %v4624_v5  ;;  %v1936_v58 = vld [vmem:[#allocation3 + $0x438] sm:$0xff] }
 0x139   : > { %784 = vst [vmem:[#allocation2 + $0x141] sm:$0xff] %v4699_v63  ;;  %v664_v7 = vadd.f32 %v3524_v3, %v4551_v47  ;;  %v658_v8 = vpop.f32.mrb[27].mxu1  ;;  %4014 = vmatprep.subr.bf16.mxu0 %v4320_v4  ;;  %v1940_v42 = vld [vmem:[#allocation3 + $0x458] sm:$0xff]  ;;  %v814_v48 = vld [vmem:[#allocation2 + $0x110] sm:$0xff] }
 0x13a   : > { %783 = vst [vmem:[#allocation2 + $0x139] sm:$0xff] %v4703_v2  ;;  %v659_v39 = vadd.f32 %v4551_v47, %v658_v8  ;;  %3596 = vmatprep.mubr.f32.mxu0 %v4703_v2 }
 0x13b   : > { %v4712_v0 = vmax.f32 %v664_v7, 0.0  ;;  %1085 = vmatmul.mubr.f32.gmra.mrb[56].mxu1 %v4611_v55  ;;  %3597 = vmatmul.mubr.f32.gmra.mrb[22].mxu0 %v4699_v63  ;;  %v1942_v7 = vld [vmem:[#allocation3 + $0x468] sm:$0xff] }
 0x13c   : > { %v4716_v11 = vmax.f32 %v659_v39, 0.0  ;;  %v3527_v12 = vpop.f32.mrb[28].mxu1  ;;  %1089 = vmatprep.mubr.f32.mxu1 %v4620_v1  ;;  %4016 = vmatpush1.bf16.msra.mxu0 %v4015_v6  ;;  %v1941_v6 = vld [vmem:[#allocation3 + $0x460] sm:$0xff]  ;;  %v4813_v39 = vpack.c.bf16 %v1944_v10, %v1943_v9  ;;  %v1920_v9 = vld [vmem:[#allocation3 + $0x3b8] sm:$0xff] }
 0x13d   : > { %786 = vst [vmem:[#allocation2 + $0x159] sm:$0xff] %v4712_v0  ;;  %v674_v18 = vadd.f32 %v3527_v12, %v4551_v47  ;;  %v668_v19 = vpop.f32.mrb[29].mxu1  ;;  %4017 = vmatprep.subr.bf16.mxu0 %v4320_v4  ;;  %v4803_v8 = vpack.c.bf16 %v1942_v7, %v1941_v6  ;;  %v4825_v12 = vld [vmem:[#allocation2 + $0x78] sm:$0xff] }
 0x13e   : > { %785 = vst [vmem:[#allocation2 + $0x151] sm:$0xff] %v4716_v11  ;;  %v669_v55 = vadd.f32 %v4551_v47, %v668_v19  ;;  %3599 = vmatprep.mubr.f32.mxu0 %v4716_v11 }
 0x13f   : > { %v4725_v22 = vmax.f32 %v674_v18, 0.0  ;;  %1090 = vmatmul.mubr.f32.gmra.mrb[58].mxu1 %v4607_v52  ;;  %3600 = vmatmul.mubr.f32.gmra.mrb[24].mxu0 %v4712_v0  ;;  %v4868_v18 = vld [vmem:[#allocation2 + $0xc8] sm:$0xff] }
 0x140   : > { %v4729_v17 = vmax.f32 %v669_v55, 0.0  ;;  %v3530_v25 = vpop.f32.mrb[30].mxu1  ;;  %4019 = vmatpush1.bf16.msra.mxu0 %v4018_v16  ;;  %1094 = vmatprep.mubr.f32.mxu1 %v4637_v15  ;;  %v1897_v16 = vld [vmem:[#allocation3 + $0x300] sm:$0xff]  ;;  %v4874_v55 = vld [vmem:[#allocation2 + $0xd8] sm:$0xff] }
 0x141   : > { %788 = vst [vmem:[#allocation2 + $0x171] sm:$0xff] %v4725_v22  ;;  %v684_v28 = vadd.f32 %v3530_v25, %v4551_v47  ;;  %v678_v30 = vpop.f32.mrb[31].mxu1  ;;  %4020 = vmatprep.subr.bf16.mxu0 %v4320_v4  ;;  %v1902_v25 = vld [vmem:[#allocation3 + $0x328] sm:$0xff]  ;;  %v818_v6 = vld [vmem:[#allocation2 + $0x140] sm:$0xff] }
 0x142   : > { %787 = vst [vmem:[#allocation2 + $0x169] sm:$0xff] %v4729_v17  ;;  %v679_v52 = vadd.f32 %v4551_v47, %v678_v30  ;;  %3602 = vmatprep.mubr.f32.mxu0 %v4729_v17  ;;  %v858_v47 = vld [vmem:[#allocation3 + $0xf8] sm:$0xff]  ;;  %v1903_v30 = vld [vmem:[#allocation3 + $0x330] sm:$0xff] }
 0x143   : > { %v4738_v14 = vmax.f32 %v684_v28, 0.0  ;;  %1095 = vmatmul.mubr.f32.gmra.mrb[60].mxu1 %v4624_v5  ;;  %3603 = vmatmul.mubr.f32.gmra.mrb[26].mxu0 %v4725_v22  ;;  %v1929_v5 = vld [vmem:[#allocation3 + $0x400] sm:$0xff]  ;;  %v4027_v29 = vpack.c.bf16 %v858_v47, %v857_v38  ;;  %v1907_v47 = vld [vmem:[#allocation3 + $0x350] sm:$0xff] }
 0x144   : > { %v4742_v36 = vmax.f32 %v679_v52, 0.0  ;;  %1099 = vmatprep.mubr.f32.mxu1 %v4633_v13  ;;  %4022 = vmatpush1.bf16.msra.mxu0 %v4021_v27  ;;  %v4753_v46 = vpack.c.bf16 %v1930_v41, %v1929_v5  ;;  %v810_v27 = vld [vmem:[#allocation2 + $0xe0] sm:$0xff]  ;;  %v4071_v52 = vpack.c.bf16 %v1904_v31, %v1903_v30  ;;  %v813_v5 = vld [vmem:[#allocation2 + $0x108] sm:$0xff] }
 0x145   : > { %790 = vst [vmem:[#allocation2 + $0x189] sm:$0xff] %v4738_v14  ;;  %4023 = vmatprep.subr.bf16.mxu0 %v4320_v4  ;;  %v819_v10 = vld [vmem:[#allocation2 + $0x150] sm:$0xff]  ;;  %v1860_v30 = vld [vmem:[#allocation2 + $0x2] sm:$0xff] }
 0x146   : > { %789 = vst [vmem:[#allocation2 + $0x181] sm:$0xff] %v4742_v36  ;;  %3605 = vmatprep.mubr.f32.mxu0 %v4742_v36  ;;  %v1863_v31 = vld [vmem:[#allocation2 + $0x22] sm:$0xff] }
 0x147   : > { %1100 = vmatmul.mubr.f32.gmra.mrb[62].mxu1 %v4620_v1  ;;  %3606 = vmatmul.mubr.f32.gmra.mrb[28].mxu0 %v4738_v14  ;;  %v793_v1 = vld [vmem:[#allocation2 + $0x18] sm:$0xff] }
 0x148   : > { %4025 = vmatpush1.bf16.msra.mxu0 %v4024_v37  ;;  %1104 = vmatprep.mubr.f32.mxu1 %v4650_v24  ;;  %v812_v37 = vld [vmem:[#allocation2 + $0xf8] sm:$0xff] }
 0x149   : > { %3608 = vmatprep.mubr.f32.mxu0 %v909_v40  ;;  %4026 = vmatprep.subr.bf16.mxu0 %v4320_v4  ;;  %v1908_v40 = vld [vmem:[#allocation3 + $0x358] sm:$0xff] }
 0x14a   : > { %v4077_v41 = vpack.c.bf16 %v1908_v40, %v1907_v47  ;;  %v4930_v40 = vld [vmem:[#allocation2 + $0x9a] sm:$0xff] }
 0x14b   : > { %1105 = vmatmul.mubr.f32.gmra.mrb[64].mxu1 %v4637_v15  ;;  %3609 = vmatmul.mubr.f32.gmra.mrb[30].mxu0 %v910_v43  ;;  %v4765_v15 = vpack.c.bf16 %v1934_v26, %v1933_v53  ;;  %v1909_v43 = vld [vmem:[#allocation3 + $0x360] sm:$0xff]  ;;  %v815_v53 = vld [vmem:[#allocation2 + $0x120] sm:$0xff] }
 0x14c   : > { %1109 = vmatprep.mubr.f32.mxu1 %v4646_v23  ;;  %4028 = vmatpush1.bf16.msra.mxu0 %v4027_v29  ;;  %v1910_v29 = vld [vmem:[#allocation3 + $0x368] sm:$0xff] }
 0x14d   : > { %1474 = vmatprep.mubr.f32.mxu0 %v793_v1  ;;  %4110 = vmatprep.subr.bf16.mxu0 %v4753_v46  ;;  %v4080_v49 = vpack.c.bf16 %v1910_v29, %v1909_v43  ;;  %v4938_v29 = vld [vmem:[#allocation2 + $0xb2] sm:$0xff] }
 0x14f   : > { %1110 = vmatmul.mubr.f32.gmra.mrb[66].mxu1 %v4633_v13  ;;  %1475 = vmatmul.mubr.f32.vlgmr.msra.gmra.mrb[32].mxu0 %v4321_v34  ;;  %v1935_v13 = vld [vmem:[#allocation3 + $0x430] sm:$0xff] }
 0x150   : > { %1479 = vmatprep.mubr.f32.mxu0 %v794_v51  ;;  %1114 = vmatprep.mubr.f32.mxu1 %v4664_v35  ;;  %v4775_v59 = vpack.c.bf16 %v1936_v58, %v1935_v13  ;;  %v1914_v13 = vld [vmem:[#allocation3 + $0x388] sm:$0xff]  ;;  %v816_v58 = vld [vmem:[#allocation2 + $0x128] sm:$0xff] }
 0x151   : > { %4112 = vmatpush3.bf16.msra.mxu0 %v4753_v46 }
 0x152   : > { %4114 = vmatprep.subr.bf16.mxu0 %v4758_v50 }
 0x153   : > { %1115 = vmatmul.mubr.f32.gmra.mrb[68].mxu1 %v4650_v24  ;;  %1480 = vmatmul.mubr.f32.gmra.mrb[34].mxu0 %v4321_v34  ;;  %v4778_v24 = vld [vmem:[#allocation2 + $0x38] sm:$0xff]  ;;  %v1937_v34 = vld [vmem:[#allocation3 + $0x440] sm:$0xff] }
 0x154   : > { %1119 = vmatprep.mubr.f32.mxu1 %v4660_v33  ;;  %1484 = vmatprep.mubr.f32.mxu0 %v4769_v57  ;;  %v4784_v61 = vpack.c.bf16 %v1938_v60, %v1937_v34  ;;  %v1915_v34 = vld [vmem:[#allocation3 + $0x390] sm:$0xff]  ;;  %v1916_v60 = vld [vmem:[#allocation3 + $0x398] sm:$0xff] }
 0x155   : > { %4116 = vmatpush3.bf16.msra.mxu0 %v4758_v50 }
 0x156   : > { %4118 = vmatprep.subr.bf16.mxu0 %v4765_v15 }
 0x157   : > { %1120 = vmatmul.mubr.f32.gmra.mrb[70].mxu1 %v4646_v23  ;;  %1485 = vmatmul.mubr.f32.gmra.mrb[36].mxu0 %v793_v1  ;;  %v1939_v23 = vld [vmem:[#allocation3 + $0x450] sm:$0xff] }
 0x158   : > { %1489 = vmatprep.mubr.f32.mxu0 %v4778_v24  ;;  %1124 = vmatprep.mubr.f32.mxu1 %v4677_v45  ;;  %v4793_v3 = vpack.c.bf16 %v1940_v42, %v1939_v23  ;;  %v1911_v1 = vld [vmem:[#allocation3 + $0x370] sm:$0xff]  ;;  %v4089_v23 = vpack.c.bf16 %v1916_v60, %v1915_v34  ;;  %v1917_v42 = vld [vmem:[#allocation3 + $0x3a0] sm:$0xff] }
 0x159   : > { %4120 = vmatpush3.bf16.msra.mxu0 %v4765_v15  ;;  %v4962_v34 = vld [vmem:[#allocation2 + $0xe2] sm:$0xff] }
 0x15a   : > { %4122 = vmatprep.subr.bf16.mxu0 %v4775_v59 }
 0x15b   : > { %1125 = vmatmul.mubr.f32.gmra.mrb[72].mxu1 %v4664_v35  ;;  %1490 = vmatmul.mubr.f32.gmra.mrb[38].mxu0 %v794_v51  ;;  %v4797_v35 = vld [vmem:[#allocation2 + $0x50] sm:$0xff]  ;;  %v1912_v51 = vld [vmem:[#allocation3 + $0x378] sm:$0xff] }
 0x15c   : > { %1129 = vmatprep.mubr.f32.mxu1 %v4673_v44  ;;  %1494 = vmatprep.mubr.f32.mxu0 %v4787_v62  ;;  %v4083_v26 = vpack.c.bf16 %v1912_v51, %v1911_v1  ;;  %v4944_v1 = vld [vmem:[#allocation2 + $0xc2] sm:$0xff] }
 0x15d   : > { %4124 = vmatpush3.bf16.msra.mxu0 %v4775_v59 }
 0x15e   : > { %4126 = vmatprep.subr.bf16.mxu0 %v4784_v61 }
 0x15f   : > { %1130 = vmatmul.mubr.f32.gmra.mrb[74].mxu1 %v4660_v33  ;;  %1495 = vmatmul.mubr.f32.gmra.mrb[40].mxu0 %v4769_v57  ;;  %v4807_v33 = vld [vmem:[#allocation2 + $0x60] sm:$0xff] }
 0x160   : > { %1499 = vmatprep.mubr.f32.mxu0 %v4797_v35  ;;  %1134 = vmatprep.mubr.f32.mxu1 %v4690_v56 }
 0x161   : > { %4128 = vmatpush3.bf16.msra.mxu0 %v4784_v61 }
 0x162   : > { %4130 = vmatprep.subr.bf16.mxu0 %v4793_v3 }
 0x163   : > { %1135 = vmatmul.mubr.f32.gmra.mrb[76].mxu1 %v4677_v45  ;;  %1500 = vmatmul.mubr.f32.gmra.mrb[42].mxu0 %v4778_v24  ;;  %v4817_v45 = vld [vmem:[#allocation2 + $0x68] sm:$0xff] }
 0x164   : > { %1139 = vmatprep.mubr.f32.mxu1 %v4686_v54  ;;  %1504 = vmatprep.mubr.f32.mxu0 %v4807_v33 }
 0x165   : > { %4132 = vmatpush3.bf16.msra.mxu0 %v4793_v3 }
 0x166   : > { %4134 = vmatprep.subr.bf16.mxu0 %v4803_v8 }
 0x167   : > { %1140 = vmatmul.mubr.f32.gmra.mrb[78].mxu1 %v4673_v44  ;;  %1505 = vmatmul.mubr.f32.gmra.mrb[44].mxu0 %v4787_v62  ;;  %v4832_v44 = vld [vmem:[#allocation2 + $0x80] sm:$0xff] }
 0x168   : > { %1509 = vmatprep.mubr.f32.mxu0 %v4817_v45  ;;  %1144 = vmatprep.mubr.f32.mxu1 %v4703_v2 }
 0x169   : > { %4136 = vmatpush3.bf16.msra.mxu0 %v4803_v8 }
 0x16a   : > { %4138 = vmatprep.subr.bf16.mxu0 %v4813_v39 }
 0x16b   : > { %1145 = vmatmul.mubr.f32.gmra.mrb[80].mxu1 %v4690_v56  ;;  %1510 = vmatmul.mubr.f32.gmra.mrb[46].mxu0 %v4797_v35  ;;  %v4838_v56 = vld [vmem:[#allocation2 + $0x90] sm:$0xff] }
 0x16c   : > { %1149 = vmatprep.mubr.f32.mxu1 %v4699_v63  ;;  %1514 = vmatprep.mubr.f32.mxu0 %v4825_v12 }
 0x16d   : > { %4140 = vmatpush3.bf16.msra.mxu0 %v4813_v39 }
 0x16f   : > { %1150 = vmatmul.mubr.f32.gmra.mrb[82].mxu1 %v4686_v54  ;;  %1515 = vmatmul.mubr.f32.gmra.mrb[48].mxu0 %v4807_v33  ;;  %v4844_v54 = vld [vmem:[#allocation2 + $0x98] sm:$0xff] }
 0x170   : > { %1519 = vmatprep.mubr.f32.mxu0 %v4832_v44  ;;  %1154 = vmatprep.mubr.f32.mxu1 %v4716_v11 }
 0x173   : > { %1155 = vmatmul.mubr.f32.gmra.mrb[84].mxu1 %v4703_v2  ;;  %1520 = vmatmul.mubr.f32.gmra.mrb[50].mxu0 %v4817_v45  ;;  %v4850_v2 = vld [vmem:[#allocation2 + $0xa8] sm:$0xff] }
 0x174   : > { %1159 = vmatprep.mubr.f32.mxu1 %v4712_v0  ;;  %1524 = vmatprep.mubr.f32.mxu0 %v4838_v56 }
 0x177   : > { %1160 = vmatmul.mubr.f32.gmra.mrb[86].mxu1 %v4699_v63  ;;  %1525 = vmatmul.mubr.f32.gmra.mrb[52].mxu0 %v4825_v12  ;;  %v4856_v63 = vld [vmem:[#allocation2 + $0xb0] sm:$0xff] }
 0x178   : > { %1529 = vmatprep.mubr.f32.mxu0 %v4844_v54  ;;  %1164 = vmatprep.mubr.f32.mxu1 %v4729_v17 }
 0x17b   : > { %1165 = vmatmul.mubr.f32.gmra.mrb[88].mxu1 %v4716_v11  ;;  %1530 = vmatmul.mubr.f32.gmra.mrb[54].mxu0 %v4832_v44  ;;  %v4862_v11 = vld [vmem:[#allocation2 + $0xc0] sm:$0xff] }
 0x17c   : > { %1169 = vmatprep.mubr.f32.mxu1 %v4725_v22  ;;  %1534 = vmatprep.mubr.f32.mxu0 %v4850_v2 }
 0x17f   : > { %1170 = vmatmul.mubr.f32.gmra.mrb[90].mxu1 %v4712_v0  ;;  %1535 = vmatmul.mubr.f32.gmra.mrb[56].mxu0 %v4838_v56  ;;  %v1898_v0 = vld [vmem:[#allocation3 + $0x308] sm:$0xff] }
 0x180   : > { %1539 = vmatprep.mubr.f32.mxu0 %v4856_v63  ;;  %1174 = vmatprep.mubr.f32.mxu1 %v4742_v36  ;;  %v4062_v19 = vpack.c.bf16 %v1898_v0, %v1897_v16  ;;  %v1906_v36 = vld [vmem:[#allocation3 + $0x348] sm:$0xff]  ;;  %v1925_v0 = vld [vmem:[#allocation3 + $0x3e0] sm:$0xff] }
 0x183   : > { %1175 = vmatmul.mubr.f32.gmra.mrb[92].mxu1 %v4729_v17  ;;  %1540 = vmatmul.mubr.f32.gmra.mrb[58].mxu0 %v4844_v54  ;;  %v1901_v17 = vld [vmem:[#allocation3 + $0x320] sm:$0xff] }
 0x184   : > { %1179 = vmatprep.mubr.f32.mxu1 %v4738_v14  ;;  %1544 = vmatprep.mubr.f32.mxu0 %v4862_v11  ;;  %v4068_v28 = vpack.c.bf16 %v1902_v25, %v1901_v17  ;;  %v1905_v14 = vld [vmem:[#allocation3 + $0x340] sm:$0xff]  ;;  %v824_v17 = vld [vmem:[#allocation2 + $0x188] sm:$0xff] }
 0x185   : > { %v4074_v38 = vpack.c.bf16 %v1906_v36, %v1905_v14  ;;  %v1866_v14 = vld [vmem:[#allocation2 + $0x4a] sm:$0xff]  ;;  %v1867_v36 = vld [vmem:[#allocation2 + $0x52] sm:$0xff] }
 0x187   : > { %1180 = vmatmul.mubr.f32.gmra.mrb[94].mxu1 %v4725_v22  ;;  %1545 = vmatmul.mubr.f32.gmra.mrb[60].mxu0 %v4850_v2  ;;  %v4065_v22 = vpack.c.bf16 %v1900_v21, %v1899_v20  ;;  %v823_v20 = vld [vmem:[#allocation2 + $0x180] sm:$0xff] }
 0x188   : > { %1549 = vmatprep.mubr.f32.mxu0 %v4868_v18  ;;  %3643 = vmatprep.mubr.f32.mxu1 %v4769_v57  ;;  %v1913_v57 = vld [vmem:[#allocation3 + $0x380] sm:$0xff] }
 0x18b   : > { %1550 = vmatmul.mubr.f32.gmra.mrb[62].mxu0 %v4856_v63  ;;  %3644 = vmatmul.mubr.f32.vlgmr.msra.gmra.mrb[96].mxu1 %v4778_v24  ;;  %v4086_v24 = vpack.c.bf16 %v1914_v13, %v1913_v57 }
 0x18c   : > { %4063 = vmatpush1.bf16.msra.mxu1 %v4062_v19  ;;  %1554 = vmatprep.mubr.f32.mxu0 %v4874_v55  ;;  %v822_v19 = vld [vmem:[#allocation2 + $0x170] sm:$0xff] }
 0x18d   : > { %3646 = vmatprep.mubr.f32.mxu1 %v4787_v62  ;;  %4064 = vmatprep.subr.bf16.mxu1 %v4320_v4  ;;  %v817_v62 = vld [vmem:[#allocation2 + $0x138] sm:$0xff] }
 0x18f   : > { %1555 = vmatmul.mubr.f32.gmra.mrb[64].mxu0 %v4862_v11  ;;  %3647 = vmatmul.mubr.f32.gmra.mrb[98].mxu1 %v4797_v35  ;;  %v1918_v35 = vld [vmem:[#allocation3 + $0x3a8] sm:$0xff] }
 0x190   : > { %4066 = vmatpush1.bf16.msra.mxu1 %v4065_v22  ;;  %1559 = vmatprep.mubr.f32.mxu0 %v810_v27  ;;  %v4092_v7 = vpack.c.bf16 %v1918_v35, %v1917_v42  ;;  %v1928_v22 = vld [vmem:[#allocation3 + $0x3f8] sm:$0xff]  ;;  %v4967_v42 = vld [vmem:[#allocation2 + $0xf2] sm:$0xff] }
 0x191   : > { %3649 = vmatprep.mubr.f32.mxu1 %v4807_v33  ;;  %4067 = vmatprep.subr.bf16.mxu1 %v4320_v4  ;;  %v1919_v33 = vld [vmem:[#allocation3 + $0x3b0] sm:$0xff] }
 0x193   : > { %1560 = vmatmul.mubr.f32.gmra.mrb[66].mxu0 %v4868_v18  ;;  %3650 = vmatmul.mubr.f32.gmra.mrb[100].mxu1 %v4817_v45  ;;  %v4095_v45 = vpack.c.bf16 %v1920_v9, %v1919_v33 }
 0x194   : > { %4069 = vmatpush1.bf16.msra.mxu1 %v4068_v28  ;;  %1564 = vmatprep.mubr.f32.mxu0 %v811_v32  ;;  %v1862_v28 = vld [vmem:[#allocation2 + $0x1a] sm:$0xff] }
 0x195   : > { %3652 = vmatprep.mubr.f32.mxu1 %v4825_v12  ;;  %4070 = vmatprep.subr.bf16.mxu1 %v4320_v4  ;;  %v1921_v12 = vld [vmem:[#allocation3 + $0x3c0] sm:$0xff] }
 0x197   : > { %1565 = vmatmul.mubr.f32.gmra.mrb[68].mxu0 %v4874_v55  ;;  %3653 = vmatmul.mubr.f32.gmra.mrb[102].mxu1 %v4832_v44  ;;  %v1922_v44 = vld [vmem:[#allocation3 + $0x3c8] sm:$0xff] }
 0x198   : > { %4072 = vmatpush1.bf16.msra.mxu1 %v4071_v52  ;;  %1569 = vmatprep.mubr.f32.mxu0 %v812_v37  ;;  %v1861_v52 = vld [vmem:[#allocation2 + $0xa] sm:$0xff] }
 0x199   : > { %3655 = vmatprep.mubr.f32.mxu1 %v4838_v56  ;;  %4073 = vmatprep.subr.bf16.mxu1 %v4320_v4  ;;  %v820_v56 = vld [vmem:[#allocation2 + $0x158] sm:$0xff] }
 0x19b   : > { %1570 = vmatmul.mubr.f32.gmra.mrb[70].mxu0 %v810_v27  ;;  %3656 = vmatmul.mubr.f32.gmra.mrb[104].mxu1 %v4844_v54  ;;  %v4098_v54 = vpack.c.bf16 %v1922_v44, %v1921_v12 }
 0x19c   : > { %4075 = vmatpush1.bf16.msra.mxu1 %v4074_v38  ;;  %1574 = vmatprep.mubr.f32.mxu0 %v813_v5  ;;  %v4918_v38 = vld [vmem:[#allocation2 + $0x7a] sm:$0xff] }
 0x19d   : > { %3658 = vmatprep.mubr.f32.mxu1 %v4850_v2  ;;  %4076 = vmatprep.subr.bf16.mxu1 %v4320_v4  ;;  %v1923_v2 = vld [vmem:[#allocation3 + $0x3d0] sm:$0xff] }
 0x19f   : > { %1575 = vmatmul.mubr.f32.gmra.mrb[72].mxu0 %v811_v32  ;;  %3659 = vmatmul.mubr.f32.gmra.mrb[106].mxu1 %v4856_v63  ;;  %v1924_v63 = vld [vmem:[#allocation3 + $0x3d8] sm:$0xff] }
 0x1a0   : > { %4078 = vmatpush1.bf16.msra.mxu1 %v4077_v41  ;;  %1579 = vmatprep.mubr.f32.mxu0 %v814_v48  ;;  %v4101_v16 = vpack.c.bf16 %v1924_v63, %v1923_v2 }
 0x1a1   : > { %3661 = vmatprep.mubr.f32.mxu1 %v4862_v11  ;;  %4079 = vmatprep.subr.bf16.mxu1 %v4320_v4  ;;  %v821_v11 = vld [vmem:[#allocation2 + $0x168] sm:$0xff] }
 0x1a3   : > { %1580 = vmatmul.mubr.f32.gmra.mrb[74].mxu0 %v812_v37  ;;  %3662 = vmatmul.mubr.f32.gmra.mrb[108].mxu1 %v4868_v18  ;;  %v1926_v18 = vld [vmem:[#allocation3 + $0x3e8] sm:$0xff] }
 0x1a4   : > { %4081 = vmatpush1.bf16.msra.mxu1 %v4080_v49  ;;  %1584 = vmatprep.mubr.f32.mxu0 %v815_v53  ;;  %v4104_v21 = vpack.c.bf16 %v1926_v18, %v1925_v0  ;;  %v4996_v18 = vld [vmem:[#allocation2 + $0x12a] sm:$0xff] }
 0x1a5   : > { %3664 = vmatprep.mubr.f32.mxu1 %v4874_v55  ;;  %4082 = vmatprep.subr.bf16.mxu1 %v4320_v4  ;;  %v1927_v55 = vld [vmem:[#allocation3 + $0x3f0] sm:$0xff] }
 0x1a6   : > { %v4107_v25 = vpack.c.bf16 %v1928_v22, %v1927_v55  ;;  %v5002_v55 = vld [vmem:[#allocation2 + $0x13a] sm:$0xff] }
 0x1a7   : > { %1585 = vmatmul.mubr.f32.gmra.mrb[76].mxu0 %v813_v5  ;;  %3665 = vmatmul.mubr.f32.gmra.mrb[110].mxu1 %v810_v27  ;;  %v4244_v27 = vld [vmem:[#allocation2] sm:$0xff] }
 0x1a8   : > { %4084 = vmatpush1.bf16.msra.mxu1 %v4083_v26  ;;  %1589 = vmatprep.mubr.f32.mxu0 %v816_v58  ;;  %v4951_v26 = vld [vmem:[#allocation2 + $0xca] sm:$0xff] }
 0x1a9   : > { %3667 = vmatprep.mubr.f32.mxu1 %v811_v32  ;;  %4085 = vmatprep.subr.bf16.mxu1 %v4320_v4  ;;  %v1864_v32 = vld [vmem:[#allocation2 + $0x32] sm:$0xff] }
 0x1ab   : > { %1590 = vmatmul.mubr.f32.gmra.mrb[78].mxu0 %v814_v48  ;;  %3668 = vmatmul.mubr.f32.gmra.mrb[112].mxu1 %v812_v37  ;;  %v4914_v37 = vld [vmem:[#allocation2 + $0x6a] sm:$0xff] }
 0x1ac   : > { %4087 = vmatpush1.bf16.msra.mxu1 %v4086_v24  ;;  %1594 = vmatprep.mubr.f32.mxu0 %v817_v62 }
 0x1ad   : > { %3670 = vmatprep.mubr.f32.mxu1 %v813_v5  ;;  %4088 = vmatprep.subr.bf16.mxu1 %v4320_v4  ;;  %v4934_v5 = vld [vmem:[#allocation2 + $0xaa] sm:$0xff] }
 0x1af   : > { %1595 = vmatmul.mubr.f32.gmra.mrb[80].mxu0 %v815_v53  ;;  %3671 = vmatmul.mubr.f32.gmra.mrb[114].mxu1 %v814_v48 }
 0x1b0   : > { %4090 = vmatpush1.bf16.msra.mxu1 %v4089_v23  ;;  %1599 = vmatprep.mubr.f32.mxu0 %v818_v6 }
 0x1b1   : > { %3673 = vmatprep.mubr.f32.mxu1 %v815_v53  ;;  %4091 = vmatprep.subr.bf16.mxu1 %v4320_v4 }
 0x1b3   : > { %1600 = vmatmul.mubr.f32.gmra.mrb[82].mxu0 %v816_v58  ;;  %3674 = vmatmul.mubr.f32.gmra.mrb[116].mxu1 %v816_v58  ;;  %v4955_v58 = vld [vmem:[#allocation2 + $0xda] sm:$0xff] }
 0x1b4   : > { %4093 = vmatpush1.bf16.msra.mxu1 %v4092_v7  ;;  %1604 = vmatprep.mubr.f32.mxu0 %v819_v10  ;;  %v4975_v7 = vld [vmem:[#allocation2 + $0xfa] sm:$0xff] }
 0x1b5   : > { %3676 = vmatprep.mubr.f32.mxu1 %v817_v62  ;;  %4094 = vmatprep.subr.bf16.mxu1 %v4320_v4 }
 0x1b7   : > { %1605 = vmatmul.mubr.f32.gmra.mrb[84].mxu0 %v817_v62  ;;  %3677 = vmatmul.mubr.f32.gmra.mrb[118].mxu1 %v818_v6 }
 0x1b8   : > { %4096 = vmatpush1.bf16.msra.mxu1 %v4095_v45  ;;  %1609 = vmatprep.mubr.f32.mxu0 %v820_v56  ;;  %v4982_v45 = vld [vmem:[#allocation2 + $0x10a] sm:$0xff] }
 0x1b9   : > { %3679 = vmatprep.mubr.f32.mxu1 %v819_v10  ;;  %4097 = vmatprep.subr.bf16.mxu1 %v4320_v4 }
 0x1bb   : > { %1610 = vmatmul.mubr.f32.gmra.mrb[86].mxu0 %v818_v6  ;;  %3680 = vmatmul.mubr.f32.gmra.mrb[120].mxu1 %v820_v56  ;;  %v2514_v6 = vld [vmem:[%s5613_s7] sm:$0xf] }
 0x1bc   : > { %4099 = vmatpush1.bf16.msra.mxu1 %v4098_v54  ;;  %1614 = vmatprep.mubr.f32.mxu0 %v821_v11 }
 0x1bd   : > { %3682 = vmatprep.mubr.f32.mxu1 %v821_v11  ;;  %4100 = vmatprep.subr.bf16.mxu1 %v4320_v4 }
 0x1be   : > { %3771 = vmatprep.subr.msk.mxu0 %vm458_vm0, %v2514_v6 }
 0x1bf   : > { %1615 = vmatmul.mubr.f32.gmra.mrb[88].mxu0 %v819_v10  ;;  %3683 = vmatmul.mubr.f32.gmra.mrb[122].mxu1 %v822_v19 }
 0x1c0   : > { %4102 = vmatpush1.bf16.msra.mxu1 %v4101_v16  ;;  %1619 = vmatprep.mubr.f32.mxu0 %v822_v19 }
 0x1c1   : > { %3685 = vmatprep.mubr.f32.mxu1 %v823_v20  ;;  %4103 = vmatprep.subr.bf16.mxu1 %v4320_v4 }
 0x1c3   : > { %1620 = vmatmul.mubr.f32.gmra.mrb[90].mxu0 %v820_v56  ;;  %3686 = vmatmul.mubr.f32.gmra.mrb[124].mxu1 %v824_v17  ;;  %v4986_v56 = vld [vmem:[#allocation2 + $0x112] sm:$0xff] }
 0x1c4   : > { %4105 = vmatpush1.bf16.msra.mxu1 %v4104_v21  ;;  %1624 = vmatprep.mubr.f32.mxu0 %v823_v20 }
 0x1c5   : > { %3688 = vmatprep.mubr.f32.mxu1 %v4244_v27  ;;  %4106 = vmatprep.subr.bf16.mxu1 %v4320_v4  ;;  %v1865_v4 = vld [vmem:[#allocation2 + $0x3a] sm:$0xff] }
 0x1c7   : > { %1625 = vmatmul.mubr.f32.gmra.mrb[92].mxu0 %v821_v11  ;;  %3689 = vmatmul.mubr.f32.gmra.mrb[126].mxu1 %v4244_v27  ;;  %v4992_v11 = vld [vmem:[#allocation2 + $0x122] sm:$0xff] }
 0x1c8   : > { %4108 = vmatpush1.bf16.msra.mxu1 %v4107_v25  ;;  %1629 = vmatprep.mubr.f32.mxu0 %v824_v17  ;;  %v5006_v25 = vld [vmem:[#allocation2 + $0x142] sm:$0xff] }
 0x1c9   : > { %2009 = vmatprep.mubr.f32.mxu1 %v1862_v28  ;;  %4173 = vmatprep.subr.bf16.mxu1 %v4753_v46 }
 0x1cb   : > { %1630 = vmatmul.mubr.f32.gmra.mrb[94].mxu0 %v822_v19  ;;  %2010 = vmatmul.mubr.f32.vlgmr.msra.gmra.mrb[128].mxu1 %v1860_v30 }
 0x1cc   : > { %4181 = vmatpush3.bf16.msra.mxu1 %v4753_v46  ;;  %2014 = vmatprep.mubr.f32.mxu1 %v1863_v31  ;;  %v1868_v46 = vld [vmem:[#allocation2 + $0x62] sm:$0xff] }
 0x1cd   : > { %3723 = vmatprep.mubr.f32.mxu0 %v1864_v32  ;;  %4174 = vmatprep.subr.bf16.mxu1 %v4758_v50 }
 0x1cf   : > { %2015 = vmatmul.mubr.f32.gmra.mrb[130].mxu1 %v1861_v52  ;;  %3724 = vmatmul.mubr.f32.vlgmr.msra.gmra.mrb[96].mxu0 %v1865_v4 }
 0x1d0   : > { %2019 = vmatprep.mubr.f32.mxu1 %v1864_v32  ;;  %3726 = vmatprep.mubr.f32.mxu0 %v1866_v14 }
 0x1d1   : > { %4182 = vmatpush3.bf16.msra.mxu1 %v4758_v50  ;;  %v4922_v50 = vld [vmem:[#allocation2 + $0x82] sm:$0xff]  ;;  %3772 = vmatpush3.msk.msra.mxu0 %vm458_vm0, %v2514_v6 }
 0x1d2   : > { %4175 = vmatprep.subr.bf16.mxu1 %v4765_v15  ;;  %v4250_v6 = vld [vmem:[%s4422_s26 + $0x28] sm:$0xff] }
 0x1d3   : > { %2020 = vmatmul.mubr.f32.gmra.mrb[132].mxu1 %v1862_v28  ;;  %3727 = vmatmul.mubr.f32.gmra.mrb[98].mxu0 %v1867_v36 }
 0x1d4   : > { %2024 = vmatprep.mubr.f32.mxu1 %v1865_v4  ;;  %3729 = vmatprep.mubr.f32.mxu0 %v1868_v46 }
 0x1d5   : > { %4183 = vmatpush3.bf16.msra.mxu1 %v4765_v15  ;;  %v4926_v15 = vld [vmem:[#allocation2 + $0x92] sm:$0xff] }
 0x1d6   : > { %4176 = vmatprep.subr.bf16.mxu1 %v4775_v59 }
 0x1d7   : > { %2025 = vmatmul.mubr.f32.gmra.mrb[134].mxu1 %v1863_v31  ;;  %3730 = vmatmul.mubr.f32.gmra.mrb[100].mxu0 %v4914_v37  ;;  %v5014_v31 = vld [vmem:[#allocation2 + $0x152] sm:$0xff] }
 0x1d8   : > { %2029 = vmatprep.mubr.f32.mxu1 %v1866_v14  ;;  %3732 = vmatprep.mubr.f32.mxu0 %v4918_v38 }
 0x1d9   : > { %4184 = vmatpush3.bf16.msra.mxu1 %v4775_v59 }
 0x1da   : > { %4177 = vmatprep.subr.bf16.mxu1 %v4784_v61 }
 0x1db   : > { %2030 = vmatmul.mubr.f32.gmra.mrb[136].mxu1 %v1864_v32  ;;  %3733 = vmatmul.mubr.f32.gmra.mrb[102].mxu0 %v4922_v50 }
 0x1dc   : > { %2034 = vmatprep.mubr.f32.mxu1 %v1867_v36  ;;  %3735 = vmatprep.mubr.f32.mxu0 %v4926_v15 }
 0x1dd   : > { %4185 = vmatpush3.bf16.msra.mxu1 %v4784_v61 }
 0x1de   : > { %v1026_v47 = vpop.f32.mrb[32].mxu1  ;;  %4178 = vmatprep.subr.bf16.mxu1 %v4793_v3 }
 0x1df   : > { %v1028_v59 = vpop.f32.mrb[33].mxu1  ;;  %2035 = vmatmul.mubr.f32.gmra.mrb[138].mxu1 %v1865_v4  ;;  %3736 = vmatmul.mubr.f32.gmra.mrb[104].mxu0 %v4930_v40  ;;  %v5018_v4 = vld [vmem:[#allocation2 + $0x15a] sm:$0xff] }
 0x1e0   : > { %2039 = vmatprep.mubr.f32.mxu1 %v1868_v46  ;;  %3738 = vmatprep.mubr.f32.mxu0 %v4934_v5 }
 0x1e1   : > { %4186 = vmatpush3.bf16.msra.mxu1 %v4793_v3 }
 0x1e2   : > { %v1031_v41 = vpop.f32.mrb[34].mxu1  ;;  %v3565_v43 = vpop.f32.mrb[0].mxu0  ;;  %4179 = vmatprep.subr.bf16.mxu1 %v4803_v8 }
 0x1e3   : > { %v4941_v61 = vadd.f32 %v3565_v43, %v1031_v41  ;;  %v1033_v48 = vpop.f32.mrb[35].mxu1  ;;  %v1251_v49 = vpop.f32.mrb[1].mxu0  ;;  %2040 = vmatmul.mubr.f32.gmra.mrb[140].mxu1 %v1866_v14  ;;  %3739 = vmatmul.mubr.f32.gmra.mrb[106].mxu0 %v4938_v29  ;;  %v4246_v41 = vld [vmem:[%s4422_s26 + $0x8] sm:$0xff]  ;;  %v4247_v43 = vld [vmem:[%s4422_s26 + $0x10] sm:$0xff] }
 0x1e4   : > { %v4946_v51 = vadd.f32 %v1251_v49, %v1026_v47  ;;  %2044 = vmatprep.mubr.f32.mxu1 %v4914_v37  ;;  %3741 = vmatprep.mubr.f32.mxu0 %v4944_v1 }
 0x1e5   : > { %4187 = vmatpush3.bf16.msra.mxu1 %v4803_v8 }
 0x1e6   : > { %v1036_v3 = vpop.f32.mrb[36].mxu1  ;;  %v3568_v53 = vpop.f32.mrb[2].mxu0  ;;  %4180 = vmatprep.subr.bf16.mxu1 %v4813_v39 }
 0x1e7   : > { %v1038_v57 = vpop.f32.mrb[37].mxu1  ;;  %v1261_v13 = vpop.f32.mrb[3].mxu0  ;;  %2045 = vmatmul.mubr.f32.gmra.mrb[142].mxu1 %v1867_v36  ;;  %3742 = vmatmul.mubr.f32.gmra.mrb[108].mxu0 %v4951_v26 }
 0x1e8   : > { %v4957_v24 = vadd.f32 %v1261_v13, %v1036_v3  ;;  %2049 = vmatprep.mubr.f32.mxu1 %v4918_v38  ;;  %3744 = vmatprep.mubr.f32.mxu0 %v4955_v58  ;;  %v4248_v57 = vld [vmem:[%s4422_s26 + $0x18] sm:$0xff]  ;;  %v4249_v13 = vld [vmem:[%s4422_s26 + $0x20] sm:$0xff] }
 0x1e9   : > { %4188 = vmatpush3.bf16.msra.mxu1 %v4813_v39 }
 0x1ea   : > { %v1041_v8 = vpop.f32.mrb[38].mxu1  ;;  %v3571_v60 = vpop.f32.mrb[4].mxu0 }
 0x1eb   : > { %v4964_v62 = vadd.f32 %v3568_v53, %v1041_v8  ;;  %v1043_v23 = vpop.f32.mrb[39].mxu1  ;;  %2050 = vmatmul.mubr.f32.gmra.mrb[144].mxu1 %v1868_v46  ;;  %3745 = vmatmul.mubr.f32.gmra.mrb[110].mxu0 %v4962_v34  ;;  %v1271_v35 = vpop.f32.mrb[5].mxu0 }
 0x1ec   : > { %2054 = vmatprep.mubr.f32.mxu1 %v4922_v50  ;;  %3747 = vmatprep.mubr.f32.mxu0 %v4967_v42 }
 0x1ee   : > { %v1046_v39 = vpop.f32.mrb[40].mxu1  ;;  %v3574_v33 = vpop.f32.mrb[6].mxu0 }
 0x1ef   : > { %v4978_v9 = vadd.f32 %v1271_v35, %v1046_v39  ;;  %v1048_v10 = vpop.f32.mrb[41].mxu1  ;;  %2055 = vmatmul.mubr.f32.gmra.mrb[146].mxu1 %v4914_v37  ;;  %3748 = vmatmul.mubr.f32.gmra.mrb[112].mxu0 %v4975_v7  ;;  %v1281_v12 = vpop.f32.mrb[7].mxu0  ;;  %v2498_v39 = vld [vmem:[%s5611_s5] sm:$0xff] }
 0x1f0   : > { %2059 = vmatprep.mubr.f32.mxu1 %v4926_v15  ;;  %3750 = vmatprep.mubr.f32.mxu0 %v4982_v45  ;;  %v4251_v10 = vld [vmem:[%s4422_s26 + $0x30] sm:$0xff] }
 0x1f2   : > { %v1051_v44 = vpop.f32.mrb[42].mxu1  ;;  %v3577_v54 = vpop.f32.mrb[8].mxu0 }
 0x1f3   : > { %v4988_v2 = vadd.f32 %v3571_v60, %v1051_v44  ;;  %v1053_v63 = vpop.f32.mrb[43].mxu1  ;;  %2060 = vmatmul.mubr.f32.gmra.mrb[148].mxu1 %v4918_v38  ;;  %3751 = vmatmul.mubr.f32.gmra.mrb[114].mxu0 %v4986_v56  ;;  %v1291_v16 = vpop.f32.mrb[9].mxu0  ;;  %v4245_v38 = vld [vmem:[%s4422_s26] sm:$0xff] }
 0x1f4   : > { %2064 = vmatprep.mubr.f32.mxu1 %v4930_v40  ;;  %3753 = vmatprep.mubr.f32.mxu0 %v4992_v11 }
 0x1f6   : > { %v1056_v0 = vpop.f32.mrb[44].mxu1  ;;  %v3580_v19 = vpop.f32.mrb[10].mxu0 }
 0x1f7   : > { %v4998_v20 = vadd.f32 %v1281_v12, %v1056_v0  ;;  %v1058_v21 = vpop.f32.mrb[45].mxu1  ;;  %2065 = vmatmul.mubr.f32.gmra.mrb[150].mxu1 %v4922_v50  ;;  %3754 = vmatmul.mubr.f32.gmra.mrb[116].mxu0 %v4996_v18  ;;  %v1301_v22 = vpop.f32.mrb[11].mxu0  ;;  %v4252_v0 = vld [vmem:[%s4422_s26 + $0x38] sm:$0xff] }
 0x1f8   : > { %2069 = vmatprep.mubr.f32.mxu1 %v4934_v5  ;;  %3756 = vmatprep.mubr.f32.mxu0 %v5002_v55  ;;  %v2501_v21 = vld [vmem:[%s5611_s5 + $0x18] sm:$0xff] }
 0x1fa   : > { %v1061_v17 = vpop.f32.mrb[46].mxu1  ;;  %v5008_v27 = vpop.f32.mrb[12].mxu0 }
 0x1fb   : > { %v5010_v28 = vadd.f32 %v3574_v33, %v1061_v17  ;;  %v1063_v30 = vpop.f32.mrb[47].mxu1  ;;  %2070 = vmatmul.mubr.f32.gmra.mrb[152].mxu1 %v4926_v15  ;;  %3757 = vmatmul.mubr.f32.gmra.mrb[118].mxu0 %v5006_v25  ;;  %v1311_v32 = vpop.f32.mrb[13].mxu0  ;;  %v2499_v33 = vld [vmem:[%s5611_s5 + $0x8] sm:$0xff] }
 0x1fc   : > { %2074 = vmatprep.mubr.f32.mxu1 %v4938_v29  ;;  %3759 = vmatprep.mubr.f32.mxu0 %v5014_v31 }
 0x1fe   : > { %v1066_v52 = vpop.f32.mrb[48].mxu1  ;;  %v5020_v14 = vpop.f32.mrb[14].mxu0 }
 0x1ff   : > { %v5022_v36 = vadd.f32 %v1291_v16, %v1066_v52  ;;  %v1068_v46 = vpop.f32.mrb[49].mxu1  ;;  %2075 = vmatmul.mubr.f32.gmra.mrb[154].mxu1 %v4930_v40  ;;  %3760 = vmatmul.mubr.f32.gmra.mrb[120].mxu0 %v5018_v4  ;;  %v5026_v37 = vpop.f32.mrb[15].mxu0 }
 0x200   : > { %2079 = vmatprep.mubr.f32.mxu1 %v4944_v1  ;;  %3773 = vmatprep.mubr.msk.f32.mxu0 %vm361_vm1, %v4245_v38  ;;  %v4254_v38 = vld [vmem:[%s4422_s26 + $0x48] sm:$0xff] }
 0x202   : > { %v1071_v50 = vpop.f32.mrb[50].mxu1  ;;  %v5031_v15 = vpop.f32.mrb[16].mxu0 }
 0x203   : > { %v5033_v47 = vadd.f32 %v3577_v54, %v1071_v50  ;;  %v1073_v59 = vpop.f32.mrb[51].mxu1  ;;  %2080 = vmatmul.mubr.f32.gmra.mrb[156].mxu1 %v4934_v5  ;;  %v5036_v40 = vpop.f32.mrb[17].mxu0  ;;  %3774 = vmatmul.mubr.msk.f32.vlgmr.msra.gmra.mrb[122].mxu0 %vm361_vm1, %v4246_v41  ;;  %v2502_v50 = vld [vmem:[%s5611_s5 + $0x20] sm:$0xff] }
 0x204   : > { %2084 = vmatprep.mubr.f32.mxu1 %v4951_v26  ;;  %3776 = vmatprep.mubr.msk.f32.mxu0 %vm361_vm1, %v4247_v43  ;;  %v2503_v59 = vld [vmem:[%s5611_s5 + $0x28] sm:$0xff] }
 0x206   : > { %v1076_v48 = vpop.f32.mrb[52].mxu1  ;;  %v5043_v49 = vpop.f32.mrb[18].mxu0 }
 0x207   : > { %v5045_v3 = vadd.f32 %v1301_v22, %v1076_v48  ;;  %v1078_v53 = vpop.f32.mrb[53].mxu1  ;;  %2085 = vmatmul.mubr.f32.gmra.mrb[158].mxu1 %v4938_v29  ;;  %v5048_v5 = vpop.f32.mrb[19].mxu0  ;;  %3777 = vmatmul.mubr.msk.f32.gmra.mrb[124].mxu0 %vm361_vm1, %v4248_v57  ;;  %v4253_v22 = vld [vmem:[%s4422_s26 + $0x40] sm:$0xff] }
 0x208   : > { %2089 = vmatprep.mubr.f32.mxu1 %v4955_v58  ;;  %3779 = vmatprep.mubr.msk.f32.mxu0 %vm361_vm1, %v4249_v13  ;;  %v4256_v13 = vld [vmem:[%s4422_s26 + $0x58] sm:$0xff] }
 0x20a   : > { %v1081_v8 = vpop.f32.mrb[54].mxu1  ;;  %v5055_v60 = vpop.f32.mrb[20].mxu0 }
 0x20b   : > { %v5057_v23 = vadd.f32 %v3580_v19, %v1081_v8  ;;  %v1083_v35 = vpop.f32.mrb[55].mxu1  ;;  %2090 = vmatmul.mubr.f32.gmra.mrb[160].mxu1 %v4944_v1  ;;  %v5060_v29 = vpop.f32.mrb[21].mxu0  ;;  %3780 = vmatmul.mubr.msk.f32.gmra.mrb[126].mxu0 %vm361_vm1, %v4250_v6  ;;  %v4141_v1 = vpack.c.bf16 %v2499_v33, %v2498_v39  ;;  %v2500_v19 = vld [vmem:[%s5611_s5 + $0x10] sm:$0xff] }
 0x20c   : > { %2094 = vmatprep.mubr.f32.mxu1 %v4962_v34  ;;  %3782 = vmatprep.mubr.msk.f32.mxu0 %vm361_vm1, %v4251_v10  ;;  %v2504_v8 = vld [vmem:[%s5611_s5 + $0x30] sm:$0xff]  ;;  %v2505_v35 = vld [vmem:[%s5611_s5 + $0x38] sm:$0xff] }
 0x20d   : > { %4142 = vmatprep.subr.bf16.mxu0 %v4141_v1 }
 0x20e   : > { %v1086_v12 = vpop.f32.mrb[56].mxu1  ;;  %v5073_v44 = vpop.f32.mrb[22].mxu0  ;;  %4144 = vmatpush3.bf16.msra.mxu0 %v4141_v1 }
 0x20f   : > { %v5075_v54 = vadd.f32 %v1311_v32, %v1086_v12  ;;  %v1088_v63 = vpop.f32.mrb[57].mxu1  ;;  %2095 = vmatmul.mubr.f32.gmra.mrb[162].mxu1 %v4951_v26  ;;  %v5078_v16 = vpop.f32.mrb[23].mxu0  ;;  %3783 = vmatmul.mubr.msk.f32.gmra.mrb[128].mxu0 %vm361_vm1, %v4252_v0  ;;  %v4145_v26 = vpack.c.bf16 %v2501_v21, %v2500_v19  ;;  %v4258_v12 = vld [vmem:[%s4422_s26 + $0x68] sm:$0xff] }
 0x210   : > { %2099 = vmatprep.mubr.f32.mxu1 %v4967_v42  ;;  %3785 = vmatprep.mubr.msk.f32.mxu0 %vm361_vm1, %v4253_v22  ;;  %v2506_v63 = vld [vmem:[%s5611_s5 + $0x40] sm:$0xff]  ;;  %v2507_v0 = vld [vmem:[%s5611_s5 + $0x48] sm:$0xff] }
 0x211   : > { %4146 = vmatprep.subr.bf16.mxu0 %v4145_v26 }
 0x212   : > { %v1091_v17 = vpop.f32.mrb[58].mxu1  ;;  %v5091_v30 = vpop.f32.mrb[24].mxu0  ;;  %4148 = vmatpush3.bf16.msra.mxu0 %v4145_v26 }
 0x213   : > { %v5094_v32 = vadd.f32 %v5008_v27, %v1091_v17  ;;  %v1093_v52 = vpop.f32.mrb[59].mxu1  ;;  %2100 = vmatmul.mubr.f32.gmra.mrb[164].mxu1 %v4955_v58  ;;  %v5097_v46 = vpop.f32.mrb[25].mxu0  ;;  %3786 = vmatmul.mubr.msk.f32.gmra.mrb[130].mxu0 %vm361_vm1, %v4254_v38  ;;  %v4255_v27 = vld [vmem:[%s4422_s26 + $0x50] sm:$0xff]  ;;  %v4149_v58 = vpack.c.bf16 %v2503_v59, %v2502_v50  ;;  %v2509_v50 = vld [vmem:[%s5611_s5 + $0x58] sm:$0xff] }
 0x214   : > { %2104 = vmatprep.mubr.f32.mxu1 %v4975_v7  ;;  %3788 = vmatprep.mubr.msk.f32.mxu0 %vm361_vm1, %v4255_v27  ;;  %v4260_v52 = vld [vmem:[%s4422_s26 + $0x78] sm:$0xff]  ;;  %v2508_v38 = vld [vmem:[%s5611_s5 + $0x50] sm:$0xff] }
 0x215   : > { %4150 = vmatprep.subr.bf16.mxu0 %v4149_v58 }
 0x216   : > { %v1096_v41 = vpop.f32.mrb[60].mxu1  ;;  %v5110_v43 = vpop.f32.mrb[26].mxu0  ;;  %4152 = vmatpush3.bf16.msra.mxu0 %v4149_v58 }
 0x217   : > { %v5113_v48 = vadd.f32 %v5026_v37, %v1096_v41  ;;  %v1098_v53 = vpop.f32.mrb[61].mxu1  ;;  %2105 = vmatmul.mubr.f32.gmra.mrb[166].mxu1 %v4962_v34  ;;  %v5116_v57 = vpop.f32.mrb[27].mxu0  ;;  %3789 = vmatmul.mubr.msk.f32.gmra.mrb[132].mxu0 %vm361_vm1, %v4256_v13  ;;  %v4257_v37 = vld [vmem:[%s4422_s26 + $0x60] sm:$0xff]  ;;  %v4153_v34 = vpack.c.bf16 %v2505_v35, %v2504_v8  ;;  %v4262_v8 = vld [vmem:[%s4422_s26 + $0x88] sm:$0xff] }
 0x218   : > { %2109 = vmatprep.mubr.f32.mxu1 %v4982_v45  ;;  %3791 = vmatprep.mubr.msk.f32.mxu0 %vm361_vm1, %v4257_v37  ;;  %v2510_v35 = vld [vmem:[%s5611_s5 + $0x60] sm:$0xff] }
 0x219   : > { %4154 = vmatprep.subr.bf16.mxu0 %v4153_v34 }
 0x21a   : > { %v1101_v6 = vpop.f32.mrb[62].mxu1  ;;  %v5129_v39 = vpop.f32.mrb[28].mxu0  ;;  %4156 = vmatpush3.bf16.msra.mxu0 %v4153_v34 }
 0x21b   : > { %v5132_v33 = vadd.f32 %v5020_v14, %v1101_v6  ;;  %v1103_v10 = vpop.f32.mrb[63].mxu1  ;;  %2110 = vmatmul.mubr.f32.gmra.mrb[168].mxu1 %v4967_v42  ;;  %v5135_v1 = vpop.f32.mrb[29].mxu0  ;;  %3792 = vmatmul.mubr.msk.f32.gmra.mrb[134].mxu0 %vm361_vm1, %v4258_v12  ;;  %v4259_v14 = vld [vmem:[%s4422_s26 + $0x70] sm:$0xff]  ;;  %v4157_v42 = vpack.c.bf16 %v2507_v0, %v2506_v63  ;;  %v4264_v0 = vld [vmem:[%s4422_s26 + $0x98] sm:$0xff] }
 0x21c   : > { %2114 = vmatprep.mubr.f32.mxu1 %v4986_v56  ;;  %3794 = vmatprep.mubr.msk.f32.mxu0 %vm361_vm1, %v4259_v14  ;;  %v2512_v14 = vld [vmem:[%s5611_s5 + $0x70] sm:$0xff] }
 0x21d   : > { %4158 = vmatprep.subr.bf16.mxu0 %v4157_v42 }
 0x21e   : > { %v1106_v19 = vpop.f32.mrb[64].mxu1  ;;  %v5148_v21 = vpop.f32.mrb[30].mxu0  ;;  %4160 = vmatpush3.bf16.msra.mxu0 %v4157_v42 }
 0x21f   : > { %v5151_v22 = vadd.f32 %v5036_v40, %v1106_v19  ;;  %v1108_v26 = vpop.f32.mrb[65].mxu1  ;;  %2115 = vmatmul.mubr.f32.gmra.mrb[170].mxu1 %v4975_v7  ;;  %v5154_v17 = vpop.f32.mrb[31].mxu0  ;;  %3795 = vmatmul.mubr.msk.f32.gmra.mrb[136].mxu0 %vm361_vm1, %v4260_v52  ;;  %v4261_v40 = vld [vmem:[%s4422_s26 + $0x80] sm:$0xff]  ;;  %v4161_v7 = vpack.c.bf16 %v2509_v50, %v2508_v38 }
 0x220   : > { %2119 = vmatprep.mubr.f32.mxu1 %v4992_v11  ;;  %3797 = vmatprep.mubr.msk.f32.mxu0 %vm361_vm1, %v4261_v40  ;;  %v4266_v40 = vld [vmem:[%s4422_s26 + $0xa8] sm:$0xff] }
 0x221   : > { %4162 = vmatprep.subr.bf16.mxu0 %v4161_v7 }
 0x222   : > { %v1111_v59 = vpop.f32.mrb[66].mxu1  ;;  %v1476_v27 = vpop.f32.mrb[32].mxu0  ;;  %4164 = vmatpush3.bf16.msra.mxu0 %v4161_v7  ;;  %v4267_v7 = vld [vmem:[%s4422_s26 + $0xb0] sm:$0xff] }
 0x223   : > { %v5168_v58 = vadd.f32 %v5031_v15, %v1111_v59  ;;  %v5171_v41 = vadd.f32 %v1476_v27, %v4946_v51  ;;  %v1113_v53 = vpop.f32.mrb[67].mxu1  ;;  %2120 = vmatmul.mubr.f32.gmra.mrb[172].mxu1 %v4982_v45  ;;  %v1478_v13 = vpop.f32.mrb[33].mxu0  ;;  %3798 = vmatmul.mubr.msk.f32.gmra.mrb[138].mxu0 %vm361_vm1, %v4262_v8  ;;  %v2511_v15 = vld [vmem:[%s5611_s5 + $0x68] sm:$0xff]  ;;  %v4263_v51 = vld [vmem:[%s4422_s26 + $0x90] sm:$0xff]  ;;  %v4269_v8 = vld [vmem:[%s4422_s26 + $0xc0] sm:$0xff] }
 0x224   : > { %2124 = vmatprep.mubr.f32.mxu1 %v4996_v18  ;;  %3800 = vmatprep.mubr.msk.f32.mxu0 %vm361_vm1, %v4263_v51  ;;  %v4165_v45 = vpack.c.bf16 %v2511_v15, %v2510_v35  ;;  %v4268_v13 = vld [vmem:[%s4422_s26 + $0xb8] sm:$0xff] }
 0x226   : > { %v1116_v37 = vpop.f32.mrb[68].mxu1  ;;  %v1481_v34 = vpop.f32.mrb[34].mxu0  ;;  %4166 = vmatprep.subr.bf16.mxu0 %v4165_v45 }
 0x227   : > { %v5186_v6 = vadd.f32 %v5048_v5, %v1116_v37  ;;  %v5189_v10 = vadd.f32 %v1481_v34, %v4941_v61  ;;  %v1118_v12 = vpop.f32.mrb[69].mxu1  ;;  %2125 = vmatmul.mubr.f32.gmra.mrb[174].mxu1 %v4986_v56  ;;  %v1483_v63 = vpop.f32.mrb[35].mxu0  ;;  %3801 = vmatmul.mubr.msk.f32.gmra.mrb[140].mxu0 %vm361_vm1, %v4264_v0  ;;  %v2513_v5 = vld [vmem:[%s5611_s5 + $0x78] sm:$0xff]  ;;  %v4265_v61 = vld [vmem:[%s4422_s26 + $0xa0] sm:$0xff]  ;;  %v4271_v37 = vld [vmem:[%s4422_s26 + $0xd0] sm:$0xff] }
 0x228   : > { %2129 = vmatprep.mubr.f32.mxu1 %v5002_v55  ;;  %3803 = vmatprep.mubr.msk.f32.mxu0 %vm361_vm1, %v4265_v61  ;;  %v4169_v56 = vpack.c.bf16 %v2513_v5, %v2512_v14  ;;  %v4272_v14 = vld [vmem:[%s4422_s26 + $0xd8] sm:$0xff]  ;;  %v4273_v5 = vld [vmem:[%s4422_s26 + $0xe0] sm:$0xff] }
 0x229   : > { %4168 = vmatpush3.bf16.msra.mxu0 %v4165_v45  ;;  %v4270_v45 = vld [vmem:[%s4422_s26 + $0xc8] sm:$0xff] }
 0x22a   : > { %v1121_v42 = vpop.f32.mrb[70].mxu1  ;;  %v1486_v19 = vpop.f32.mrb[36].mxu0  ;;  %4170 = vmatprep.subr.bf16.mxu0 %v4169_v56 }
 0x22b   : > { %v5204_v26 = vadd.f32 %v5043_v49, %v1121_v42  ;;  %v5207_v52 = vadd.f32 %v1486_v19, %v4957_v24  ;;  %v1123_v38 = vpop.f32.mrb[71].mxu1  ;;  %v1488_v50 = vpop.f32.mrb[37].mxu0  ;;  %2130 = vmatmul.mubr.f32.gmra.mrb[176].mxu1 %v4992_v11  ;;  %3804 = vmatmul.mubr.msk.f32.gmra.mrb[142].mxu0 %vm361_vm1, %v4266_v40 }
 0x22c   : > { %2134 = vmatprep.mubr.f32.mxu1 %v5006_v25  ;;  %3806 = vmatprep.mubr.msk.f32.mxu0 %vm361_vm1, %v4267_v7  ;;  %v4274_v38 = vld [vmem:[%s4422_s26 + $0xe8] sm:$0xff]  ;;  %v4275_v50 = vld [vmem:[%s4422_s26 + $0xf0] sm:$0xff] }
 0x22d   : > { %4172 = vmatpush3.bf16.msra.mxu0 %v4169_v56 }
 0x22e   : > { %v1126_v49 = vpop.f32.mrb[72].mxu1  ;;  %v1491_v59 = vpop.f32.mrb[38].mxu0 }
 0x22f   : > { %v5216_v24 = vadd.f32 %v5060_v29, %v1126_v49  ;;  %v5219_v27 = vadd.f32 %v1491_v59, %v4964_v62  ;;  %v1128_v11 = vpop.f32.mrb[73].mxu1  ;;  %v1493_v53 = vpop.f32.mrb[39].mxu0  ;;  %2135 = vmatmul.mubr.f32.gmra.mrb[178].mxu1 %v4996_v18  ;;  %3807 = vmatmul.mubr.msk.f32.gmra.mrb[144].mxu0 %vm361_vm1, %v4268_v13 }
 0x230   : > { %2139 = vmatprep.mubr.f32.mxu1 %v5014_v31  ;;  %3809 = vmatprep.mubr.msk.f32.mxu0 %vm361_vm1, %v4269_v8  ;;  %v4276_v11 = vld [vmem:[%s4422_s26 + $0xf8] sm:$0xff] }
 0x232   : > { %v1131_v35 = vpop.f32.mrb[74].mxu1  ;;  %v1496_v29 = vpop.f32.mrb[40].mxu0 }
 0x233   : > { %v5228_v15 = vadd.f32 %v5055_v60, %v1131_v35  ;;  %v5231_v62 = vadd.f32 %v1496_v29, %v4978_v9  ;;  %v1133_v51 = vpop.f32.mrb[75].mxu1  ;;  %v1498_v18 = vpop.f32.mrb[41].mxu0  ;;  %2140 = vmatmul.mubr.f32.gmra.mrb[180].mxu1 %v5002_v55  ;;  %3810 = vmatmul.mubr.msk.f32.gmra.mrb[146].mxu0 %vm361_vm1, %v4270_v45  ;;  %v1890_v55 = vld [vmem:[#allocation2 + $0x16a] sm:$0xff] }
 0x234   : > { %2144 = vmatprep.mubr.f32.mxu1 %v5018_v4  ;;  %3812 = vmatprep.mubr.msk.f32.mxu0 %vm361_vm1, %v4271_v37  ;;  %v1893_v29 = vld [vmem:[#allocation2 + $0x18a] sm:$0xff] }
 0x236   : > { %v1136_v34 = vpop.f32.mrb[76].mxu1  ;;  %v1501_v60 = vpop.f32.mrb[42].mxu0 }
 0x237   : > { %v5240_v12 = vadd.f32 %v5078_v16, %v1136_v34  ;;  %v5243_v9 = vadd.f32 %v1501_v60, %v4988_v2  ;;  %v1138_v63 = vpop.f32.mrb[77].mxu1  ;;  %v1503_v0 = vpop.f32.mrb[43].mxu0  ;;  %2145 = vmatmul.mubr.f32.gmra.mrb[182].mxu1 %v5006_v25  ;;  %3813 = vmatmul.mubr.msk.f32.gmra.mrb[148].mxu0 %vm361_vm1, %v4272_v14  ;;  %v1891_v25 = vld [vmem:[#allocation2 + $0x172] sm:$0xff] }
 0x238   : > { %2149 = vmatprep.mubr.f32.mxu1 %v1890_v55  ;;  %3815 = vmatprep.mubr.msk.f32.mxu0 %vm361_vm1, %v4273_v5 }
 0x23a   : > { %v1141_v61 = vpop.f32.mrb[78].mxu1  ;;  %v1506_v16 = vpop.f32.mrb[44].mxu0 }
 0x23b   : > { %v5251_v56 = vadd.f32 %v5073_v44, %v1141_v61  ;;  %v5254_v2 = vadd.f32 %v1506_v16, %v4998_v20  ;;  %v1143_v42 = vpop.f32.mrb[79].mxu1  ;;  %v1508_v19 = vpop.f32.mrb[45].mxu0  ;;  %2150 = vmatmul.mubr.f32.gmra.mrb[184].mxu1 %v5014_v31  ;;  %3816 = vmatmul.mubr.msk.f32.gmra.mrb[150].mxu0 %vm361_vm1, %v4274_v38  ;;  %v1892_v31 = vld [vmem:[#allocation2 + $0x182] sm:$0xff] }
 0x23c   : > { %2154 = vmatprep.mubr.f32.mxu1 %v1891_v25  ;;  %3818 = vmatprep.mubr.msk.f32.mxu0 %vm361_vm1, %v4275_v50 }
 0x23e   : > { %v1146_v40 = vpop.f32.mrb[80].mxu1  ;;  %v1511_v7 = vpop.f32.mrb[46].mxu0 }
 0x23f   : > { %v5262_v44 = vadd.f32 %v5097_v46, %v1146_v40  ;;  %v5265_v20 = vadd.f32 %v1511_v7, %v5010_v28  ;;  %v1148_v49 = vpop.f32.mrb[81].mxu1  ;;  %v1513_v59 = vpop.f32.mrb[47].mxu0  ;;  %2155 = vmatmul.mubr.f32.gmra.mrb[186].mxu1 %v5018_v4  ;;  %3819 = vmatmul.mubr.msk.f32.gmra.mrb[152].mxu0 %vm361_vm1, %v4276_v11 }
 0x240   : > { %2159 = vmatprep.mubr.f32.mxu1 %v1892_v31 }
 0x242   : > { %v1151_v53 = vpop.f32.mrb[82].mxu1  ;;  %v1516_v13 = vpop.f32.mrb[48].mxu0 }
 0x243   : > { %v5271_v8 = vadd.f32 %v5091_v30, %v1151_v53  ;;  %v5274_v46 = vadd.f32 %v1516_v13, %v5022_v36  ;;  %v1153_v35 = vpop.f32.mrb[83].mxu1  ;;  %v1518_v28 = vpop.f32.mrb[49].mxu0  ;;  %2160 = vmatmul.mubr.f32.gmra.mrb[188].mxu1 %v1890_v55 }
 0x244   : > { %2164 = vmatprep.mubr.f32.mxu1 %v1893_v29 }
 0x246   : > { %v1156_v51 = vpop.f32.mrb[84].mxu1  ;;  %v1521_v4 = vpop.f32.mrb[50].mxu0 }
 0x247   : > { %v5277_v18 = vadd.f32 %v5116_v57, %v1156_v51  ;;  %v5280_v45 = vadd.f32 %v1521_v4, %v5033_v47  ;;  %v1158_v37 = vpop.f32.mrb[85].mxu1  ;;  %v1523_v34 = vpop.f32.mrb[51].mxu0  ;;  %2165 = vmatmul.mubr.f32.gmra.mrb[190].mxu1 %v1891_v25  ;;  %v1894_v57 = vld [vmem:[#allocation2 + $0x19a] sm:$0xff] }
 0x248   : > { %3762 = vmatprep.mubr.f32.mxu1 %v1890_v55 }
 0x24a   : > { %v1161_v30 = vpop.f32.mrb[86].mxu1  ;;  %v1526_v36 = vpop.f32.mrb[52].mxu0 }
 0x24b   : > { %v5283_v60 = vadd.f32 %v5110_v43, %v1161_v30  ;;  %v5286_v63 = vadd.f32 %v1526_v36, %v5045_v3  ;;  %v1163_v0 = vpop.f32.mrb[87].mxu1  ;;  %v1528_v14 = vpop.f32.mrb[53].mxu0  ;;  %3763 = vmatmul.mubr.f32.vlgmr.msra.gmra.mrb[192].mxu1 %v1891_v25  ;;  %v1895_v43 = vld [vmem:[#allocation2 + $0x1a2] sm:$0xff] }
 0x24c   : > { %3765 = vmatprep.mubr.f32.mxu1 %v1892_v31 }
 0x24e   : > { %v1166_v5 = vpop.f32.mrb[88].mxu1  ;;  %v1531_v47 = vpop.f32.mrb[54].mxu0 }
 0x24f   : > { %v5289_v61 = vadd.f32 %v5135_v1, %v1166_v5  ;;  %v5292_v55 = vadd.f32 %v1531_v47, %v5057_v23  ;;  %v1168_v16 = vpop.f32.mrb[89].mxu1  ;;  %v1533_v42 = vpop.f32.mrb[55].mxu0  ;;  %3766 = vmatmul.mubr.f32.gmra.mrb[194].mxu1 %v1893_v29 }
 0x250   : > { %3768 = vmatprep.mubr.f32.mxu1 %v1894_v57 }
 0x252   : > { %v1171_v3 = vpop.f32.mrb[90].mxu1  ;;  %v1536_v19 = vpop.f32.mrb[56].mxu0 }
 0x253   : > { %v5295_v38 = vadd.f32 %v5129_v39, %v1171_v3  ;;  %v5298_v25 = vadd.f32 %v1536_v19, %v5075_v54  ;;  %v1173_v50 = vpop.f32.mrb[91].mxu1  ;;  %v1538_v40 = vpop.f32.mrb[57].mxu0  ;;  %3769 = vmatmul.mubr.f32.gmra.mrb[196].mxu1 %v1895_v43 }
 0x256   : > { %v1176_v1 = vpop.f32.mrb[92].mxu1  ;;  %v1541_v7 = vpop.f32.mrb[58].mxu0 }
 0x257   : > { %v5301_v23 = vadd.f32 %v5154_v17, %v1176_v1  ;;  %v1542_v49 = vadd.f32 %v1541_v7, %v5094_v32  ;;  %v1178_v59 = vpop.f32.mrb[93].mxu1  ;;  %v1543_v31 = vpop.f32.mrb[59].mxu0 }
 0x25a   : > { %v1181_v11 = vpop.f32.mrb[94].mxu1  ;;  %v1546_v53 = vpop.f32.mrb[60].mxu0 }
 0x25b   : > { %v5305_v39 = vadd.f32 %v5148_v21, %v1181_v11  ;;  %v1547_v54 = vadd.f32 %v1546_v53, %v5113_v48  ;;  %v1183_v13 = vpop.f32.mrb[95].mxu1  ;;  %v1548_v35 = vpop.f32.mrb[61].mxu0 }
 0x25e   : > { %v1551_v28 = vpop.f32.mrb[62].mxu0  ;;  %v3645_v29 = vpop.f32.mrb[96].mxu1 }
 0x25f   : > { %v1552_v51 = vadd.f32 %v1551_v28, %v5132_v33  ;;  %v5310_v17 = vadd.f32 %v3645_v29, %v5189_v10  ;;  %v1553_v4 = vpop.f32.mrb[63].mxu0  ;;  %v1701_v32 = vpop.f32.mrb[97].mxu1 }
 0x260   : > { %v5313_v37 = vadd.f32 %v1701_v32, %v5171_v41 }
 0x262   : > { %v1556_v34 = vpop.f32.mrb[64].mxu0  ;;  %v3648_v30 = vpop.f32.mrb[98].mxu1 }
 0x263   : > { %v1557_v21 = vadd.f32 %v1556_v34, %v5151_v22  ;;  %v5317_v48 = vadd.f32 %v3648_v30, %v5219_v27  ;;  %v1558_v36 = vpop.f32.mrb[65].mxu0  ;;  %v1711_v0 = vpop.f32.mrb[99].mxu1 }
 0x264   : > { %v5320_v14 = vadd.f32 %v1711_v0, %v5207_v52 }
 0x266   : > { %v1561_v33 = vpop.f32.mrb[66].mxu0  ;;  %v3651_v10 = vpop.f32.mrb[100].mxu1 }
 0x267   : > { %v1562_v57 = vadd.f32 %v1561_v33, %v5168_v58  ;;  %v5324_v5 = vadd.f32 %v3651_v10, %v5243_v9  ;;  %v1563_v41 = vpop.f32.mrb[67].mxu0  ;;  %v1721_v47 = vpop.f32.mrb[101].mxu1 }
 0x268   : > { %v5327_v16 = vadd.f32 %v1721_v47, %v5231_v62 }
 0x26a   : > { %v1566_v22 = vpop.f32.mrb[68].mxu0  ;;  %v3654_v27 = vpop.f32.mrb[102].mxu1 }
 0x26b   : > { %v1567_v42 = vadd.f32 %v1566_v22, %v5186_v6  ;;  %v5331_v43 = vadd.f32 %v3654_v27, %v5265_v20  ;;  %v1568_v52 = vpop.f32.mrb[69].mxu0  ;;  %v1731_v3 = vpop.f32.mrb[103].mxu1 }
 0x26c   : > { %v5334_v19 = vadd.f32 %v1731_v3, %v5254_v2 }
 0x26e   : > { %v1571_v58 = vpop.f32.mrb[70].mxu0  ;;  %v3657_v9 = vpop.f32.mrb[104].mxu1 }
 0x26f   : > { %v1572_v50 = vadd.f32 %v1571_v58, %v5204_v26  ;;  %v5338_v40 = vadd.f32 %v3657_v9, %v5280_v45  ;;  %v1573_v62 = vpop.f32.mrb[71].mxu0  ;;  %v1741_v1 = vpop.f32.mrb[105].mxu1 }
 0x270   : > { %v5341_v7 = vadd.f32 %v1741_v1, %v5274_v46 }
 0x272   : > { %v1576_v6 = vpop.f32.mrb[72].mxu0  ;;  %v3660_v20 = vpop.f32.mrb[106].mxu1 }
 0x273   : > { %v1577_v59 = vadd.f32 %v1576_v6, %v5216_v24  ;;  %v5345_v31 = vadd.f32 %v3660_v20, %v5292_v55  ;;  %v1578_v2 = vpop.f32.mrb[73].mxu0  ;;  %v1751_v11 = vpop.f32.mrb[107].mxu1 }
 0x274   : > { %v5348_v53 = vadd.f32 %v1751_v11, %v5286_v63 }
 0x276   : > { %v1581_v26 = vpop.f32.mrb[74].mxu0  ;;  %v3663_v45 = vpop.f32.mrb[108].mxu1 }
 0x277   : > { %v1582_v13 = vadd.f32 %v1581_v26, %v5228_v15  ;;  %v5351_v35 = vadd.f32 %v3663_v45, %v1542_v49  ;;  %v1583_v46 = vpop.f32.mrb[75].mxu0  ;;  %v1761_v28 = vpop.f32.mrb[109].mxu1 }
 0x278   : > { %v5354_v29 = vadd.f32 %v1761_v28, %v5298_v25 }
 0x27a   : > { %v1586_v24 = vpop.f32.mrb[76].mxu0  ;;  %v3666_v4 = vpop.f32.mrb[110].mxu1 }
 0x27b   : > { %v1587_v55 = vadd.f32 %v1586_v24, %v5240_v12  ;;  %v5357_v32 = vadd.f32 %v3666_v4, %v1552_v51  ;;  %v1588_v34 = vpop.f32.mrb[77].mxu0  ;;  %v1771_v63 = vpop.f32.mrb[111].mxu1 }
 0x27c   : > { %v5359_v30 = vadd.f32 %v1771_v63, %v1547_v54 }
 0x27e   : > { %v1591_v36 = vpop.f32.mrb[78].mxu0  ;;  %v3669_v0 = vpop.f32.mrb[112].mxu1 }
 0x27f   : > { %v1592_v15 = vadd.f32 %v1591_v36, %v5251_v56  ;;  %v5362_v49 = vadd.f32 %v3669_v0, %v1562_v57  ;;  %v1593_v33 = vpop.f32.mrb[79].mxu0  ;;  %v1781_v10 = vpop.f32.mrb[113].mxu1 }
 0x280   : > { %v5364_v25 = vadd.f32 %v1781_v10, %v1557_v21 }
 0x282   : > { %v1596_v41 = vpop.f32.mrb[80].mxu0  ;;  %v3672_v47 = vpop.f32.mrb[114].mxu1 }
 0x283   : > { %v1597_v12 = vadd.f32 %v1596_v41, %v5262_v44  ;;  %v5367_v51 = vadd.f32 %v3672_v47, %v1572_v50  ;;  %v1598_v22 = vpop.f32.mrb[81].mxu0  ;;  %v1791_v27 = vpop.f32.mrb[115].mxu1 }
 0x284   : > { %v5369_v54 = vadd.f32 %v1791_v27, %v1567_v42 }
 0x286   : > { %v1601_v52 = vpop.f32.mrb[82].mxu0  ;;  %v3675_v3 = vpop.f32.mrb[116].mxu1 }
 0x287   : > { %v1602_v56 = vadd.f32 %v1601_v52, %v5271_v8  ;;  %v5372_v57 = vadd.f32 %v3675_v3, %v1582_v13  ;;  %v1603_v58 = vpop.f32.mrb[83].mxu0  ;;  %v1801_v9 = vpop.f32.mrb[117].mxu1 }
 0x288   : > { %v5374_v21 = vadd.f32 %v1801_v9, %v1577_v59 }
 0x28a   : > { %v1606_v62 = vpop.f32.mrb[84].mxu0  ;;  %v3678_v1 = vpop.f32.mrb[118].mxu1 }
 0x28b   : > { %v1607_v44 = vadd.f32 %v1606_v62, %v5277_v18  ;;  %v5377_v50 = vadd.f32 %v3678_v1, %v1592_v15  ;;  %v1608_v6 = vpop.f32.mrb[85].mxu0  ;;  %v1811_v20 = vpop.f32.mrb[119].mxu1 }
 0x28c   : > { %v5379_v42 = vadd.f32 %v1811_v20, %v1587_v55 }
 0x28e   : > { %v1611_v2 = vpop.f32.mrb[86].mxu0  ;;  %v3681_v11 = vpop.f32.mrb[120].mxu1 }
 0x28f   : > { %v1612_v8 = vadd.f32 %v1611_v2, %v5283_v60  ;;  %v5382_v26 = vadd.f32 %v3681_v11, %v1602_v56  ;;  %v1613_v45 = vpop.f32.mrb[87].mxu0  ;;  %v1821_v13 = vpop.f32.mrb[121].mxu1 }
 0x290   : > { %v5384_v59 = vadd.f32 %v1821_v13, %v1597_v12 }
 0x292   : > { %v1616_v46 = vpop.f32.mrb[88].mxu0  ;;  %v3684_v28 = vpop.f32.mrb[122].mxu1 }
 0x293   : > { %v1617_v18 = vadd.f32 %v1616_v46, %v5289_v61  ;;  %v5387_v24 = vadd.f32 %v3684_v28, %v1612_v8  ;;  %v1618_v4 = vpop.f32.mrb[89].mxu0  ;;  %v1831_v34 = vpop.f32.mrb[123].mxu1 }
 0x294   : > { %v5389_v55 = vadd.f32 %v1831_v34, %v1607_v44 }
 0x296   : > { %v1621_v63 = vpop.f32.mrb[90].mxu0  ;;  %v3687_v36 = vpop.f32.mrb[124].mxu1 }
 0x297   : > { %v1622_v60 = vadd.f32 %v1621_v63, %v5295_v38  ;;  %v1623_v0 = vpop.f32.mrb[91].mxu0  ;;  %v1841_v15 = vpop.f32.mrb[125].mxu1 }
 0x298   : > { %v5392_v33 = vadd.f32 %v1841_v15, %v1617_v18 }
 0x299   : > { %v5394_v10 = vadd.f32 %v3687_v36, %v1622_v60 }
 0x29a   : > { %v1626_v41 = vpop.f32.mrb[92].mxu0  ;;  %v3690_v47 = vpop.f32.mrb[126].mxu1 }
 0x29b   : > { %v1627_v61 = vadd.f32 %v1626_v41, %v5301_v23  ;;  %v1628_v12 = vpop.f32.mrb[93].mxu0  ;;  %v1851_v22 = vpop.f32.mrb[127].mxu1  ;;  %v5405_v23 = vld [vmem:[%s5610_s4] ss:$0 sm:$0xff] }
 0x29d   : > { %v5397_v27 = vadd.f32 %v1851_v22, %v1627_v61 }
 0x29e   : > { %v1631_v52 = vpop.f32.mrb[94].mxu0  ;;  %v2011_v3 = vpop.f32.mrb[128].mxu1 }
 0x29f   : > { %v1632_v56 = vadd.f32 %v1631_v52, %v5305_v39  ;;  %v1633_v58 = vpop.f32.mrb[95].mxu0  ;;  %v2013_v38 = vpop.f32.mrb[129].mxu1 }
 0x2a1   : > { %v5400_v9 = vadd.f32 %v3690_v47, %v1632_v56 }
 0x2a2   : > { %v2016_v62 = vpop.f32.mrb[130].mxu1  ;;  %v3725_v1 = vpop.f32.mrb[96].mxu0 }
 0x2a3   : > { %v2242_v44 = vadd.f32 %v3725_v1, %v2016_v62  ;;  %v2018_v6 = vpop.f32.mrb[131].mxu1  ;;  %v2236_v20 = vpop.f32.mrb[97].mxu0 }
 0x2a4   : > { %v2237_v2 = vadd.f32 %v2236_v20, %v2011_v3 }
 0x2a5   : > { %v2396_v11 = vadd.f32 %v2242_v44, %v5310_v17 }
 0x2a6   : > { %v2395_v8 = vadd.f32 %v2237_v2, %v5313_v37  ;;  %v2021_v39 = vpop.f32.mrb[132].mxu1  ;;  %v3728_v45 = vpop.f32.mrb[98].mxu0 }
 0x2a7   : > { %v2435_v13 = vadd.f32 %v5405_v23, %v2396_v11  ;;  %v2023_v46 = vpop.f32.mrb[133].mxu1  ;;  %v2246_v28 = vpop.f32.mrb[99].mxu0 }
 0x2a8   : > { %v2247_v18 = vadd.f32 %v2246_v28, %v2021_v39  ;;  %v2434_v4 = vadd.f32 %v5405_v23, %v2395_v8 }
 0x2a9   : > { %v2467_v0 = vmax.f32 %v2435_v13, 0.0 }
 0x2aa   : > { %v2397_v34 = vadd.f32 %v2247_v18, %v5320_v14  ;;  %v2026_v63 = vpop.f32.mrb[134].mxu1  ;;  %v3731_v36 = vpop.f32.mrb[100].mxu0  ;;  %v2466_v60 = vmax.f32 %v2434_v4, 0.0 }
 0x2ab   : > { %v2252_v15 = vadd.f32 %v3728_v45, %v2026_v63  ;;  %v2028_v41 = vpop.f32.mrb[135].mxu1  ;;  %v2256_v17 = vpop.f32.mrb[101].mxu0 }
 0x2ac   : > { %3853 = vmatprep.mubr.f32.mxu0 %v2466_v60  ;;  %v2436_v37 = vadd.f32 %v5405_v23, %v2397_v34 }
 0x2ad   : > { %v2398_v47 = vadd.f32 %v2252_v15, %v5317_v48  ;;  %3854 = vmatmul.mubr.f32.vlgmr.msra.gmra.mrb[122].mxu0 %v2467_v0 }
 0x2ae   : > { %v2031_v61 = vpop.f32.mrb[136].mxu1  ;;  %v3734_v12 = vpop.f32.mrb[102].mxu0  ;;  %v2468_v22 = vmax.f32 %v2436_v37, 0.0 }
 0x2af   : > { %v2257_v52 = vadd.f32 %v2256_v17, %v2031_v61  ;;  %v2033_v3 = vpop.f32.mrb[137].mxu1  ;;  %v2266_v56 = vpop.f32.mrb[103].mxu0  ;;  %v2437_v14 = vadd.f32 %v5405_v23, %v2398_v47 }
 0x2b0   : > { %3856 = vmatprep.mubr.f32.mxu0 %v2468_v22 }
 0x2b1   : > { %v2399_v58 = vadd.f32 %v2257_v52, %v5327_v16  ;;  %v2469_v38 = vmax.f32 %v2437_v14, 0.0 }
 0x2b2   : > { %v2036_v62 = vpop.f32.mrb[138].mxu1  ;;  %v3737_v1 = vpop.f32.mrb[104].mxu0 }
 0x2b3   : > { %v2262_v44 = vadd.f32 %v3731_v36, %v2036_v62  ;;  %v2038_v6 = vpop.f32.mrb[139].mxu1  ;;  %v2276_v20 = vpop.f32.mrb[105].mxu0  ;;  %3857 = vmatmul.mubr.f32.gmra.mrb[124].mxu0 %v2469_v38  ;;  %v2438_v48 = vadd.f32 %v5405_v23, %v2399_v58 }
 0x2b5   : > { %v2400_v2 = vadd.f32 %v2262_v44, %v5324_v5  ;;  %v2470_v11 = vmax.f32 %v2438_v48, 0.0 }
 0x2b6   : > { %v2041_v8 = vpop.f32.mrb[140].mxu1  ;;  %v3740_v39 = vpop.f32.mrb[106].mxu0 }
 0x2b7   : > { %v2267_v45 = vadd.f32 %v2266_v56, %v2041_v8  ;;  %v2043_v13 = vpop.f32.mrb[141].mxu1  ;;  %v2286_v46 = vpop.f32.mrb[107].mxu0  ;;  %3859 = vmatprep.mubr.f32.mxu0 %v2470_v11  ;;  %v2439_v16 = vadd.f32 %v5405_v23, %v2400_v2 }
 0x2b9   : > { %v2401_v28 = vadd.f32 %v2267_v45, %v5334_v19  ;;  %v2471_v18 = vmax.f32 %v2439_v16, 0.0 }
 0x2ba   : > { %v2046_v4 = vpop.f32.mrb[142].mxu1  ;;  %v3743_v34 = vpop.f32.mrb[108].mxu0 }
 0x2bb   : > { %v2272_v63 = vadd.f32 %v3734_v12, %v2046_v4  ;;  %v2048_v36 = vpop.f32.mrb[143].mxu1  ;;  %v2296_v60 = vpop.f32.mrb[109].mxu0  ;;  %3860 = vmatmul.mubr.f32.gmra.mrb[126].mxu0 %v2471_v18  ;;  %v2440_v5 = vadd.f32 %v5405_v23, %v2401_v28 }
 0x2bd   : > { %v2402_v0 = vadd.f32 %v2272_v63, %v5331_v43  ;;  %v2472_v15 = vmax.f32 %v2440_v5, 0.0 }
 0x2be   : > { %v2051_v41 = vpop.f32.mrb[144].mxu1  ;;  %v3746_v17 = vpop.f32.mrb[110].mxu0 }
 0x2bf   : > { %v2277_v37 = vadd.f32 %v2276_v20, %v2051_v41  ;;  %v2053_v47 = vpop.f32.mrb[145].mxu1  ;;  %v2306_v61 = vpop.f32.mrb[111].mxu0  ;;  %3862 = vmatprep.mubr.f32.mxu0 %v2472_v15  ;;  %v2441_v19 = vadd.f32 %v5405_v23, %v2402_v0 }
 0x2c1   : > { %v2403_v22 = vadd.f32 %v2277_v37, %v5341_v7  ;;  %v2473_v52 = vmax.f32 %v2441_v19, 0.0 }
 0x2c2   : > { %v2056_v12 = vpop.f32.mrb[146].mxu1  ;;  %v5424_v3 = vpop.f32.mrb[112].mxu0 }
 0x2c3   : > { %v2282_v56 = vadd.f32 %v3737_v1, %v2056_v12  ;;  %v2058_v14 = vpop.f32.mrb[147].mxu1  ;;  %v2316_v58 = vpop.f32.mrb[113].mxu0  ;;  %3863 = vmatmul.mubr.f32.gmra.mrb[128].mxu0 %v2473_v52  ;;  %v2442_v43 = vadd.f32 %v5405_v23, %v2403_v22 }
 0x2c5   : > { %v2404_v38 = vadd.f32 %v2282_v56, %v5338_v40  ;;  %v2474_v62 = vmax.f32 %v2442_v43, 0.0 }
 0x2c6   : > { %v2061_v44 = vpop.f32.mrb[148].mxu1  ;;  %v5428_v6 = vpop.f32.mrb[114].mxu0 }
 0x2c7   : > { %v2287_v20 = vadd.f32 %v2286_v46, %v2061_v44  ;;  %v2063_v48 = vpop.f32.mrb[149].mxu1  ;;  %v2326_v2 = vpop.f32.mrb[115].mxu0  ;;  %3865 = vmatprep.mubr.f32.mxu0 %v2474_v62  ;;  %v2443_v7 = vadd.f32 %v5405_v23, %v2404_v38 }
 0x2c9   : > { %v2405_v11 = vadd.f32 %v2287_v20, %v5348_v53  ;;  %v2475_v1 = vmax.f32 %v2443_v7, 0.0 }
 0x2ca   : > { %v2066_v8 = vpop.f32.mrb[150].mxu1  ;;  %v5432_v45 = vpop.f32.mrb[116].mxu0 }
 0x2cb   : > { %v2292_v13 = vadd.f32 %v3740_v39, %v2066_v8  ;;  %v2068_v16 = vpop.f32.mrb[151].mxu1  ;;  %v5434_v28 = vpop.f32.mrb[117].mxu0  ;;  %3866 = vmatmul.mubr.f32.gmra.mrb[130].mxu0 %v2475_v1  ;;  %v2444_v40 = vadd.f32 %v5405_v23, %v2405_v11 }
 0x2cd   : > { %v2406_v46 = vadd.f32 %v2292_v13, %v5345_v31  ;;  %v2476_v18 = vmax.f32 %v2444_v40, 0.0 }
 0x2ce   : > { %v2071_v4 = vpop.f32.mrb[152].mxu1  ;;  %v5438_v63 = vpop.f32.mrb[118].mxu0 }
 0x2cf   : > { %v2297_v36 = vadd.f32 %v2296_v60, %v2071_v4  ;;  %v2073_v5 = vpop.f32.mrb[153].mxu1  ;;  %v5440_v53 = vpop.f32.mrb[119].mxu0  ;;  %3868 = vmatprep.mubr.f32.mxu0 %v2476_v18  ;;  %v2445_v0 = vadd.f32 %v5405_v23, %v2406_v46 }
 0x2d1   : > { %v2407_v39 = vadd.f32 %v2297_v36, %v5354_v29  ;;  %v2477_v15 = vmax.f32 %v2445_v0, 0.0 }
 0x2d2   : > { %v2076_v41 = vpop.f32.mrb[154].mxu1  ;;  %v5444_v37 = vpop.f32.mrb[120].mxu0 }
 0x2d3   : > { %v2302_v47 = vadd.f32 %v3743_v34, %v2076_v41  ;;  %v2078_v19 = vpop.f32.mrb[155].mxu1  ;;  %v5446_v31 = vpop.f32.mrb[121].mxu0  ;;  %3869 = vmatmul.mubr.f32.gmra.mrb[132].mxu0 %v2477_v15  ;;  %v2446_v22 = vadd.f32 %v5405_v23, %v2407_v39 }
 0x2d5   : > { %v2408_v60 = vadd.f32 %v2302_v47, %v5351_v35  ;;  %v2478_v52 = vmax.f32 %v2446_v22, 0.0 }
 0x2d6   : > { %v2081_v12 = vpop.f32.mrb[156].mxu1 }
 0x2d7   : > { %v2307_v56 = vadd.f32 %v2306_v61, %v2081_v12  ;;  %v2083_v14 = vpop.f32.mrb[157].mxu1  ;;  %3871 = vmatprep.mubr.f32.mxu0 %v2478_v52  ;;  %v2447_v29 = vadd.f32 %v5405_v23, %v2408_v60 }
 0x2d9   : > { %v2409_v43 = vadd.f32 %v2307_v56, %v5359_v30  ;;  %v2479_v38 = vmax.f32 %v2447_v29, 0.0 }
 0x2da   : > { %v2086_v62 = vpop.f32.mrb[158].mxu1 }
 0x2db   : > { %v2312_v34 = vadd.f32 %v3746_v17, %v2086_v62  ;;  %v2088_v44 = vpop.f32.mrb[159].mxu1  ;;  %3872 = vmatmul.mubr.f32.gmra.mrb[134].mxu0 %v2479_v38  ;;  %v2448_v20 = vadd.f32 %v5405_v23, %v2409_v43 }
 0x2dd   : > { %v2410_v48 = vadd.f32 %v2312_v34, %v5357_v32  ;;  %v2480_v7 = vmax.f32 %v2448_v20, 0.0 }
 0x2de   : > { %v2091_v35 = vpop.f32.mrb[160].mxu1 }
 0x2df   : > { %v2317_v11 = vadd.f32 %v2316_v58, %v2091_v35  ;;  %v2093_v1 = vpop.f32.mrb[161].mxu1  ;;  %3874 = vmatprep.mubr.f32.mxu0 %v2480_v7  ;;  %v2449_v61 = vadd.f32 %v5405_v23, %v2410_v48 }
 0x2e1   : > { %v2411_v8 = vadd.f32 %v2317_v11, %v5364_v25  ;;  %v2481_v13 = vmax.f32 %v2449_v61, 0.0 }
 0x2e2   : > { %v2096_v30 = vpop.f32.mrb[162].mxu1 }
 0x2e3   : > { %v2322_v16 = vadd.f32 %v5424_v3, %v2096_v30  ;;  %v2098_v17 = vpop.f32.mrb[163].mxu1  ;;  %3875 = vmatmul.mubr.f32.gmra.mrb[136].mxu0 %v2481_v13  ;;  %v2450_v40 = vadd.f32 %v5405_v23, %v2411_v8 }
 0x2e5   : > { %v2412_v46 = vadd.f32 %v2322_v16, %v5362_v49  ;;  %v2482_v32 = vmax.f32 %v2450_v40, 0.0 }
 0x2e6   : > { %v2101_v18 = vpop.f32.mrb[164].mxu1 }
 0x2e7   : > { %v2327_v4 = vadd.f32 %v2326_v2, %v2101_v18  ;;  %v2103_v58 = vpop.f32.mrb[165].mxu1  ;;  %3877 = vmatprep.mubr.f32.mxu0 %v2482_v32  ;;  %v2451_v36 = vadd.f32 %v5405_v23, %v2412_v46 }
 0x2e9   : > { %v2413_v5 = vadd.f32 %v2327_v4, %v5369_v54  ;;  %v2483_v25 = vmax.f32 %v2451_v36, 0.0 }
 0x2ea   : > { %v2106_v0 = vpop.f32.mrb[166].mxu1 }
 0x2eb   : > { %v2332_v39 = vadd.f32 %v5428_v6, %v2106_v0  ;;  %v2108_v3 = vpop.f32.mrb[167].mxu1  ;;  %3878 = vmatmul.mubr.f32.gmra.mrb[138].mxu0 %v2483_v25  ;;  %v2452_v15 = vadd.f32 %v5405_v23, %v2413_v5 }
 0x2ed   : > { %v2414_v41 = vadd.f32 %v2332_v39, %v5367_v51  ;;  %v2484_v49 = vmax.f32 %v2452_v15, 0.0 }
 0x2ee   : > { %v2111_v47 = vpop.f32.mrb[168].mxu1 }
 0x2ef   : > { %v2337_v2 = vadd.f32 %v5434_v28, %v2111_v47  ;;  %v2113_v19 = vpop.f32.mrb[169].mxu1  ;;  %3880 = vmatprep.mubr.f32.mxu0 %v2484_v49  ;;  %v2453_v22 = vadd.f32 %v5405_v23, %v2414_v41 }
 0x2f1   : > { %v2415_v54 = vadd.f32 %v2337_v2, %v5374_v21  ;;  %v2485_v60 = vmax.f32 %v2453_v22, 0.0 }
 0x2f2   : > { %v2116_v52 = vpop.f32.mrb[170].mxu1 }
 0x2f3   : > { %v2342_v6 = vadd.f32 %v5432_v45, %v2116_v52  ;;  %v2118_v12 = vpop.f32.mrb[171].mxu1  ;;  %3881 = vmatmul.mubr.f32.gmra.mrb[140].mxu0 %v2485_v60  ;;  %v2454_v56 = vadd.f32 %v5405_v23, %v2415_v54 }
 0x2f5   : > { %v2416_v51 = vadd.f32 %v2342_v6, %v5372_v57  ;;  %v2486_v14 = vmax.f32 %v2454_v56, 0.0 }
 0x2f6   : > { %v2121_v29 = vpop.f32.mrb[172].mxu1 }
 0x2f7   : > { %v2347_v28 = vadd.f32 %v5440_v53, %v2121_v29  ;;  %v2123_v43 = vpop.f32.mrb[173].mxu1  ;;  %3883 = vmatprep.mubr.f32.mxu0 %v2486_v14  ;;  %v2455_v38 = vadd.f32 %v5405_v23, %v2416_v51 }
 0x2f9   : > { %v2417_v21 = vadd.f32 %v2347_v28, %v5379_v42  ;;  %v2487_v62 = vmax.f32 %v2455_v38, 0.0 }
 0x2fa   : > { %v2126_v34 = vpop.f32.mrb[174].mxu1 }
 0x2fb   : > { %v2352_v45 = vadd.f32 %v5438_v63, %v2126_v34  ;;  %v2128_v44 = vpop.f32.mrb[175].mxu1  ;;  %3884 = vmatmul.mubr.f32.gmra.mrb[142].mxu0 %v2487_v62  ;;  %v2456_v20 = vadd.f32 %v5405_v23, %v2417_v21 }
 0x2fd   : > { %v2418_v57 = vadd.f32 %v2352_v45, %v5377_v50  ;;  %v2488_v48 = vmax.f32 %v2456_v20, 0.0 }
 0x2fe   : > { %v2131_v7 = vpop.f32.mrb[176].mxu1 }
 0x2ff   : > { %v2357_v53 = vadd.f32 %v5446_v31, %v2131_v7  ;;  %v2133_v35 = vpop.f32.mrb[177].mxu1  ;;  %3886 = vmatprep.mubr.f32.mxu0 %v2488_v48  ;;  %v2457_v11 = vadd.f32 %v5405_v23, %v2418_v57 }
 0x301   : > { %v2419_v42 = vadd.f32 %v2357_v53, %v5384_v59  ;;  %v2489_v1 = vmax.f32 %v2457_v11, 0.0 }
 0x302   : > { %v2136_v61 = vpop.f32.mrb[178].mxu1 }
 0x303   : > { %v2362_v63 = vadd.f32 %v5444_v37, %v2136_v61  ;;  %v2138_v8 = vpop.f32.mrb[179].mxu1  ;;  %3887 = vmatmul.mubr.f32.gmra.mrb[144].mxu0 %v2489_v1  ;;  %v2458_v13 = vadd.f32 %v5405_v23, %v2419_v42 }
 0x305   : > { %v2420_v50 = vadd.f32 %v2362_v63, %v5382_v26  ;;  %v2490_v30 = vmax.f32 %v2458_v13, 0.0 }
 0x306   : > { %v2141_v16 = vpop.f32.mrb[180].mxu1 }
 0x307   : > { %v2143_v17 = vpop.f32.mrb[181].mxu1  ;;  %3889 = vmatprep.mubr.f32.mxu0 %v2490_v30  ;;  %v2459_v31 = vadd.f32 %v5405_v23, %v2420_v50 }
 0x309   : > { %v2491_v40 = vmax.f32 %v2459_v31, 0.0 }
 0x30a   : > { %v2146_v46 = vpop.f32.mrb[182].mxu1 }
 0x30b   : > { %v2148_v32 = vpop.f32.mrb[183].mxu1  ;;  %3890 = vmatmul.mubr.f32.gmra.mrb[146].mxu0 %v2491_v40 }
 0x30e   : > { %v2151_v59 = vpop.f32.mrb[184].mxu1 }
 0x30f   : > { %v2153_v18 = vpop.f32.mrb[185].mxu1 }
 0x312   : > { %v2156_v4 = vpop.f32.mrb[186].mxu1 }
 0x313   : > { %v2158_v37 = vpop.f32.mrb[187].mxu1 }
 0x316   : > { %v2161_v58 = vpop.f32.mrb[188].mxu1 }
 0x317   : > { %v2163_v36 = vpop.f32.mrb[189].mxu1 }
 0x31a   : > { %v2166_v5 = vpop.f32.mrb[190].mxu1 }
 0x31b   : > { %v2168_v25 = vpop.f32.mrb[191].mxu1 }
 0x31e   : > { %v3764_v0 = vpop.f32.mrb[192].mxu1 }
 0x31f   : > { %v2372_v26 = vadd.f32 %v3764_v0, %v2146_v46  ;;  %v2366_v39 = vpop.f32.mrb[193].mxu1 }
 0x320   : > { %v2367_v3 = vadd.f32 %v2366_v39, %v2141_v16 }
 0x321   : > { %v2422_v15 = vadd.f32 %v2372_v26, %v5387_v24 }
 0x322   : > { %v2421_v41 = vadd.f32 %v2367_v3, %v5389_v55  ;;  %v3767_v49 = vpop.f32.mrb[194].mxu1 }
 0x323   : > { %v2382_v47 = vadd.f32 %v3767_v49, %v2156_v4  ;;  %v2376_v2 = vpop.f32.mrb[195].mxu1  ;;  %v2461_v19 = vadd.f32 %v5405_v23, %v2422_v15 }
 0x324   : > { %v2377_v22 = vadd.f32 %v2376_v2, %v2151_v59  ;;  %v2460_v54 = vadd.f32 %v5405_v23, %v2421_v41 }
 0x325   : > { %v2424_v60 = vadd.f32 %v2382_v47, %v5394_v10  ;;  %v2493_v14 = vmax.f32 %v2461_v19, 0.0 }
 0x326   : > { %v2423_v52 = vadd.f32 %v2377_v22, %v5392_v33  ;;  %v3770_v6 = vpop.f32.mrb[196].mxu1  ;;  %v2492_v12 = vmax.f32 %v2460_v54, 0.0 }
 0x327   : > { %v2392_v56 = vadd.f32 %v3770_v6, %v2166_v5  ;;  %v2386_v51 = vpop.f32.mrb[197].mxu1  ;;  %v2463_v24 = vadd.f32 %v5405_v23, %v2424_v60 }
 0x328   : > { %v2387_v55 = vadd.f32 %v2386_v51, %v2161_v58  ;;  %3892 = vmatprep.mubr.f32.mxu0 %v2492_v12  ;;  %v2462_v29 = vadd.f32 %v5405_v23, %v2423_v52 }
 0x329   : > { %v2426_v28 = vadd.f32 %v2392_v56, %v5400_v9  ;;  %3893 = vmatmul.mubr.f32.gmra.mrb[148].mxu0 %v2493_v14  ;;  %v2495_v38 = vmax.f32 %v2463_v24, 0.0  ;;  %v5498_v9 = vld [vmem:[%s5612_s6] ss:$0 sm:$0xff] }
 0x32a   : > { %v2425_v43 = vadd.f32 %v2387_v55, %v5397_v27  ;;  %v2494_v10 = vmax.f32 %v2462_v29, 0.0 }
 0x32b   : > { %v2465_v33 = vadd.f32 %v5405_v23, %v2426_v28 }
 0x32c   : > { %3895 = vmatprep.mubr.f32.mxu0 %v2494_v10  ;;  %v2464_v21 = vadd.f32 %v5405_v23, %v2425_v43 }
 0x32d   : > { %3896 = vmatmul.mubr.f32.gmra.mrb[150].mxu0 %v2495_v38  ;;  %v2497_v34 = vmax.f32 %v2465_v33, 0.0 }
 0x32e   : > { %v2496_v62 = vmax.f32 %v2464_v21, 0.0 }
 0x330   : > { %3898 = vmatprep.mubr.f32.mxu0 %v2496_v62 }
 0x331   : > { %3899 = vmatmul.mubr.f32.gmra.mrb[152].mxu0 %v2497_v34 }
 0x380   : > { %v3855_v45 = vpop.f32.mrb[122].mxu0 }
 0x381   : > { %v2976_v27 = vadd.f32 %v3855_v45, %v5498_v9  ;;  %v2809_v44 = vpop.f32.mrb[123].mxu0 }
 0x382   : > { %v2975_v23 = vadd.f32 %v5498_v9, %v2809_v44 }
 0x383   : > { %v3008_v20 = vmax.f32 %v2976_v27, 0.0 }
 0x384   : > { %v3007_v57 = vmax.f32 %v2975_v23, 0.0 }
 0x385   : > { %3041 = vst.msk [vmem:[%s5506_s14 + $0x8] sm:$0xff] %vm3039_vm2, %v3008_v20 }
 0x386   : > { %3040 = vst.msk [vmem:[%s5506_s14] sm:$0xff] %vm3039_vm2, %v3007_v57  ;;  %v3858_v48 = vpop.f32.mrb[124].mxu0 }
 0x387   : > { %v2978_v7 = vadd.f32 %v3858_v48, %v5498_v9  ;;  %v2819_v53 = vpop.f32.mrb[125].mxu0 }
 0x388   : > { %v2977_v35 = vadd.f32 %v5498_v9, %v2819_v53 }
 0x389   : > { %v3010_v11 = vmax.f32 %v2978_v7, 0.0 }
 0x38a   : > { %v3009_v42 = vmax.f32 %v2977_v35, 0.0 }
 0x38b   : > { %3043 = vst.msk [vmem:[%s5506_s14 + $0x18] sm:$0xff] %vm3039_vm2, %v3010_v11 }
 0x38c   : > { %3042 = vst.msk [vmem:[%s5506_s14 + $0x10] sm:$0xff] %vm3039_vm2, %v3009_v42 }
 0x38e   : > { %v3861_v1 = vpop.f32.mrb[126].mxu0 }
 0x38f   : > { %v2980_v61 = vadd.f32 %v3861_v1, %v5498_v9  ;;  %v2829_v63 = vpop.f32.mrb[127].mxu0 }
 0x390   : > { %v2979_v8 = vadd.f32 %v5498_v9, %v2829_v63 }
 0x391   : > { %v3012_v13 = vmax.f32 %v2980_v61, 0.0 }
 0x392   : > { %v3011_v50 = vmax.f32 %v2979_v8, 0.0 }
 0x393   : > { %3045 = vst.msk [vmem:[%s5506_s14 + $0x28] sm:$0xff] %vm3039_vm2, %v3012_v13 }
 0x394   : > { %3044 = vst.msk [vmem:[%s5506_s14 + $0x20] sm:$0xff] %vm3039_vm2, %v3011_v50 }
 0x396   : > { %v3864_v30 = vpop.f32.mrb[128].mxu0 }
 0x397   : > { %v2982_v16 = vadd.f32 %v3864_v30, %v5498_v9  ;;  %v2839_v17 = vpop.f32.mrb[129].mxu0 }
 0x398   : > { %v2981_v31 = vadd.f32 %v5498_v9, %v2839_v17 }
 0x399   : > { %v3014_v40 = vmax.f32 %v2982_v16, 0.0 }
 0x39a   : > { %v3013_v46 = vmax.f32 %v2981_v31, 0.0 }
 0x39b   : > { %3047 = vst.msk [vmem:[%s5506_s14 + $0x38] sm:$0xff] %vm3039_vm2, %v3014_v40 }
 0x39c   : > { %3046 = vst.msk [vmem:[%s5506_s14 + $0x30] sm:$0xff] %vm3039_vm2, %v3013_v46 }
 0x39e   : > { %v3867_v32 = vpop.f32.mrb[130].mxu0 }
 0x39f   : > { %v2984_v59 = vadd.f32 %v3867_v32, %v5498_v9  ;;  %v2849_v18 = vpop.f32.mrb[131].mxu0 }
 0x3a0   : > { %v2983_v4 = vadd.f32 %v5498_v9, %v2849_v18 }
 0x3a1   : > { %v3016_v37 = vmax.f32 %v2984_v59, 0.0 }
 0x3a2   : > { %v3015_v58 = vmax.f32 %v2983_v4, 0.0 }
 0x3a3   : > { %3049 = vst.msk [vmem:[%s5506_s14 + $0x48] sm:$0xff] %vm3039_vm2, %v3016_v37 }
 0x3a4   : > { %3048 = vst.msk [vmem:[%s5506_s14 + $0x40] sm:$0xff] %vm3039_vm2, %v3015_v58 }
 0x3a6   : > { %v3870_v36 = vpop.f32.mrb[132].mxu0 }
 0x3a7   : > { %v2986_v5 = vadd.f32 %v3870_v36, %v5498_v9  ;;  %v2859_v25 = vpop.f32.mrb[133].mxu0 }
 0x3a8   : > { %v2985_v0 = vadd.f32 %v5498_v9, %v2859_v25 }
 0x3a9   : > { %v3018_v26 = vmax.f32 %v2986_v5, 0.0 }
 0x3aa   : > { %v3017_v39 = vmax.f32 %v2985_v0, 0.0 }
 0x3ab   : > { %3051 = vst.msk [vmem:[%s5506_s14 + $0x58] sm:$0xff] %vm3039_vm2, %v3018_v26 }
 0x3ac   : > { %3050 = vst.msk [vmem:[%s5506_s14 + $0x50] sm:$0xff] %vm3039_vm2, %v3017_v39 }
 0x3ae   : > { %v3873_v3 = vpop.f32.mrb[134].mxu0 }
 0x3af   : > { %v2988_v15 = vadd.f32 %v3873_v3, %v5498_v9  ;;  %v2869_v41 = vpop.f32.mrb[135].mxu0 }
 0x3b0   : > { %v2987_v49 = vadd.f32 %v5498_v9, %v2869_v41 }
 0x3b1   : > { %v3020_v47 = vmax.f32 %v2988_v15, 0.0 }
 0x3b2   : > { %v3019_v2 = vmax.f32 %v2987_v49, 0.0 }
 0x3b3   : > { %3053 = vst.msk [vmem:[%s5506_s14 + $0x68] sm:$0xff] %vm3039_vm2, %v3020_v47 }
 0x3b4   : > { %3052 = vst.msk [vmem:[%s5506_s14 + $0x60] sm:$0xff] %vm3039_vm2, %v3019_v2 }
 0x3b6   : > { %v3876_v19 = vpop.f32.mrb[136].mxu0 }
 0x3b7   : > { %v2990_v22 = vadd.f32 %v3876_v19, %v5498_v9  ;;  %v2879_v54 = vpop.f32.mrb[137].mxu0 }
 0x3b8   : > { %v2989_v60 = vadd.f32 %v5498_v9, %v2879_v54 }
 0x3b9   : > { %v3022_v52 = vmax.f32 %v2990_v22, 0.0 }
 0x3ba   : > { %v3021_v6 = vmax.f32 %v2989_v60, 0.0 }
 0x3bb   : > { %3055 = vst.msk [vmem:[%s5506_s14 + $0x78] sm:$0xff] %vm3039_vm2, %v3022_v52 }
 0x3bc   : > { %3054 = vst.msk [vmem:[%s5506_s14 + $0x70] sm:$0xff] %vm3039_vm2, %v3021_v6 }
 0x3be   : > { %v3879_v12 = vpop.f32.mrb[138].mxu0 }
 0x3bf   : > { %v2992_v56 = vadd.f32 %v3879_v12, %v5498_v9  ;;  %v2889_v51 = vpop.f32.mrb[139].mxu0 }
 0x3c0   : > { %v2991_v14 = vadd.f32 %v5498_v9, %v2889_v51 }
 0x3c1   : > { %v3024_v24 = vmax.f32 %v2992_v56, 0.0 }
 0x3c2   : > { %v3023_v55 = vmax.f32 %v2991_v14, 0.0 }
 0x3c3   : > { %3057 = vst.msk [vmem:[%s5506_s14 + $0x88] sm:$0xff] %vm3039_vm2, %v3024_v24 }
 0x3c4   : > { %3056 = vst.msk [vmem:[%s5506_s14 + $0x80] sm:$0xff] %vm3039_vm2, %v3023_v55 }
 0x3c6   : > { %v3882_v29 = vpop.f32.mrb[140].mxu0 }
 0x3c7   : > { %v2994_v28 = vadd.f32 %v3882_v29, %v5498_v9  ;;  %v2899_v43 = vpop.f32.mrb[141].mxu0 }
 0x3c8   : > { %v2993_v10 = vadd.f32 %v5498_v9, %v2899_v43 }
 0x3c9   : > { %v3026_v38 = vmax.f32 %v2994_v28, 0.0 }
 0x3ca   : > { %v3025_v33 = vmax.f32 %v2993_v10, 0.0 }
 0x3cb   : > { %3059 = vst.msk [vmem:[%s5506_s14 + $0x98] sm:$0xff] %vm3039_vm2, %v3026_v38 }
 0x3cc   : > { %3058 = vst.msk [vmem:[%s5506_s14 + $0x90] sm:$0xff] %vm3039_vm2, %v3025_v33 }
 0x3ce   : > { %v3885_v21 = vpop.f32.mrb[142].mxu0 }
 0x3cf   : > { %v2996_v62 = vadd.f32 %v3885_v21, %v5498_v9  ;;  %v2909_v34 = vpop.f32.mrb[143].mxu0 }
 0x3d0   : > { %v2995_v45 = vadd.f32 %v5498_v9, %v2909_v34 }
 0x3d1   : > { %v3028_v27 = vmax.f32 %v2996_v62, 0.0 }
 0x3d2   : > { %v3027_v44 = vmax.f32 %v2995_v45, 0.0 }
 0x3d3   : > { %3061 = vst.msk [vmem:[%s5506_s14 + $0xa8] sm:$0xff] %vm3039_vm2, %v3028_v27 }
 0x3d4   : > { %3060 = vst.msk [vmem:[%s5506_s14 + $0xa0] sm:$0xff] %vm3039_vm2, %v3027_v44 }
 0x3d6   : > { %v3888_v23 = vpop.f32.mrb[144].mxu0 }
 0x3d7   : > { %v2998_v20 = vadd.f32 %v3888_v23, %v5498_v9  ;;  %v2919_v57 = vpop.f32.mrb[145].mxu0 }
 0x3d8   : > { %v2997_v48 = vadd.f32 %v5498_v9, %v2919_v57 }
 0x3d9   : > { %v3030_v7 = vmax.f32 %v2998_v20, 0.0 }
 0x3da   : > { %v3029_v53 = vmax.f32 %v2997_v48, 0.0 }
 0x3db   : > { %3063 = vst.msk [vmem:[%s5506_s14 + $0xb8] sm:$0xff] %vm3039_vm2, %v3030_v7 }
 0x3dc   : > { %3062 = vst.msk [vmem:[%s5506_s14 + $0xb0] sm:$0xff] %vm3039_vm2, %v3029_v53 }
 0x3de   : > { %v3891_v35 = vpop.f32.mrb[146].mxu0 }
 0x3df   : > { %v3000_v11 = vadd.f32 %v3891_v35, %v5498_v9  ;;  %v2929_v42 = vpop.f32.mrb[147].mxu0 }
 0x3e0   : > { %v2999_v1 = vadd.f32 %v5498_v9, %v2929_v42 }
 0x3e1   : > { %v3032_v61 = vmax.f32 %v3000_v11, 0.0 }
 0x3e2   : > { %v3031_v63 = vmax.f32 %v2999_v1, 0.0 }
 0x3e3   : > { %3065 = vst.msk [vmem:[%s5506_s14 + $0xc8] sm:$0xff] %vm3039_vm2, %v3032_v61 }
 0x3e4   : > { %3064 = vst.msk [vmem:[%s5506_s14 + $0xc0] sm:$0xff] %vm3039_vm2, %v3031_v63 }
 0x3fc   : > { %v3894_v8 = vpop.f32.mrb[148].mxu0 }
 0x3fd   : > { %v3002_v13 = vadd.f32 %v3894_v8, %v5498_v9  ;;  %v2939_v50 = vpop.f32.mrb[149].mxu0 }
 0x3fe   : > { %v3001_v30 = vadd.f32 %v5498_v9, %v2939_v50 }
 0x3ff   : > { %v3034_v16 = vmax.f32 %v3002_v13, 0.0 }
 0x400   : > { %v3033_v17 = vmax.f32 %v3001_v30, 0.0  ;;  %v3897_v31 = vpop.f32.mrb[150].mxu0 }
 0x401   : > { %3067 = vst.msk [vmem:[%s5506_s14 + $0xd8] sm:$0xff] %vm3039_vm2, %v3034_v16  ;;  %v3004_v40 = vadd.f32 %v3897_v31, %v5498_v9  ;;  %v2949_v46 = vpop.f32.mrb[151].mxu0 }
 0x402   : > { %3066 = vst.msk [vmem:[%s5506_s14 + $0xd0] sm:$0xff] %vm3039_vm2, %v3033_v17  ;;  %v3003_v32 = vadd.f32 %v5498_v9, %v2949_v46 }
 0x403   : > { %v3036_v59 = vmax.f32 %v3004_v40, 0.0 }
 0x404   : > { %v3035_v18 = vmax.f32 %v3003_v32, 0.0  ;;  %v3900_v4 = vpop.f32.mrb[152].mxu0 }
 0x405   : > { %3069 = vst.msk [vmem:[%s5506_s14 + $0xe8] sm:$0xff] %vm3039_vm2, %v3036_v59  ;;  %v3006_v37 = vadd.f32 %v3900_v4, %v5498_v9  ;;  %v2959_v58 = vpop.f32.mrb[153].mxu0 }
 0x406   : > { %3068 = vst.msk [vmem:[%s5506_s14 + $0xe0] sm:$0xff] %vm3039_vm2, %v3035_v18  ;;  %v3005_v36 = vadd.f32 %v5498_v9, %v2959_v58 }
 0x407   : > { %v3038_v5 = vmax.f32 %v3006_v37, 0.0 }
 0x408   : > { %v3037_v25 = vmax.f32 %v3005_v36, 0.0 }
 0x409   : > { %3071 = vst.msk [vmem:[%s5506_s14 + $0xf8] sm:$0xff] %vm3039_vm2, %v3038_v5 }
 0x40a   : > { %3070 = vst.msk [vmem:[%s5506_s14 + $0xf0] sm:$0xff] %vm3039_vm2, %v3037_v25 }
 0x40b PF: > { %s19_s27 = sadd.s32 1, %s4315_s27  }
 0x40c   : > { %p16_p3 = scmp.ge.s32.totalorder %s19_s27, 4  }
 0x40e   :  { %18 = sbr.rel (!%p16_p3) target bundleno = 1 (0x1), region = 91 }
 0x415   :  { %3093 = vsyncpa [#allocation4], 1 }
 0x416   :  { %3095 = vsyncpa [#allocation4 + $0x1], 1 }

</bundles_post_ra>
